<compile_context>
chip_gen: v5e
topology: v5e:2x2
jax: 0.10.0
libtpu: 0.0.40
codegen_flags: <defaults>
</compile_context>

<pallas_src>
import functools

import jax
import jax.numpy as jnp
from jax import lax
from jax.experimental import pallas as pl
from jax.experimental.pallas import tpu as pltpu

# ----------------------------- config ---------------------------------------
D_MODEL = 32          # config.hidden_size
N_LAYER = 2           # config.n_layer (small for the synthetic test)
VOCAB = 84            # config.vocab_size
HEAD_PAD = 128        # per-head lane-padded logits width (lane-dense stores)
N_HEADS = 4
D_STATE = 16
D_CONV = 4
EXPAND = 2
D_INNER = EXPAND * D_MODEL
DT_RANK = max(1, (D_MODEL + 15) // 16)   # = 2
AVG_ELO = 1500.0
EPS = 1e-5

ID_REMAPPER = jnp.array(list(range(78)) + [78, 79, 80, 78, 79, 80],
                        dtype=jnp.int32)


def _silu(x):
    return x * jax.nn.sigmoid(x)


def _rmsnorm(x, w):
    inv = lax.rsqrt(jnp.mean(x * x, axis=-1, keepdims=True) + EPS)
    return x * inv * w


# ------------------- fused forward kernel (single grid step) -----------------
def fused_forward_kernel(ids_ref, e1_ref, e2_ref, emb_ref,
                         wnorm_ref, win_ref, wconv_ref, wxp_ref, wdt_ref,
                         bias_ref, At_ref, wout_ref,
                         normf_ref, wheads_ref,
                         logits_ref,
                         *, batch, seqlen):
    B, L = batch, seqlen
    R = B * L
    S = At_ref.shape[1]          # d_state
    Di = At_ref.shape[2]         # d_inner
    K = wconv_ref.shape[1]       # conv width
    dtr = wdt_ref.shape[1]       # dt_rank
    n_layers = win_ref.shape[0]

    # ---- elo multipliers * token embeddings (fused; exact torch semantics) --
    ids = ids_ref[...]                                 # (R, 1) int32
    e1 = (e1_ref[...] - AVG_ELO) / AVG_ELO             # (R, 1)
    e2 = (e2_ref[...] - AVG_ELO) / AVG_ELO
    m1 = ((ids == 78) | (ids == 79) | (ids == 80)).astype(jnp.float32) * e1
    m1 = m1 + (m1 == 0.0).astype(jnp.float32)
    m2 = ((ids == 81) | (ids == 82) | (ids == 83)).astype(jnp.float32) * e2
    m2 = m2 + (m2 == 0.0).astype(jnp.float32)
    x = emb_ref[...] * (m1 * m2)                       # (R, D) residual stream

    # position-in-sequence per row (batch-major (b*L + t) layout), used to
    # zero the cross-batch wrap-around of the conv rolls.
    row_t = lax.broadcasted_iota(jnp.int32, (B, L, Di), 1).reshape(R, Di)

    for l in range(n_layers):                          # static unroll (N_LAYER)
        wn = wnorm_ref[l]                              # (1, D)
        w_in = win_ref[l]                              # (D, 2*Di)  [w_x | w_z]
        wconv = wconv_ref[l]                           # (K, Di)
        wxp = wxp_ref[l]                               # (Di, dtr+2S)
        wdt = wdt_ref[l]                               # (dtr, Di)
        biases = bias_ref[l]                           # (3, Di)
        b_conv = biases[0:1, :]
        b_dt = biases[1:2, :]
        Dv = biases[2:3, :]
        At = At_ref[l]                                 # (S, Di) = A^T
        w_out = wout_ref[l]                            # (Di, D)

        # RMSNorm + packed in_proj (one lane-dense 128-wide matmul)
        xn = _rmsnorm(x, wn)                           # (R, D)
        xz = jnp.dot(xn, w_in, preferred_element_type=jnp.float32)   # (R, 2Di)
        xc = xz[:, :Di]                                # x path
        z = xz[:, Di:]                                 # gate path

        # depthwise causal conv1d: sublane rotations (XLU) + row mask,
        # no zero-concat copies.  tap offset s uses weight w[K-1-s].
        acc = xc * wconv[K - 1:K, :]
        for s in range(1, K):
            shifted = pltpu.roll(xc, shift=s, axis=0)  # row r <- row r-s
            shifted = jnp.where(row_t >= s, shifted, 0.0)
            acc = acc + shifted * wconv[K - 1 - s:K - s, :]
        xs = _silu(acc + b_conv)                       # (R, Di)

        # packed x_proj -> [dt_low | B | C], then dt_proj + softplus
        xdbl = jnp.dot(xs, wxp, preferred_element_type=jnp.float32)  # (R, dtr+2S)
        dt_low = xdbl[:, :dtr]
        Bm = xdbl[:, dtr:dtr + S]
        Cm = xdbl[:, dtr + S:dtr + 2 * S]
        dt = jax.nn.softplus(
            jnp.dot(dt_low, wdt, preferred_element_type=jnp.float32) + b_dt)
        dtx = dt * xs                                  # (R, Di)

        # --- hoisted off the serial chain: exp(dt*A) and B (x) (dt*x) for all
        #     (batch, timestep) pairs; EUP/MXU work overlaps freely. ---
        dA_all = []
        dBx_all = []
        for q in range(R):
            dt_q = dt[q:q + 1, :]                                   # (1, Di)
            dA_all.append(jnp.exp(dt_q * At))                       # (S, Di)
            dBx_all.append(lax.dot_general(                         # outer prod
                Bm[q:q + 1, :], dtx[q:q + 1, :],
                (((0,), (0,)), ((), ())),
                preferred_element_type=jnp.float32))                # (S, Di)

        # --- selective scan: fully unrolled; body = VPU FMA + tiny dot ---
        ys = []
        for b in range(B):
            h = jnp.zeros((S, Di), jnp.float32)
            for t in range(L):
                q = b * L + t
                h = dA_all[q] * h + dBx_all[q]
                ys.append(jnp.dot(Cm[q:q + 1, :], h,
                                  preferred_element_type=jnp.float32))  # (1, Di)
        y = jnp.concatenate(ys, axis=0)                # (R, Di), batch-major

        # skip term and gate applied once, outside the scan
        y = (y + Dv * xs) * _silu(z)
        x = x + jnp.dot(y, w_out, preferred_element_type=jnp.float32)

    # ---- final RMSNorm + all 4 heads in one lane-dense matmul/store ----
    hn = _rmsnorm(x, normf_ref[...])
    logits_ref[...] = jnp.dot(hn, wheads_ref[...],
                              preferred_element_type=jnp.float32)   # (R, 4*128)


# ------------------------------ forward --------------------------------------
def mamba_chess_forward(params, input_ids, player_1_elo=None,
                        player_2_elo=None, num_last_tokens=0):
    B, L = input_ids.shape
    R = B * L
    if player_1_elo is None:
        player_1_elo = jnp.full((B, 1), 1500.0, jnp.float32)
    if player_2_elo is None:
        player_2_elo = jnp.full((B, 1), 1500.0, jnp.float32)

    # glue: id remap + embedding gather (data-dependent gather stays in JAX)
    remapped = ID_REMAPPER[input_ids]
    emb = jnp.take(params["embedding"], remapped, axis=0).reshape(R, D_MODEL)

    ids2 = input_ids.reshape(R, 1).astype(jnp.int32)
    e1r = jnp.broadcast_to(player_1_elo.astype(jnp.float32).reshape(B, 1),
                           (B, L)).reshape(R, 1)
    e2r = jnp.broadcast_to(player_2_elo.astype(jnp.float32).reshape(B, 1),
                           (B, L)).reshape(R, 1)

    w = params["stacked"]
    kernel = functools.partial(fused_forward_kernel, batch=B, seqlen=L)
    logits_flat = pl.pallas_call(
        kernel,
        out_shape=jax.ShapeDtypeStruct((R, N_HEADS * HEAD_PAD), jnp.float32),
    )(ids2, e1r, e2r, emb,
      w["w_norm"], w["w_in"], w["w_conv"], w["w_xp"], w["w_dt"],
      w["bias3"], w["A_t"], w["w_out"], w["norm_f"], w["w_heads"])

    # split the lane-dense packed logits back into 4 heads, drop lane padding
    logits = logits_flat.reshape(B, L, N_HEADS, HEAD_PAD)[..., :VOCAB]
    if num_last_tokens > 0:
        logits = logits[:, -num_last_tokens:]
    logits_list = [logits[:, :, i, :] for i in range(N_HEADS)]

    # TODO(synk): CrossEntropyLoss training path (labels / label_weights) is
    # not implemented; forward returns logits with loss=None (labels=None).
    return {"logits": logits_list, "loss": None}


# ------------------------------ params ---------------------------------------
def init_params(key):
    keys = iter(jax.random.split(key, 64))

    def nrm(shape, scale=0.02):
        return scale * jax.random.normal(next(keys), shape, jnp.float32)

    # A (d_inner, d_state) with A[i, s] = -(s+1); stored transposed (S, Di)
    A_t = -jnp.broadcast_to(
        jnp.arange(1, D_STATE + 1, dtype=jnp.float32)[:, None],
        (D_STATE, D_INNER))

    w_norm, w_in, w_conv, w_xp, w_dt, bias3, A_ts, w_out = ([] for _ in range(8))
    for _ in range(N_LAYER):
        w_norm.append(jnp.ones((1, D_MODEL), jnp.float32))
        wx, wz = nrm((D_MODEL, D_INNER)), nrm((D_MODEL, D_INNER))
        w_in.append(jnp.concatenate([wx, wz], axis=1))              # (D, 2Di)=128 lanes
        w_conv.append(nrm((D_CONV, D_INNER), 0.1))
        b_conv = nrm((1, D_INNER), 0.01)
        w_xp.append(jnp.concatenate([nrm((D_INNER, DT_RANK)),       # dt_low
                                     nrm((D_INNER, D_STATE)),       # B
                                     nrm((D_INNER, D_STATE))],      # C
                                    axis=1))                        # (Di, 34)
        w_dt.append(nrm((DT_RANK, D_INNER), 0.1))
        b_dt = nrm((1, D_INNER), 0.1)
        Dv = jnp.ones((1, D_INNER), jnp.float32)
        bias3.append(jnp.concatenate([b_conv, b_dt, Dv], axis=0))   # (3, Di)
        A_ts.append(A_t)
        w_out.append(nrm((D_INNER, D_MODEL)))

    # 4 heads merged into one lane-dense (D, 4*128) matrix (zero lane padding)
    heads = [jnp.pad(nrm((D_MODEL, VOCAB)), ((0, 0), (0, HEAD_PAD - VOCAB)))
             for _ in range(N_HEADS)]
    w_heads = jnp.concatenate(heads, axis=1)                        # (D, 512)

    stacked = dict(
        w_norm=jnp.stack(w_norm), w_in=jnp.stack(w_in),
        w_conv=jnp.stack(w_conv), w_xp=jnp.stack(w_xp),
        w_dt=jnp.stack(w_dt), bias3=jnp.stack(bias3),
        A_t=jnp.stack(A_ts), w_out=jnp.stack(w_out),
        norm_f=jnp.ones((1, D_MODEL), jnp.float32), w_heads=w_heads)
    return dict(embedding=nrm((VOCAB, D_MODEL)), stacked=stacked)


# ------------------------------- main -----------------------------------------
if __name__ == "__main__":
    key = jax.random.PRNGKey(0)
    pkey, ikey = jax.random.split(key)
    params = init_params(pkey)

    B, L = 2, 8
    input_ids = jax.random.randint(ikey, (B, L), 0, VOCAB, dtype=jnp.int32)
    # make sure some elo-sensitive tokens (78-83) are present
    input_ids = input_ids.at[0, 0].set(78).at[1, 3].set(82)

    player_1_elo = jnp.array([[1800.0], [1200.0]], jnp.float32)
    player_2_elo = jnp.array([[1400.0], [1650.0]], jnp.float32)

    out = mamba_chess_forward(params, input_ids, player_1_elo, player_2_elo)
    jax.block_until_ready(out["logits"])

    assert len(out["logits"]) == N_HEADS
    assert all(lg.shape == (B, L, VOCAB) for lg in out["logits"])
    print("KERNEL_OK")
</pallas_src>

<mosaic_0001>
module attributes {stable_mosaic.version = 11 : i64} {
  func.func @fused_forward_kernel(%arg0: memref<16x1xi32, #tpu.memory_space<vmem>>, %arg1: memref<16x1xf32, #tpu.memory_space<vmem>>, %arg2: memref<16x1xf32, #tpu.memory_space<vmem>>, %arg3: memref<16x32xf32, #tpu.memory_space<vmem>>, %arg4: memref<2x1x32xf32, #tpu.memory_space<vmem>>, %arg5: memref<2x32x128xf32, #tpu.memory_space<vmem>>, %arg6: memref<2x4x64xf32, #tpu.memory_space<vmem>>, %arg7: memref<2x64x34xf32, #tpu.memory_space<vmem>>, %arg8: memref<2x2x64xf32, #tpu.memory_space<vmem>>, %arg9: memref<2x3x64xf32, #tpu.memory_space<vmem>>, %arg10: memref<2x16x64xf32, #tpu.memory_space<vmem>>, %arg11: memref<2x64x32xf32, #tpu.memory_space<vmem>>, %arg12: memref<1x32xf32, #tpu.memory_space<vmem>>, %arg13: memref<32x512xf32, #tpu.memory_space<vmem>>, %arg14: memref<16x512xf32, #tpu.memory_space<vmem>>) attributes {dimension_semantics = [], scalar_prefetch = 0 : i64, scratch_operands = 0 : i64, tpu.core_type = #tpu.core_type<tc>} {
    %c0 = arith.constant 0 : index
    %c0_0 = arith.constant 0 : index
    %0 = vector.load %arg0[%c0, %c0_0] : memref<16x1xi32, #tpu.memory_space<vmem>>, vector<16x1xi32>
    %c0_1 = arith.constant 0 : index
    %c0_2 = arith.constant 0 : index
    %1 = vector.load %arg1[%c0_1, %c0_2] : memref<16x1xf32, #tpu.memory_space<vmem>>, vector<16x1xf32>
    %cst = arith.constant 1.500000e+03 : f32
    %2 = vector.broadcast %cst : f32 to vector<16x1xf32>
    %3 = arith.subf %1, %2 : vector<16x1xf32>
    %cst_3 = arith.constant 1.500000e+03 : f32
    %4 = vector.broadcast %cst_3 : f32 to vector<16x1xf32>
    %5 = arith.divf %3, %4 : vector<16x1xf32>
    %c0_4 = arith.constant 0 : index
    %c0_5 = arith.constant 0 : index
    %6 = vector.load %arg2[%c0_4, %c0_5] : memref<16x1xf32, #tpu.memory_space<vmem>>, vector<16x1xf32>
    %cst_6 = arith.constant 1.500000e+03 : f32
    %7 = vector.broadcast %cst_6 : f32 to vector<16x1xf32>
    %8 = arith.subf %6, %7 : vector<16x1xf32>
    %cst_7 = arith.constant 1.500000e+03 : f32
    %9 = vector.broadcast %cst_7 : f32 to vector<16x1xf32>
    %10 = arith.divf %8, %9 : vector<16x1xf32>
    %c78_i32 = arith.constant 78 : i32
    %11 = vector.broadcast %c78_i32 : i32 to vector<16x1xi32>
    %12 = arith.cmpi eq, %0, %11 : vector<16x1xi32>
    %c79_i32 = arith.constant 79 : i32
    %13 = vector.broadcast %c79_i32 : i32 to vector<16x1xi32>
    %14 = arith.cmpi eq, %0, %13 : vector<16x1xi32>
    %15 = arith.ori %12, %14 : vector<16x1xi1>
    %c80_i32 = arith.constant 80 : i32
    %16 = vector.broadcast %c80_i32 : i32 to vector<16x1xi32>
    %17 = arith.cmpi eq, %0, %16 : vector<16x1xi32>
    %18 = arith.ori %15, %17 : vector<16x1xi1>
    %19 = arith.extui %18 : vector<16x1xi1> to vector<16x1xi32>
    %20 = arith.sitofp %19 : vector<16x1xi32> to vector<16x1xf32>
    %21 = arith.mulf %20, %5 : vector<16x1xf32>
    %cst_8 = arith.constant 0.000000e+00 : f32
    %22 = vector.broadcast %cst_8 : f32 to vector<16x1xf32>
    %23 = arith.cmpf oeq, %21, %22 : vector<16x1xf32>
    %24 = arith.extui %23 : vector<16x1xi1> to vector<16x1xi32>
    %25 = arith.sitofp %24 : vector<16x1xi32> to vector<16x1xf32>
    %26 = arith.addf %21, %25 : vector<16x1xf32>
    %c81_i32 = arith.constant 81 : i32
    %27 = vector.broadcast %c81_i32 : i32 to vector<16x1xi32>
    %28 = arith.cmpi eq, %0, %27 : vector<16x1xi32>
    %c82_i32 = arith.constant 82 : i32
    %29 = vector.broadcast %c82_i32 : i32 to vector<16x1xi32>
    %30 = arith.cmpi eq, %0, %29 : vector<16x1xi32>
    %31 = arith.ori %28, %30 : vector<16x1xi1>
    %c83_i32 = arith.constant 83 : i32
    %32 = vector.broadcast %c83_i32 : i32 to vector<16x1xi32>
    %33 = arith.cmpi eq, %0, %32 : vector<16x1xi32>
    %34 = arith.ori %31, %33 : vector<16x1xi1>
    %35 = arith.extui %34 : vector<16x1xi1> to vector<16x1xi32>
    %36 = arith.sitofp %35 : vector<16x1xi32> to vector<16x1xf32>
    %37 = arith.mulf %36, %10 : vector<16x1xf32>
    %cst_9 = arith.constant 0.000000e+00 : f32
    %38 = vector.broadcast %cst_9 : f32 to vector<16x1xf32>
    %39 = arith.cmpf oeq, %37, %38 : vector<16x1xf32>
    %40 = arith.extui %39 : vector<16x1xi1> to vector<16x1xi32>
    %41 = arith.sitofp %40 : vector<16x1xi32> to vector<16x1xf32>
    %42 = arith.addf %37, %41 : vector<16x1xf32>
    %c0_10 = arith.constant 0 : index
    %c0_11 = arith.constant 0 : index
    %43 = vector.load %arg3[%c0_10, %c0_11] : memref<16x32xf32, #tpu.memory_space<vmem>>, vector<16x32xf32>
    %44 = arith.mulf %26, %42 : vector<16x1xf32>
    %45 = vector.broadcast %44 : vector<16x1xf32> to vector<16x32xf32>
    %46 = arith.mulf %43, %45 : vector<16x32xf32>
    %47 = tpu.iota {dimensions = array<i32: 1>} : vector<2x8x64xi32>
    %48 = vector.shape_cast %47 : vector<2x8x64xi32> to vector<16x64xi32>
    %c0_12 = arith.constant 0 : index
    %c0_13 = arith.constant 0 : index
    %c0_14 = arith.constant 0 : index
    %49 = vector.load %arg4[%c0_12, %c0_13, %c0_14] : memref<2x1x32xf32, #tpu.memory_space<vmem>>, vector<1x1x32xf32>
    %50 = vector.shape_cast %49 : vector<1x1x32xf32> to vector<1x32xf32>
    %c0_15 = arith.constant 0 : index
    %c0_16 = arith.constant 0 : index
    %c0_17 = arith.constant 0 : index
    %51 = vector.load %arg5[%c0_15, %c0_16, %c0_17] : memref<2x32x128xf32, #tpu.memory_space<vmem>>, vector<1x32x128xf32>
    %52 = vector.shape_cast %51 : vector<1x32x128xf32> to vector<32x128xf32>
    %c0_18 = arith.constant 0 : index
    %c0_19 = arith.constant 0 : index
    %c0_20 = arith.constant 0 : index
    %53 = vector.load %arg6[%c0_18, %c0_19, %c0_20] : memref<2x4x64xf32, #tpu.memory_space<vmem>>, vector<1x4x64xf32>
    %54 = vector.shape_cast %53 : vector<1x4x64xf32> to vector<4x64xf32>
    %c0_21 = arith.constant 0 : index
    %c0_22 = arith.constant 0 : index
    %c0_23 = arith.constant 0 : index
    %55 = vector.load %arg7[%c0_21, %c0_22, %c0_23] : memref<2x64x34xf32, #tpu.memory_space<vmem>>, vector<1x64x34xf32>
    %56 = vector.shape_cast %55 : vector<1x64x34xf32> to vector<64x34xf32>
    %c0_24 = arith.constant 0 : index
    %c0_25 = arith.constant 0 : index
    %c0_26 = arith.constant 0 : index
    %57 = vector.load %arg8[%c0_24, %c0_25, %c0_26] : memref<2x2x64xf32, #tpu.memory_space<vmem>>, vector<1x2x64xf32>
    %58 = vector.shape_cast %57 : vector<1x2x64xf32> to vector<2x64xf32>
    %c0_27 = arith.constant 0 : index
    %c0_28 = arith.constant 0 : index
    %c0_29 = arith.constant 0 : index
    %59 = vector.load %arg9[%c0_27, %c0_28, %c0_29] : memref<2x3x64xf32, #tpu.memory_space<vmem>>, vector<1x3x64xf32>
    %60 = vector.shape_cast %59 : vector<1x3x64xf32> to vector<3x64xf32>
    %61 = vector.extract_strided_slice %60 {offsets = [0, 0], sizes = [1, 64], strides = [1, 1]} : vector<3x64xf32> to vector<1x64xf32>
    %62 = vector.extract_strided_slice %60 {offsets = [1, 0], sizes = [1, 64], strides = [1, 1]} : vector<3x64xf32> to vector<1x64xf32>
    %63 = vector.extract_strided_slice %60 {offsets = [2, 0], sizes = [1, 64], strides = [1, 1]} : vector<3x64xf32> to vector<1x64xf32>
    %c0_30 = arith.constant 0 : index
    %c0_31 = arith.constant 0 : index
    %c0_32 = arith.constant 0 : index
    %64 = vector.load %arg10[%c0_30, %c0_31, %c0_32] : memref<2x16x64xf32, #tpu.memory_space<vmem>>, vector<1x16x64xf32>
    %65 = vector.shape_cast %64 : vector<1x16x64xf32> to vector<16x64xf32>
    %c0_33 = arith.constant 0 : index
    %c0_34 = arith.constant 0 : index
    %c0_35 = arith.constant 0 : index
    %66 = vector.load %arg11[%c0_33, %c0_34, %c0_35] : memref<2x64x32xf32, #tpu.memory_space<vmem>>, vector<1x64x32xf32>
    %67 = vector.shape_cast %66 : vector<1x64x32xf32> to vector<64x32xf32>
    %68 = arith.mulf %46, %46 : vector<16x32xf32>
    %cst_36 = arith.constant dense<0.000000e+00> : vector<16xf32>
    %69 = vector.multi_reduction <add>, %68, %cst_36 [1] : vector<16x32xf32> to vector<16xf32>
    %70 = vector.shape_cast %69 : vector<16xf32> to vector<16x1xf32>
    %cst_37 = arith.constant 3.200000e+01 : f32
    %71 = vector.broadcast %cst_37 : f32 to vector<16x1xf32>
    %72 = arith.divf %70, %71 : vector<16x1xf32>
    %cst_38 = arith.constant 9.99999974E-6 : f32
    %73 = vector.broadcast %cst_38 : f32 to vector<16x1xf32>
    %74 = arith.addf %72, %73 : vector<16x1xf32>
    %75 = math.rsqrt %74 : vector<16x1xf32>
    %76 = vector.broadcast %75 : vector<16x1xf32> to vector<16x32xf32>
    %77 = arith.mulf %46, %76 : vector<16x32xf32>
    %78 = vector.broadcast %50 : vector<1x32xf32> to vector<16x32xf32>
    %79 = arith.mulf %77, %78 : vector<16x32xf32>
    %cst_39 = arith.constant dense<0.000000e+00> : vector<16x128xf32>
    %80 = tpu.matmul %79, %52, %cst_39 {dimension_numbers = #tpu.dot_dimension_numbers<[1], [0], [0], [1], [0, 0, 1, 1], [], []>} : vector<16x32xf32>, vector<32x128xf32>, vector<16x128xf32> -> vector<16x128xf32>
    %81 = vector.extract_strided_slice %80 {offsets = [0, 0], sizes = [16, 64], strides = [1, 1]} : vector<16x128xf32> to vector<16x64xf32>
    %82 = vector.extract_strided_slice %80 {offsets = [0, 64], sizes = [16, 64], strides = [1, 1]} : vector<16x128xf32> to vector<16x64xf32>
    %83 = vector.extract_strided_slice %54 {offsets = [3, 0], sizes = [1, 64], strides = [1, 1]} : vector<4x64xf32> to vector<1x64xf32>
    %84 = vector.broadcast %83 : vector<1x64xf32> to vector<16x64xf32>
    %85 = arith.mulf %81, %84 : vector<16x64xf32>
    %c1_i32 = arith.constant 1 : i32
    %86 = tpu.dynamic_rotate %81 by %c1_i32 dim 0 : vector<16x64xf32>, i32 -> vector<16x64xf32>
    %c1_i32_40 = arith.constant 1 : i32
    %87 = vector.broadcast %c1_i32_40 : i32 to vector<16x64xi32>
    %88 = arith.cmpi sge, %48, %87 : vector<16x64xi32>
    %cst_41 = arith.constant 0.000000e+00 : f32
    %89 = vector.broadcast %cst_41 : f32 to vector<16x64xf32>
    %90 = arith.select %88, %86, %89 : vector<16x64xi1>, vector<16x64xf32>
    %91 = vector.extract_strided_slice %54 {offsets = [2, 0], sizes = [1, 64], strides = [1, 1]} : vector<4x64xf32> to vector<1x64xf32>
    %92 = vector.broadcast %91 : vector<1x64xf32> to vector<16x64xf32>
    %93 = arith.mulf %90, %92 : vector<16x64xf32>
    %94 = arith.addf %85, %93 : vector<16x64xf32>
    %c2_i32 = arith.constant 2 : i32
    %95 = tpu.dynamic_rotate %81 by %c2_i32 dim 0 : vector<16x64xf32>, i32 -> vector<16x64xf32>
    %c2_i32_42 = arith.constant 2 : i32
    %96 = vector.broadcast %c2_i32_42 : i32 to vector<16x64xi32>
    %97 = arith.cmpi sge, %48, %96 : vector<16x64xi32>
    %cst_43 = arith.constant 0.000000e+00 : f32
    %98 = vector.broadcast %cst_43 : f32 to vector<16x64xf32>
    %99 = arith.select %97, %95, %98 : vector<16x64xi1>, vector<16x64xf32>
    %100 = vector.extract_strided_slice %54 {offsets = [1, 0], sizes = [1, 64], strides = [1, 1]} : vector<4x64xf32> to vector<1x64xf32>
    %101 = vector.broadcast %100 : vector<1x64xf32> to vector<16x64xf32>
    %102 = arith.mulf %99, %101 : vector<16x64xf32>
    %103 = arith.addf %94, %102 : vector<16x64xf32>
    %c3_i32 = arith.constant 3 : i32
    %104 = tpu.dynamic_rotate %81 by %c3_i32 dim 0 : vector<16x64xf32>, i32 -> vector<16x64xf32>
    %c3_i32_44 = arith.constant 3 : i32
    %105 = vector.broadcast %c3_i32_44 : i32 to vector<16x64xi32>
    %106 = arith.cmpi sge, %48, %105 : vector<16x64xi32>
    %cst_45 = arith.constant 0.000000e+00 : f32
    %107 = vector.broadcast %cst_45 : f32 to vector<16x64xf32>
    %108 = arith.select %106, %104, %107 : vector<16x64xi1>, vector<16x64xf32>
    %109 = vector.extract_strided_slice %54 {offsets = [0, 0], sizes = [1, 64], strides = [1, 1]} : vector<4x64xf32> to vector<1x64xf32>
    %110 = vector.broadcast %109 : vector<1x64xf32> to vector<16x64xf32>
    %111 = arith.mulf %108, %110 : vector<16x64xf32>
    %112 = arith.addf %103, %111 : vector<16x64xf32>
    %113 = vector.broadcast %61 : vector<1x64xf32> to vector<16x64xf32>
    %114 = arith.addf %112, %113 : vector<16x64xf32>
    %115 = arith.negf %114 : vector<16x64xf32>
    %116 = math.exp %115 : vector<16x64xf32>
    %cst_46 = arith.constant 1.000000e+00 : f32
    %117 = vector.broadcast %cst_46 : f32 to vector<16x64xf32>
    %118 = arith.addf %117, %116 : vector<16x64xf32>
    %119 = arith.divf %117, %118 : vector<16x64xf32>
    %120 = arith.mulf %114, %119 : vector<16x64xf32>
    %cst_47 = arith.constant dense<0.000000e+00> : vector<16x34xf32>
    %121 = tpu.matmul %120, %56, %cst_47 {dimension_numbers = #tpu.dot_dimension_numbers<[1], [0], [0], [1], [0, 0, 1, 1], [], []>} : vector<16x64xf32>, vector<64x34xf32>, vector<16x34xf32> -> vector<16x34xf32>
    %122 = vector.extract_strided_slice %121 {offsets = [0, 0], sizes = [16, 2], strides = [1, 1]} : vector<16x34xf32> to vector<16x2xf32>
    %123 = vector.extract_strided_slice %121 {offsets = [0, 2], sizes = [16, 16], strides = [1, 1]} : vector<16x34xf32> to vector<16x16xf32>
    %124 = vector.extract_strided_slice %121 {offsets = [0, 18], sizes = [16, 16], strides = [1, 1]} : vector<16x34xf32> to vector<16x16xf32>
    %cst_48 = arith.constant dense<0.000000e+00> : vector<16x64xf32>
    %125 = tpu.matmul %122, %58, %cst_48 {dimension_numbers = #tpu.dot_dimension_numbers<[1], [0], [0], [1], [0, 0, 1, 1], [], []>} : vector<16x2xf32>, vector<2x64xf32>, vector<16x64xf32> -> vector<16x64xf32>
    %126 = vector.broadcast %62 : vector<1x64xf32> to vector<16x64xf32>
    %127 = arith.addf %125, %126 : vector<16x64xf32>
    %cst_49 = arith.constant 0.000000e+00 : f32
    %128 = vector.broadcast %cst_49 : f32 to vector<16x64xf32>
    %129 = arith.maximumf %127, %128 : vector<16x64xf32>
    %130 = vector.broadcast %cst_49 : f32 to vector<16x64xf32>
    %131 = arith.subf %127, %130 : vector<16x64xf32>
    %132 = arith.cmpf one, %131, %131 : vector<16x64xf32>
    %133 = vector.broadcast %cst_49 : f32 to vector<16x64xf32>
    %134 = arith.addf %127, %133 : vector<16x64xf32>
    %135 = math.absf %131 : vector<16x64xf32>
    %cst_50 = arith.constant 0.000000e+00 : f32
    %136 = vector.broadcast %cst_50 : f32 to vector<16x64xf32>
    %137 = arith.subf %136, %135 : vector<16x64xf32>
    %138 = math.exp %137 : vector<16x64xf32>
    %139 = math.log1p %138 : vector<16x64xf32>
    %140 = arith.addf %129, %139 : vector<16x64xf32>
    %141 = arith.select %132, %134, %140 : vector<16x64xi1>, vector<16x64xf32>
    %142 = arith.mulf %141, %120 : vector<16x64xf32>
    %143 = vector.extract_strided_slice %141 {offsets = [0, 0], sizes = [1, 64], strides = [1, 1]} : vector<16x64xf32> to vector<1x64xf32>
    %144 = vector.broadcast %143 : vector<1x64xf32> to vector<16x64xf32>
    %145 = arith.mulf %144, %65 : vector<16x64xf32>
    %146 = math.exp %145 : vector<16x64xf32>
    %147 = vector.extract_strided_slice %123 {offsets = [0, 0], sizes = [1, 16], strides = [1, 1]} : vector<16x16xf32> to vector<1x16xf32>
    %148 = vector.extract_strided_slice %142 {offsets = [0, 0], sizes = [1, 64], strides = [1, 1]} : vector<16x64xf32> to vector<1x64xf32>
    %cst_51 = arith.constant dense<0.000000e+00> : vector<16x64xf32>
    %149 = tpu.matmul %147, %148, %cst_51 {dimension_numbers = #tpu.dot_dimension_numbers<[0], [0], [1], [1], [0, 1, 1, 1], [], []>} : vector<1x16xf32>, vector<1x64xf32>, vector<16x64xf32> -> vector<16x64xf32>
    %150 = vector.extract_strided_slice %141 {offsets = [1, 0], sizes = [1, 64], strides = [1, 1]} : vector<16x64xf32> to vector<1x64xf32>
    %151 = vector.broadcast %150 : vector<1x64xf32> to vector<16x64xf32>
    %152 = arith.mulf %151, %65 : vector<16x64xf32>
    %153 = math.exp %152 : vector<16x64xf32>
    %154 = vector.extract_strided_slice %123 {offsets = [1, 0], sizes = [1, 16], strides = [1, 1]} : vector<16x16xf32> to vector<1x16xf32>
    %155 = vector.extract_strided_slice %142 {offsets = [1, 0], sizes = [1, 64], strides = [1, 1]} : vector<16x64xf32> to vector<1x64xf32>
    %cst_52 = arith.constant dense<0.000000e+00> : vector<16x64xf32>
    %156 = tpu.matmul %154, %155, %cst_52 {dimension_numbers = #tpu.dot_dimension_numbers<[0], [0], [1], [1], [0, 1, 1, 1], [], []>} : vector<1x16xf32>, vector<1x64xf32>, vector<16x64xf32> -> vector<16x64xf32>
    %157 = vector.extract_strided_slice %141 {offsets = [2, 0], sizes = [1, 64], strides = [1, 1]} : vector<16x64xf32> to vector<1x64xf32>
    %158 = vector.broadcast %157 : vector<1x64xf32> to vector<16x64xf32>
    %159 = arith.mulf %158, %65 : vector<16x64xf32>
    %160 = math.exp %159 : vector<16x64xf32>
    %161 = vector.extract_strided_slice %123 {offsets = [2, 0], sizes = [1, 16], strides = [1, 1]} : vector<16x16xf32> to vector<1x16xf32>
    %162 = vector.extract_strided_slice %142 {offsets = [2, 0], sizes = [1, 64], strides = [1, 1]} : vector<16x64xf32> to vector<1x64xf32>
    %cst_53 = arith.constant dense<0.000000e+00> : vector<16x64xf32>
    %163 = tpu.matmul %161, %162, %cst_53 {dimension_numbers = #tpu.dot_dimension_numbers<[0], [0], [1], [1], [0, 1, 1, 1], [], []>} : vector<1x16xf32>, vector<1x64xf32>, vector<16x64xf32> -> vector<16x64xf32>
    %164 = vector.extract_strided_slice %141 {offsets = [3, 0], sizes = [1, 64], strides = [1, 1]} : vector<16x64xf32> to vector<1x64xf32>
    %165 = vector.broadcast %164 : vector<1x64xf32> to vector<16x64xf32>
    %166 = arith.mulf %165, %65 : vector<16x64xf32>
    %167 = math.exp %166 : vector<16x64xf32>
    %168 = vector.extract_strided_slice %123 {offsets = [3, 0], sizes = [1, 16], strides = [1, 1]} : vector<16x16xf32> to vector<1x16xf32>
    %169 = vector.extract_strided_slice %142 {offsets = [3, 0], sizes = [1, 64], strides = [1, 1]} : vector<16x64xf32> to vector<1x64xf32>
    %cst_54 = arith.constant dense<0.000000e+00> : vector<16x64xf32>
    %170 = tpu.matmul %168, %169, %cst_54 {dimension_numbers = #tpu.dot_dimension_numbers<[0], [0], [1], [1], [0, 1, 1, 1], [], []>} : vector<1x16xf32>, vector<1x64xf32>, vector<16x64xf32> -> vector<16x64xf32>
    %171 = vector.extract_strided_slice %141 {offsets = [4, 0], sizes = [1, 64], strides = [1, 1]} : vector<16x64xf32> to vector<1x64xf32>
    %172 = vector.broadcast %171 : vector<1x64xf32> to vector<16x64xf32>
    %173 = arith.mulf %172, %65 : vector<16x64xf32>
    %174 = math.exp %173 : vector<16x64xf32>
    %175 = vector.extract_strided_slice %123 {offsets = [4, 0], sizes = [1, 16], strides = [1, 1]} : vector<16x16xf32> to vector<1x16xf32>
    %176 = vector.extract_strided_slice %142 {offsets = [4, 0], sizes = [1, 64], strides = [1, 1]} : vector<16x64xf32> to vector<1x64xf32>
    %cst_55 = arith.constant dense<0.000000e+00> : vector<16x64xf32>
    %177 = tpu.matmul %175, %176, %cst_55 {dimension_numbers = #tpu.dot_dimension_numbers<[0], [0], [1], [1], [0, 1, 1, 1], [], []>} : vector<1x16xf32>, vector<1x64xf32>, vector<16x64xf32> -> vector<16x64xf32>
    %178 = vector.extract_strided_slice %141 {offsets = [5, 0], sizes = [1, 64], strides = [1, 1]} : vector<16x64xf32> to vector<1x64xf32>
    %179 = vector.broadcast %178 : vector<1x64xf32> to vector<16x64xf32>
    %180 = arith.mulf %179, %65 : vector<16x64xf32>
    %181 = math.exp %180 : vector<16x64xf32>
    %182 = vector.extract_strided_slice %123 {offsets = [5, 0], sizes = [1, 16], strides = [1, 1]} : vector<16x16xf32> to vector<1x16xf32>
    %183 = vector.extract_strided_slice %142 {offsets = [5, 0], sizes = [1, 64], strides = [1, 1]} : vector<16x64xf32> to vector<1x64xf32>
    %cst_56 = arith.constant dense<0.000000e+00> : vector<16x64xf32>
    %184 = tpu.matmul %182, %183, %cst_56 {dimension_numbers = #tpu.dot_dimension_numbers<[0], [0], [1], [1], [0, 1, 1, 1], [], []>} : vector<1x16xf32>, vector<1x64xf32>, vector<16x64xf32> -> vector<16x64xf32>
    %185 = vector.extract_strided_slice %141 {offsets = [6, 0], sizes = [1, 64], strides = [1, 1]} : vector<16x64xf32> to vector<1x64xf32>
    %186 = vector.broadcast %185 : vector<1x64xf32> to vector<16x64xf32>
    %187 = arith.mulf %186, %65 : vector<16x64xf32>
    %188 = math.exp %187 : vector<16x64xf32>
    %189 = vector.extract_strided_slice %123 {offsets = [6, 0], sizes = [1, 16], strides = [1, 1]} : vector<16x16xf32> to vector<1x16xf32>
    %190 = vector.extract_strided_slice %142 {offsets = [6, 0], sizes = [1, 64], strides = [1, 1]} : vector<16x64xf32> to vector<1x64xf32>
    %cst_57 = arith.constant dense<0.000000e+00> : vector<16x64xf32>
    %191 = tpu.matmul %189, %190, %cst_57 {dimension_numbers = #tpu.dot_dimension_numbers<[0], [0], [1], [1], [0, 1, 1, 1], [], []>} : vector<1x16xf32>, vector<1x64xf32>, vector<16x64xf32> -> vector<16x64xf32>
    %192 = vector.extract_strided_slice %141 {offsets = [7, 0], sizes = [1, 64], strides = [1, 1]} : vector<16x64xf32> to vector<1x64xf32>
    %193 = vector.broadcast %192 : vector<1x64xf32> to vector<16x64xf32>
    %194 = arith.mulf %193, %65 : vector<16x64xf32>
    %195 = math.exp %194 : vector<16x64xf32>
    %196 = vector.extract_strided_slice %123 {offsets = [7, 0], sizes = [1, 16], strides = [1, 1]} : vector<16x16xf32> to vector<1x16xf32>
    %197 = vector.extract_strided_slice %142 {offsets = [7, 0], sizes = [1, 64], strides = [1, 1]} : vector<16x64xf32> to vector<1x64xf32>
    %cst_58 = arith.constant dense<0.000000e+00> : vector<16x64xf32>
    %198 = tpu.matmul %196, %197, %cst_58 {dimension_numbers = #tpu.dot_dimension_numbers<[0], [0], [1], [1], [0, 1, 1, 1], [], []>} : vector<1x16xf32>, vector<1x64xf32>, vector<16x64xf32> -> vector<16x64xf32>
    %199 = vector.extract_strided_slice %141 {offsets = [8, 0], sizes = [1, 64], strides = [1, 1]} : vector<16x64xf32> to vector<1x64xf32>
    %200 = vector.broadcast %199 : vector<1x64xf32> to vector<16x64xf32>
    %201 = arith.mulf %200, %65 : vector<16x64xf32>
    %202 = math.exp %201 : vector<16x64xf32>
    %203 = vector.extract_strided_slice %123 {offsets = [8, 0], sizes = [1, 16], strides = [1, 1]} : vector<16x16xf32> to vector<1x16xf32>
    %204 = vector.extract_strided_slice %142 {offsets = [8, 0], sizes = [1, 64], strides = [1, 1]} : vector<16x64xf32> to vector<1x64xf32>
    %cst_59 = arith.constant dense<0.000000e+00> : vector<16x64xf32>
    %205 = tpu.matmul %203, %204, %cst_59 {dimension_numbers = #tpu.dot_dimension_numbers<[0], [0], [1], [1], [0, 1, 1, 1], [], []>} : vector<1x16xf32>, vector<1x64xf32>, vector<16x64xf32> -> vector<16x64xf32>
    %206 = vector.extract_strided_slice %141 {offsets = [9, 0], sizes = [1, 64], strides = [1, 1]} : vector<16x64xf32> to vector<1x64xf32>
    %207 = vector.broadcast %206 : vector<1x64xf32> to vector<16x64xf32>
    %208 = arith.mulf %207, %65 : vector<16x64xf32>
    %209 = math.exp %208 : vector<16x64xf32>
    %210 = vector.extract_strided_slice %123 {offsets = [9, 0], sizes = [1, 16], strides = [1, 1]} : vector<16x16xf32> to vector<1x16xf32>
    %211 = vector.extract_strided_slice %142 {offsets = [9, 0], sizes = [1, 64], strides = [1, 1]} : vector<16x64xf32> to vector<1x64xf32>
    %cst_60 = arith.constant dense<0.000000e+00> : vector<16x64xf32>
    %212 = tpu.matmul %210, %211, %cst_60 {dimension_numbers = #tpu.dot_dimension_numbers<[0], [0], [1], [1], [0, 1, 1, 1], [], []>} : vector<1x16xf32>, vector<1x64xf32>, vector<16x64xf32> -> vector<16x64xf32>
    %213 = vector.extract_strided_slice %141 {offsets = [10, 0], sizes = [1, 64], strides = [1, 1]} : vector<16x64xf32> to vector<1x64xf32>
    %214 = vector.broadcast %213 : vector<1x64xf32> to vector<16x64xf32>
    %215 = arith.mulf %214, %65 : vector<16x64xf32>
    %216 = math.exp %215 : vector<16x64xf32>
    %217 = vector.extract_strided_slice %123 {offsets = [10, 0], sizes = [1, 16], strides = [1, 1]} : vector<16x16xf32> to vector<1x16xf32>
    %218 = vector.extract_strided_slice %142 {offsets = [10, 0], sizes = [1, 64], strides = [1, 1]} : vector<16x64xf32> to vector<1x64xf32>
    %cst_61 = arith.constant dense<0.000000e+00> : vector<16x64xf32>
    %219 = tpu.matmul %217, %218, %cst_61 {dimension_numbers = #tpu.dot_dimension_numbers<[0], [0], [1], [1], [0, 1, 1, 1], [], []>} : vector<1x16xf32>, vector<1x64xf32>, vector<16x64xf32> -> vector<16x64xf32>
    %220 = vector.extract_strided_slice %141 {offsets = [11, 0], sizes = [1, 64], strides = [1, 1]} : vector<16x64xf32> to vector<1x64xf32>
    %221 = vector.broadcast %220 : vector<1x64xf32> to vector<16x64xf32>
    %222 = arith.mulf %221, %65 : vector<16x64xf32>
    %223 = math.exp %222 : vector<16x64xf32>
    %224 = vector.extract_strided_slice %123 {offsets = [11, 0], sizes = [1, 16], strides = [1, 1]} : vector<16x16xf32> to vector<1x16xf32>
    %225 = vector.extract_strided_slice %142 {offsets = [11, 0], sizes = [1, 64], strides = [1, 1]} : vector<16x64xf32> to vector<1x64xf32>
    %cst_62 = arith.constant dense<0.000000e+00> : vector<16x64xf32>
    %226 = tpu.matmul %224, %225, %cst_62 {dimension_numbers = #tpu.dot_dimension_numbers<[0], [0], [1], [1], [0, 1, 1, 1], [], []>} : vector<1x16xf32>, vector<1x64xf32>, vector<16x64xf32> -> vector<16x64xf32>
    %227 = vector.extract_strided_slice %141 {offsets = [12, 0], sizes = [1, 64], strides = [1, 1]} : vector<16x64xf32> to vector<1x64xf32>
    %228 = vector.broadcast %227 : vector<1x64xf32> to vector<16x64xf32>
    %229 = arith.mulf %228, %65 : vector<16x64xf32>
    %230 = math.exp %229 : vector<16x64xf32>
    %231 = vector.extract_strided_slice %123 {offsets = [12, 0], sizes = [1, 16], strides = [1, 1]} : vector<16x16xf32> to vector<1x16xf32>
    %232 = vector.extract_strided_slice %142 {offsets = [12, 0], sizes = [1, 64], strides = [1, 1]} : vector<16x64xf32> to vector<1x64xf32>
    %cst_63 = arith.constant dense<0.000000e+00> : vector<16x64xf32>
    %233 = tpu.matmul %231, %232, %cst_63 {dimension_numbers = #tpu.dot_dimension_numbers<[0], [0], [1], [1], [0, 1, 1, 1], [], []>} : vector<1x16xf32>, vector<1x64xf32>, vector<16x64xf32> -> vector<16x64xf32>
    %234 = vector.extract_strided_slice %141 {offsets = [13, 0], sizes = [1, 64], strides = [1, 1]} : vector<16x64xf32> to vector<1x64xf32>
    %235 = vector.broadcast %234 : vector<1x64xf32> to vector<16x64xf32>
    %236 = arith.mulf %235, %65 : vector<16x64xf32>
    %237 = math.exp %236 : vector<16x64xf32>
    %238 = vector.extract_strided_slice %123 {offsets = [13, 0], sizes = [1, 16], strides = [1, 1]} : vector<16x16xf32> to vector<1x16xf32>
    %239 = vector.extract_strided_slice %142 {offsets = [13, 0], sizes = [1, 64], strides = [1, 1]} : vector<16x64xf32> to vector<1x64xf32>
    %cst_64 = arith.constant dense<0.000000e+00> : vector<16x64xf32>
    %240 = tpu.matmul %238, %239, %cst_64 {dimension_numbers = #tpu.dot_dimension_numbers<[0], [0], [1], [1], [0, 1, 1, 1], [], []>} : vector<1x16xf32>, vector<1x64xf32>, vector<16x64xf32> -> vector<16x64xf32>
    %241 = vector.extract_strided_slice %141 {offsets = [14, 0], sizes = [1, 64], strides = [1, 1]} : vector<16x64xf32> to vector<1x64xf32>
    %242 = vector.broadcast %241 : vector<1x64xf32> to vector<16x64xf32>
    %243 = arith.mulf %242, %65 : vector<16x64xf32>
    %244 = math.exp %243 : vector<16x64xf32>
    %245 = vector.extract_strided_slice %123 {offsets = [14, 0], sizes = [1, 16], strides = [1, 1]} : vector<16x16xf32> to vector<1x16xf32>
    %246 = vector.extract_strided_slice %142 {offsets = [14, 0], sizes = [1, 64], strides = [1, 1]} : vector<16x64xf32> to vector<1x64xf32>
    %cst_65 = arith.constant dense<0.000000e+00> : vector<16x64xf32>
    %247 = tpu.matmul %245, %246, %cst_65 {dimension_numbers = #tpu.dot_dimension_numbers<[0], [0], [1], [1], [0, 1, 1, 1], [], []>} : vector<1x16xf32>, vector<1x64xf32>, vector<16x64xf32> -> vector<16x64xf32>
    %248 = vector.extract_strided_slice %141 {offsets = [15, 0], sizes = [1, 64], strides = [1, 1]} : vector<16x64xf32> to vector<1x64xf32>
    %249 = vector.broadcast %248 : vector<1x64xf32> to vector<16x64xf32>
    %250 = arith.mulf %249, %65 : vector<16x64xf32>
    %251 = math.exp %250 : vector<16x64xf32>
    %252 = vector.extract_strided_slice %123 {offsets = [15, 0], sizes = [1, 16], strides = [1, 1]} : vector<16x16xf32> to vector<1x16xf32>
    %253 = vector.extract_strided_slice %142 {offsets = [15, 0], sizes = [1, 64], strides = [1, 1]} : vector<16x64xf32> to vector<1x64xf32>
    %cst_66 = arith.constant dense<0.000000e+00> : vector<16x64xf32>
    %254 = tpu.matmul %252, %253, %cst_66 {dimension_numbers = #tpu.dot_dimension_numbers<[0], [0], [1], [1], [0, 1, 1, 1], [], []>} : vector<1x16xf32>, vector<1x64xf32>, vector<16x64xf32> -> vector<16x64xf32>
    %cst_67 = arith.constant 0.000000e+00 : f32
    %255 = vector.broadcast %cst_67 : f32 to vector<16x64xf32>
    %256 = arith.mulf %146, %255 : vector<16x64xf32>
    %257 = arith.addf %256, %149 : vector<16x64xf32>
    %258 = vector.extract_strided_slice %124 {offsets = [0, 0], sizes = [1, 16], strides = [1, 1]} : vector<16x16xf32> to vector<1x16xf32>
    %cst_68 = arith.constant dense<0.000000e+00> : vector<1x64xf32>
    %259 = tpu.matmul %258, %257, %cst_68 {dimension_numbers = #tpu.dot_dimension_numbers<[1], [0], [0], [1], [0, 0, 1, 1], [], []>} : vector<1x16xf32>, vector<16x64xf32>, vector<1x64xf32> -> vector<1x64xf32>
    %260 = arith.mulf %153, %257 : vector<16x64xf32>
    %261 = arith.addf %260, %156 : vector<16x64xf32>
    %262 = vector.extract_strided_slice %124 {offsets = [1, 0], sizes = [1, 16], strides = [1, 1]} : vector<16x16xf32> to vector<1x16xf32>
    %cst_69 = arith.constant dense<0.000000e+00> : vector<1x64xf32>
    %263 = tpu.matmul %262, %261, %cst_69 {dimension_numbers = #tpu.dot_dimension_numbers<[1], [0], [0], [1], [0, 0, 1, 1], [], []>} : vector<1x16xf32>, vector<16x64xf32>, vector<1x64xf32> -> vector<1x64xf32>
    %264 = arith.mulf %160, %261 : vector<16x64xf32>
    %265 = arith.addf %264, %163 : vector<16x64xf32>
    %266 = vector.extract_strided_slice %124 {offsets = [2, 0], sizes = [1, 16], strides = [1, 1]} : vector<16x16xf32> to vector<1x16xf32>
    %cst_70 = arith.constant dense<0.000000e+00> : vector<1x64xf32>
    %267 = tpu.matmul %266, %265, %cst_70 {dimension_numbers = #tpu.dot_dimension_numbers<[1], [0], [0], [1], [0, 0, 1, 1], [], []>} : vector<1x16xf32>, vector<16x64xf32>, vector<1x64xf32> -> vector<1x64xf32>
    %268 = arith.mulf %167, %265 : vector<16x64xf32>
    %269 = arith.addf %268, %170 : vector<16x64xf32>
    %270 = vector.extract_strided_slice %124 {offsets = [3, 0], sizes = [1, 16], strides = [1, 1]} : vector<16x16xf32> to vector<1x16xf32>
    %cst_71 = arith.constant dense<0.000000e+00> : vector<1x64xf32>
    %271 = tpu.matmul %270, %269, %cst_71 {dimension_numbers = #tpu.dot_dimension_numbers<[1], [0], [0], [1], [0, 0, 1, 1], [], []>} : vector<1x16xf32>, vector<16x64xf32>, vector<1x64xf32> -> vector<1x64xf32>
    %272 = arith.mulf %174, %269 : vector<16x64xf32>
    %273 = arith.addf %272, %177 : vector<16x64xf32>
    %274 = vector.extract_strided_slice %124 {offsets = [4, 0], sizes = [1, 16], strides = [1, 1]} : vector<16x16xf32> to vector<1x16xf32>
    %cst_72 = arith.constant dense<0.000000e+00> : vector<1x64xf32>
    %275 = tpu.matmul %274, %273, %cst_72 {dimension_numbers = #tpu.dot_dimension_numbers<[1], [0], [0], [1], [0, 0, 1, 1], [], []>} : vector<1x16xf32>, vector<16x64xf32>, vector<1x64xf32> -> vector<1x64xf32>
    %276 = arith.mulf %181, %273 : vector<16x64xf32>
    %277 = arith.addf %276, %184 : vector<16x64xf32>
    %278 = vector.extract_strided_slice %124 {offsets = [5, 0], sizes = [1, 16], strides = [1, 1]} : vector<16x16xf32> to vector<1x16xf32>
    %cst_73 = arith.constant dense<0.000000e+00> : vector<1x64xf32>
    %279 = tpu.matmul %278, %277, %cst_73 {dimension_numbers = #tpu.dot_dimension_numbers<[1], [0], [0], [1], [0, 0, 1, 1], [], []>} : vector<1x16xf32>, vector<16x64xf32>, vector<1x64xf32> -> vector<1x64xf32>
    %280 = arith.mulf %188, %277 : vector<16x64xf32>
    %281 = arith.addf %280, %191 : vector<16x64xf32>
    %282 = vector.extract_strided_slice %124 {offsets = [6, 0], sizes = [1, 16], strides = [1, 1]} : vector<16x16xf32> to vector<1x16xf32>
    %cst_74 = arith.constant dense<0.000000e+00> : vector<1x64xf32>
    %283 = tpu.matmul %282, %281, %cst_74 {dimension_numbers = #tpu.dot_dimension_numbers<[1], [0], [0], [1], [0, 0, 1, 1], [], []>} : vector<1x16xf32>, vector<16x64xf32>, vector<1x64xf32> -> vector<1x64xf32>
    %284 = arith.mulf %195, %281 : vector<16x64xf32>
    %285 = arith.addf %284, %198 : vector<16x64xf32>
    %286 = vector.extract_strided_slice %124 {offsets = [7, 0], sizes = [1, 16], strides = [1, 1]} : vector<16x16xf32> to vector<1x16xf32>
    %cst_75 = arith.constant dense<0.000000e+00> : vector<1x64xf32>
    %287 = tpu.matmul %286, %285, %cst_75 {dimension_numbers = #tpu.dot_dimension_numbers<[1], [0], [0], [1], [0, 0, 1, 1], [], []>} : vector<1x16xf32>, vector<16x64xf32>, vector<1x64xf32> -> vector<1x64xf32>
    %cst_76 = arith.constant 0.000000e+00 : f32
    %288 = vector.broadcast %cst_76 : f32 to vector<16x64xf32>
    %289 = arith.mulf %202, %288 : vector<16x64xf32>
    %290 = arith.addf %289, %205 : vector<16x64xf32>
    %291 = vector.extract_strided_slice %124 {offsets = [8, 0], sizes = [1, 16], strides = [1, 1]} : vector<16x16xf32> to vector<1x16xf32>
    %cst_77 = arith.constant dense<0.000000e+00> : vector<1x64xf32>
    %292 = tpu.matmul %291, %290, %cst_77 {dimension_numbers = #tpu.dot_dimension_numbers<[1], [0], [0], [1], [0, 0, 1, 1], [], []>} : vector<1x16xf32>, vector<16x64xf32>, vector<1x64xf32> -> vector<1x64xf32>
    %293 = arith.mulf %209, %290 : vector<16x64xf32>
    %294 = arith.addf %293, %212 : vector<16x64xf32>
    %295 = vector.extract_strided_slice %124 {offsets = [9, 0], sizes = [1, 16], strides = [1, 1]} : vector<16x16xf32> to vector<1x16xf32>
    %cst_78 = arith.constant dense<0.000000e+00> : vector<1x64xf32>
    %296 = tpu.matmul %295, %294, %cst_78 {dimension_numbers = #tpu.dot_dimension_numbers<[1], [0], [0], [1], [0, 0, 1, 1], [], []>} : vector<1x16xf32>, vector<16x64xf32>, vector<1x64xf32> -> vector<1x64xf32>
    %297 = arith.mulf %216, %294 : vector<16x64xf32>
    %298 = arith.addf %297, %219 : vector<16x64xf32>
    %299 = vector.extract_strided_slice %124 {offsets = [10, 0], sizes = [1, 16], strides = [1, 1]} : vector<16x16xf32> to vector<1x16xf32>
    %cst_79 = arith.constant dense<0.000000e+00> : vector<1x64xf32>
    %300 = tpu.matmul %299, %298, %cst_79 {dimension_numbers = #tpu.dot_dimension_numbers<[1], [0], [0], [1], [0, 0, 1, 1], [], []>} : vector<1x16xf32>, vector<16x64xf32>, vector<1x64xf32> -> vector<1x64xf32>
    %301 = arith.mulf %223, %298 : vector<16x64xf32>
    %302 = arith.addf %301, %226 : vector<16x64xf32>
    %303 = vector.extract_strided_slice %124 {offsets = [11, 0], sizes = [1, 16], strides = [1, 1]} : vector<16x16xf32> to vector<1x16xf32>
    %cst_80 = arith.constant dense<0.000000e+00> : vector<1x64xf32>
    %304 = tpu.matmul %303, %302, %cst_80 {dimension_numbers = #tpu.dot_dimension_numbers<[1], [0], [0], [1], [0, 0, 1, 1], [], []>} : vector<1x16xf32>, vector<16x64xf32>, vector<1x64xf32> -> vector<1x64xf32>
    %305 = arith.mulf %230, %302 : vector<16x64xf32>
    %306 = arith.addf %305, %233 : vector<16x64xf32>
    %307 = vector.extract_strided_slice %124 {offsets = [12, 0], sizes = [1, 16], strides = [1, 1]} : vector<16x16xf32> to vector<1x16xf32>
    %cst_81 = arith.constant dense<0.000000e+00> : vector<1x64xf32>
    %308 = tpu.matmul %307, %306, %cst_81 {dimension_numbers = #tpu.dot_dimension_numbers<[1], [0], [0], [1], [0, 0, 1, 1], [], []>} : vector<1x16xf32>, vector<16x64xf32>, vector<1x64xf32> -> vector<1x64xf32>
    %309 = arith.mulf %237, %306 : vector<16x64xf32>
    %310 = arith.addf %309, %240 : vector<16x64xf32>
    %311 = vector.extract_strided_slice %124 {offsets = [13, 0], sizes = [1, 16], strides = [1, 1]} : vector<16x16xf32> to vector<1x16xf32>
    %cst_82 = arith.constant dense<0.000000e+00> : vector<1x64xf32>
    %312 = tpu.matmul %311, %310, %cst_82 {dimension_numbers = #tpu.dot_dimension_numbers<[1], [0], [0], [1], [0, 0, 1, 1], [], []>} : vector<1x16xf32>, vector<16x64xf32>, vector<1x64xf32> -> vector<1x64xf32>
    %313 = arith.mulf %244, %310 : vector<16x64xf32>
    %314 = arith.addf %313, %247 : vector<16x64xf32>
    %315 = vector.extract_strided_slice %124 {offsets = [14, 0], sizes = [1, 16], strides = [1, 1]} : vector<16x16xf32> to vector<1x16xf32>
    %cst_83 = arith.constant dense<0.000000e+00> : vector<1x64xf32>
    %316 = tpu.matmul %315, %314, %cst_83 {dimension_numbers = #tpu.dot_dimension_numbers<[1], [0], [0], [1], [0, 0, 1, 1], [], []>} : vector<1x16xf32>, vector<16x64xf32>, vector<1x64xf32> -> vector<1x64xf32>
    %317 = arith.mulf %251, %314 : vector<16x64xf32>
    %318 = arith.addf %317, %254 : vector<16x64xf32>
    %319 = vector.extract_strided_slice %124 {offsets = [15, 0], sizes = [1, 16], strides = [1, 1]} : vector<16x16xf32> to vector<1x16xf32>
    %cst_84 = arith.constant dense<0.000000e+00> : vector<1x64xf32>
    %320 = tpu.matmul %319, %318, %cst_84 {dimension_numbers = #tpu.dot_dimension_numbers<[1], [0], [0], [1], [0, 0, 1, 1], [], []>} : vector<1x16xf32>, vector<16x64xf32>, vector<1x64xf32> -> vector<1x64xf32>
    %321 = tpu.concatenate %259, %263, %267, %271, %275, %279, %283, %287, %292, %296, %300, %304, %308, %312, %316, %320 in 0 : vector<1x64xf32>, vector<1x64xf32>, vector<1x64xf32>, vector<1x64xf32>, vector<1x64xf32>, vector<1x64xf32>, vector<1x64xf32>, vector<1x64xf32>, vector<1x64xf32>, vector<1x64xf32>, vector<1x64xf32>, vector<1x64xf32>, vector<1x64xf32>, vector<1x64xf32>, vector<1x64xf32>, vector<1x64xf32> -> vector<16x64xf32>
    %322 = vector.broadcast %63 : vector<1x64xf32> to vector<16x64xf32>
    %323 = arith.mulf %322, %120 : vector<16x64xf32>
    %324 = arith.addf %321, %323 : vector<16x64xf32>
    %325 = arith.negf %82 : vector<16x64xf32>
    %326 = math.exp %325 : vector<16x64xf32>
    %cst_85 = arith.constant 1.000000e+00 : f32
    %327 = vector.broadcast %cst_85 : f32 to vector<16x64xf32>
    %328 = arith.addf %327, %326 : vector<16x64xf32>
    %329 = arith.divf %327, %328 : vector<16x64xf32>
    %330 = arith.mulf %82, %329 : vector<16x64xf32>
    %331 = arith.mulf %324, %330 : vector<16x64xf32>
    %cst_86 = arith.constant dense<0.000000e+00> : vector<16x32xf32>
    %332 = tpu.matmul %331, %67, %cst_86 {dimension_numbers = #tpu.dot_dimension_numbers<[1], [0], [0], [1], [0, 0, 1, 1], [], []>} : vector<16x64xf32>, vector<64x32xf32>, vector<16x32xf32> -> vector<16x32xf32>
    %333 = arith.addf %46, %332 : vector<16x32xf32>
    %c1 = arith.constant 1 : index
    %c0_87 = arith.constant 0 : index
    %c0_88 = arith.constant 0 : index
    %334 = vector.load %arg4[%c1, %c0_87, %c0_88] : memref<2x1x32xf32, #tpu.memory_space<vmem>>, vector<1x1x32xf32>
    %335 = vector.shape_cast %334 : vector<1x1x32xf32> to vector<1x32xf32>
    %c1_89 = arith.constant 1 : index
    %c0_90 = arith.constant 0 : index
    %c0_91 = arith.constant 0 : index
    %336 = vector.load %arg5[%c1_89, %c0_90, %c0_91] : memref<2x32x128xf32, #tpu.memory_space<vmem>>, vector<1x32x128xf32>
    %337 = vector.shape_cast %336 : vector<1x32x128xf32> to vector<32x128xf32>
    %c1_92 = arith.constant 1 : index
    %c0_93 = arith.constant 0 : index
    %c0_94 = arith.constant 0 : index
    %338 = vector.load %arg6[%c1_92, %c0_93, %c0_94] : memref<2x4x64xf32, #tpu.memory_space<vmem>>, vector<1x4x64xf32>
    %339 = vector.shape_cast %338 : vector<1x4x64xf32> to vector<4x64xf32>
    %c1_95 = arith.constant 1 : index
    %c0_96 = arith.constant 0 : index
    %c0_97 = arith.constant 0 : index
    %340 = vector.load %arg7[%c1_95, %c0_96, %c0_97] : memref<2x64x34xf32, #tpu.memory_space<vmem>>, vector<1x64x34xf32>
    %341 = vector.shape_cast %340 : vector<1x64x34xf32> to vector<64x34xf32>
    %c1_98 = arith.constant 1 : index
    %c0_99 = arith.constant 0 : index
    %c0_100 = arith.constant 0 : index
    %342 = vector.load %arg8[%c1_98, %c0_99, %c0_100] : memref<2x2x64xf32, #tpu.memory_space<vmem>>, vector<1x2x64xf32>
    %343 = vector.shape_cast %342 : vector<1x2x64xf32> to vector<2x64xf32>
    %c1_101 = arith.constant 1 : index
    %c0_102 = arith.constant 0 : index
    %c0_103 = arith.constant 0 : index
    %344 = vector.load %arg9[%c1_101, %c0_102, %c0_103] : memref<2x3x64xf32, #tpu.memory_space<vmem>>, vector<1x3x64xf32>
    %345 = vector.shape_cast %344 : vector<1x3x64xf32> to vector<3x64xf32>
    %346 = vector.extract_strided_slice %345 {offsets = [0, 0], sizes = [1, 64], strides = [1, 1]} : vector<3x64xf32> to vector<1x64xf32>
    %347 = vector.extract_strided_slice %345 {offsets = [1, 0], sizes = [1, 64], strides = [1, 1]} : vector<3x64xf32> to vector<1x64xf32>
    %348 = vector.extract_strided_slice %345 {offsets = [2, 0], sizes = [1, 64], strides = [1, 1]} : vector<3x64xf32> to vector<1x64xf32>
    %c1_104 = arith.constant 1 : index
    %c0_105 = arith.constant 0 : index
    %c0_106 = arith.constant 0 : index
    %349 = vector.load %arg10[%c1_104, %c0_105, %c0_106] : memref<2x16x64xf32, #tpu.memory_space<vmem>>, vector<1x16x64xf32>
    %350 = vector.shape_cast %349 : vector<1x16x64xf32> to vector<16x64xf32>
    %c1_107 = arith.constant 1 : index
    %c0_108 = arith.constant 0 : index
    %c0_109 = arith.constant 0 : index
    %351 = vector.load %arg11[%c1_107, %c0_108, %c0_109] : memref<2x64x32xf32, #tpu.memory_space<vmem>>, vector<1x64x32xf32>
    %352 = vector.shape_cast %351 : vector<1x64x32xf32> to vector<64x32xf32>
    %353 = arith.mulf %333, %333 : vector<16x32xf32>
    %cst_110 = arith.constant dense<0.000000e+00> : vector<16xf32>
    %354 = vector.multi_reduction <add>, %353, %cst_110 [1] : vector<16x32xf32> to vector<16xf32>
    %355 = vector.shape_cast %354 : vector<16xf32> to vector<16x1xf32>
    %cst_111 = arith.constant 3.200000e+01 : f32
    %356 = vector.broadcast %cst_111 : f32 to vector<16x1xf32>
    %357 = arith.divf %355, %356 : vector<16x1xf32>
    %cst_112 = arith.constant 9.99999974E-6 : f32
    %358 = vector.broadcast %cst_112 : f32 to vector<16x1xf32>
    %359 = arith.addf %357, %358 : vector<16x1xf32>
    %360 = math.rsqrt %359 : vector<16x1xf32>
    %361 = vector.broadcast %360 : vector<16x1xf32> to vector<16x32xf32>
    %362 = arith.mulf %333, %361 : vector<16x32xf32>
    %363 = vector.broadcast %335 : vector<1x32xf32> to vector<16x32xf32>
    %364 = arith.mulf %362, %363 : vector<16x32xf32>
    %cst_113 = arith.constant dense<0.000000e+00> : vector<16x128xf32>
    %365 = tpu.matmul %364, %337, %cst_113 {dimension_numbers = #tpu.dot_dimension_numbers<[1], [0], [0], [1], [0, 0, 1, 1], [], []>} : vector<16x32xf32>, vector<32x128xf32>, vector<16x128xf32> -> vector<16x128xf32>
    %366 = vector.extract_strided_slice %365 {offsets = [0, 0], sizes = [16, 64], strides = [1, 1]} : vector<16x128xf32> to vector<16x64xf32>
    %367 = vector.extract_strided_slice %365 {offsets = [0, 64], sizes = [16, 64], strides = [1, 1]} : vector<16x128xf32> to vector<16x64xf32>
    %368 = vector.extract_strided_slice %339 {offsets = [3, 0], sizes = [1, 64], strides = [1, 1]} : vector<4x64xf32> to vector<1x64xf32>
    %369 = vector.broadcast %368 : vector<1x64xf32> to vector<16x64xf32>
    %370 = arith.mulf %366, %369 : vector<16x64xf32>
    %c1_i32_114 = arith.constant 1 : i32
    %371 = tpu.dynamic_rotate %366 by %c1_i32_114 dim 0 : vector<16x64xf32>, i32 -> vector<16x64xf32>
    %c1_i32_115 = arith.constant 1 : i32
    %372 = vector.broadcast %c1_i32_115 : i32 to vector<16x64xi32>
    %373 = arith.cmpi sge, %48, %372 : vector<16x64xi32>
    %cst_116 = arith.constant 0.000000e+00 : f32
    %374 = vector.broadcast %cst_116 : f32 to vector<16x64xf32>
    %375 = arith.select %373, %371, %374 : vector<16x64xi1>, vector<16x64xf32>
    %376 = vector.extract_strided_slice %339 {offsets = [2, 0], sizes = [1, 64], strides = [1, 1]} : vector<4x64xf32> to vector<1x64xf32>
    %377 = vector.broadcast %376 : vector<1x64xf32> to vector<16x64xf32>
    %378 = arith.mulf %375, %377 : vector<16x64xf32>
    %379 = arith.addf %370, %378 : vector<16x64xf32>
    %c2_i32_117 = arith.constant 2 : i32
    %380 = tpu.dynamic_rotate %366 by %c2_i32_117 dim 0 : vector<16x64xf32>, i32 -> vector<16x64xf32>
    %c2_i32_118 = arith.constant 2 : i32
    %381 = vector.broadcast %c2_i32_118 : i32 to vector<16x64xi32>
    %382 = arith.cmpi sge, %48, %381 : vector<16x64xi32>
    %cst_119 = arith.constant 0.000000e+00 : f32
    %383 = vector.broadcast %cst_119 : f32 to vector<16x64xf32>
    %384 = arith.select %382, %380, %383 : vector<16x64xi1>, vector<16x64xf32>
    %385 = vector.extract_strided_slice %339 {offsets = [1, 0], sizes = [1, 64], strides = [1, 1]} : vector<4x64xf32> to vector<1x64xf32>
    %386 = vector.broadcast %385 : vector<1x64xf32> to vector<16x64xf32>
    %387 = arith.mulf %384, %386 : vector<16x64xf32>
    %388 = arith.addf %379, %387 : vector<16x64xf32>
    %c3_i32_120 = arith.constant 3 : i32
    %389 = tpu.dynamic_rotate %366 by %c3_i32_120 dim 0 : vector<16x64xf32>, i32 -> vector<16x64xf32>
    %c3_i32_121 = arith.constant 3 : i32
    %390 = vector.broadcast %c3_i32_121 : i32 to vector<16x64xi32>
    %391 = arith.cmpi sge, %48, %390 : vector<16x64xi32>
    %cst_122 = arith.constant 0.000000e+00 : f32
    %392 = vector.broadcast %cst_122 : f32 to vector<16x64xf32>
    %393 = arith.select %391, %389, %392 : vector<16x64xi1>, vector<16x64xf32>
    %394 = vector.extract_strided_slice %339 {offsets = [0, 0], sizes = [1, 64], strides = [1, 1]} : vector<4x64xf32> to vector<1x64xf32>
    %395 = vector.broadcast %394 : vector<1x64xf32> to vector<16x64xf32>
    %396 = arith.mulf %393, %395 : vector<16x64xf32>
    %397 = arith.addf %388, %396 : vector<16x64xf32>
    %398 = vector.broadcast %346 : vector<1x64xf32> to vector<16x64xf32>
    %399 = arith.addf %397, %398 : vector<16x64xf32>
    %400 = arith.negf %399 : vector<16x64xf32>
    %401 = math.exp %400 : vector<16x64xf32>
    %cst_123 = arith.constant 1.000000e+00 : f32
    %402 = vector.broadcast %cst_123 : f32 to vector<16x64xf32>
    %403 = arith.addf %402, %401 : vector<16x64xf32>
    %404 = arith.divf %402, %403 : vector<16x64xf32>
    %405 = arith.mulf %399, %404 : vector<16x64xf32>
    %cst_124 = arith.constant dense<0.000000e+00> : vector<16x34xf32>
    %406 = tpu.matmul %405, %341, %cst_124 {dimension_numbers = #tpu.dot_dimension_numbers<[1], [0], [0], [1], [0, 0, 1, 1], [], []>} : vector<16x64xf32>, vector<64x34xf32>, vector<16x34xf32> -> vector<16x34xf32>
    %407 = vector.extract_strided_slice %406 {offsets = [0, 0], sizes = [16, 2], strides = [1, 1]} : vector<16x34xf32> to vector<16x2xf32>
    %408 = vector.extract_strided_slice %406 {offsets = [0, 2], sizes = [16, 16], strides = [1, 1]} : vector<16x34xf32> to vector<16x16xf32>
    %409 = vector.extract_strided_slice %406 {offsets = [0, 18], sizes = [16, 16], strides = [1, 1]} : vector<16x34xf32> to vector<16x16xf32>
    %cst_125 = arith.constant dense<0.000000e+00> : vector<16x64xf32>
    %410 = tpu.matmul %407, %343, %cst_125 {dimension_numbers = #tpu.dot_dimension_numbers<[1], [0], [0], [1], [0, 0, 1, 1], [], []>} : vector<16x2xf32>, vector<2x64xf32>, vector<16x64xf32> -> vector<16x64xf32>
    %411 = vector.broadcast %347 : vector<1x64xf32> to vector<16x64xf32>
    %412 = arith.addf %410, %411 : vector<16x64xf32>
    %cst_126 = arith.constant 0.000000e+00 : f32
    %413 = vector.broadcast %cst_126 : f32 to vector<16x64xf32>
    %414 = arith.maximumf %412, %413 : vector<16x64xf32>
    %415 = vector.broadcast %cst_126 : f32 to vector<16x64xf32>
    %416 = arith.subf %412, %415 : vector<16x64xf32>
    %417 = arith.cmpf one, %416, %416 : vector<16x64xf32>
    %418 = vector.broadcast %cst_126 : f32 to vector<16x64xf32>
    %419 = arith.addf %412, %418 : vector<16x64xf32>
    %420 = math.absf %416 : vector<16x64xf32>
    %cst_127 = arith.constant 0.000000e+00 : f32
    %421 = vector.broadcast %cst_127 : f32 to vector<16x64xf32>
    %422 = arith.subf %421, %420 : vector<16x64xf32>
    %423 = math.exp %422 : vector<16x64xf32>
    %424 = math.log1p %423 : vector<16x64xf32>
    %425 = arith.addf %414, %424 : vector<16x64xf32>
    %426 = arith.select %417, %419, %425 : vector<16x64xi1>, vector<16x64xf32>
    %427 = arith.mulf %426, %405 : vector<16x64xf32>
    %428 = vector.extract_strided_slice %426 {offsets = [0, 0], sizes = [1, 64], strides = [1, 1]} : vector<16x64xf32> to vector<1x64xf32>
    %429 = vector.broadcast %428 : vector<1x64xf32> to vector<16x64xf32>
    %430 = arith.mulf %429, %350 : vector<16x64xf32>
    %431 = math.exp %430 : vector<16x64xf32>
    %432 = vector.extract_strided_slice %408 {offsets = [0, 0], sizes = [1, 16], strides = [1, 1]} : vector<16x16xf32> to vector<1x16xf32>
    %433 = vector.extract_strided_slice %427 {offsets = [0, 0], sizes = [1, 64], strides = [1, 1]} : vector<16x64xf32> to vector<1x64xf32>
    %cst_128 = arith.constant dense<0.000000e+00> : vector<16x64xf32>
    %434 = tpu.matmul %432, %433, %cst_128 {dimension_numbers = #tpu.dot_dimension_numbers<[0], [0], [1], [1], [0, 1, 1, 1], [], []>} : vector<1x16xf32>, vector<1x64xf32>, vector<16x64xf32> -> vector<16x64xf32>
    %435 = vector.extract_strided_slice %426 {offsets = [1, 0], sizes = [1, 64], strides = [1, 1]} : vector<16x64xf32> to vector<1x64xf32>
    %436 = vector.broadcast %435 : vector<1x64xf32> to vector<16x64xf32>
    %437 = arith.mulf %436, %350 : vector<16x64xf32>
    %438 = math.exp %437 : vector<16x64xf32>
    %439 = vector.extract_strided_slice %408 {offsets = [1, 0], sizes = [1, 16], strides = [1, 1]} : vector<16x16xf32> to vector<1x16xf32>
    %440 = vector.extract_strided_slice %427 {offsets = [1, 0], sizes = [1, 64], strides = [1, 1]} : vector<16x64xf32> to vector<1x64xf32>
    %cst_129 = arith.constant dense<0.000000e+00> : vector<16x64xf32>
    %441 = tpu.matmul %439, %440, %cst_129 {dimension_numbers = #tpu.dot_dimension_numbers<[0], [0], [1], [1], [0, 1, 1, 1], [], []>} : vector<1x16xf32>, vector<1x64xf32>, vector<16x64xf32> -> vector<16x64xf32>
    %442 = vector.extract_strided_slice %426 {offsets = [2, 0], sizes = [1, 64], strides = [1, 1]} : vector<16x64xf32> to vector<1x64xf32>
    %443 = vector.broadcast %442 : vector<1x64xf32> to vector<16x64xf32>
    %444 = arith.mulf %443, %350 : vector<16x64xf32>
    %445 = math.exp %444 : vector<16x64xf32>
    %446 = vector.extract_strided_slice %408 {offsets = [2, 0], sizes = [1, 16], strides = [1, 1]} : vector<16x16xf32> to vector<1x16xf32>
    %447 = vector.extract_strided_slice %427 {offsets = [2, 0], sizes = [1, 64], strides = [1, 1]} : vector<16x64xf32> to vector<1x64xf32>
    %cst_130 = arith.constant dense<0.000000e+00> : vector<16x64xf32>
    %448 = tpu.matmul %446, %447, %cst_130 {dimension_numbers = #tpu.dot_dimension_numbers<[0], [0], [1], [1], [0, 1, 1, 1], [], []>} : vector<1x16xf32>, vector<1x64xf32>, vector<16x64xf32> -> vector<16x64xf32>
    %449 = vector.extract_strided_slice %426 {offsets = [3, 0], sizes = [1, 64], strides = [1, 1]} : vector<16x64xf32> to vector<1x64xf32>
    %450 = vector.broadcast %449 : vector<1x64xf32> to vector<16x64xf32>
    %451 = arith.mulf %450, %350 : vector<16x64xf32>
    %452 = math.exp %451 : vector<16x64xf32>
    %453 = vector.extract_strided_slice %408 {offsets = [3, 0], sizes = [1, 16], strides = [1, 1]} : vector<16x16xf32> to vector<1x16xf32>
    %454 = vector.extract_strided_slice %427 {offsets = [3, 0], sizes = [1, 64], strides = [1, 1]} : vector<16x64xf32> to vector<1x64xf32>
    %cst_131 = arith.constant dense<0.000000e+00> : vector<16x64xf32>
    %455 = tpu.matmul %453, %454, %cst_131 {dimension_numbers = #tpu.dot_dimension_numbers<[0], [0], [1], [1], [0, 1, 1, 1], [], []>} : vector<1x16xf32>, vector<1x64xf32>, vector<16x64xf32> -> vector<16x64xf32>
    %456 = vector.extract_strided_slice %426 {offsets = [4, 0], sizes = [1, 64], strides = [1, 1]} : vector<16x64xf32> to vector<1x64xf32>
    %457 = vector.broadcast %456 : vector<1x64xf32> to vector<16x64xf32>
    %458 = arith.mulf %457, %350 : vector<16x64xf32>
    %459 = math.exp %458 : vector<16x64xf32>
    %460 = vector.extract_strided_slice %408 {offsets = [4, 0], sizes = [1, 16], strides = [1, 1]} : vector<16x16xf32> to vector<1x16xf32>
    %461 = vector.extract_strided_slice %427 {offsets = [4, 0], sizes = [1, 64], strides = [1, 1]} : vector<16x64xf32> to vector<1x64xf32>
    %cst_132 = arith.constant dense<0.000000e+00> : vector<16x64xf32>
    %462 = tpu.matmul %460, %461, %cst_132 {dimension_numbers = #tpu.dot_dimension_numbers<[0], [0], [1], [1], [0, 1, 1, 1], [], []>} : vector<1x16xf32>, vector<1x64xf32>, vector<16x64xf32> -> vector<16x64xf32>
    %463 = vector.extract_strided_slice %426 {offsets = [5, 0], sizes = [1, 64], strides = [1, 1]} : vector<16x64xf32> to vector<1x64xf32>
    %464 = vector.broadcast %463 : vector<1x64xf32> to vector<16x64xf32>
    %465 = arith.mulf %464, %350 : vector<16x64xf32>
    %466 = math.exp %465 : vector<16x64xf32>
    %467 = vector.extract_strided_slice %408 {offsets = [5, 0], sizes = [1, 16], strides = [1, 1]} : vector<16x16xf32> to vector<1x16xf32>
    %468 = vector.extract_strided_slice %427 {offsets = [5, 0], sizes = [1, 64], strides = [1, 1]} : vector<16x64xf32> to vector<1x64xf32>
    %cst_133 = arith.constant dense<0.000000e+00> : vector<16x64xf32>
    %469 = tpu.matmul %467, %468, %cst_133 {dimension_numbers = #tpu.dot_dimension_numbers<[0], [0], [1], [1], [0, 1, 1, 1], [], []>} : vector<1x16xf32>, vector<1x64xf32>, vector<16x64xf32> -> vector<16x64xf32>
    %470 = vector.extract_strided_slice %426 {offsets = [6, 0], sizes = [1, 64], strides = [1, 1]} : vector<16x64xf32> to vector<1x64xf32>
    %471 = vector.broadcast %470 : vector<1x64xf32> to vector<16x64xf32>
    %472 = arith.mulf %471, %350 : vector<16x64xf32>
    %473 = math.exp %472 : vector<16x64xf32>
    %474 = vector.extract_strided_slice %408 {offsets = [6, 0], sizes = [1, 16], strides = [1, 1]} : vector<16x16xf32> to vector<1x16xf32>
    %475 = vector.extract_strided_slice %427 {offsets = [6, 0], sizes = [1, 64], strides = [1, 1]} : vector<16x64xf32> to vector<1x64xf32>
    %cst_134 = arith.constant dense<0.000000e+00> : vector<16x64xf32>
    %476 = tpu.matmul %474, %475, %cst_134 {dimension_numbers = #tpu.dot_dimension_numbers<[0], [0], [1], [1], [0, 1, 1, 1], [], []>} : vector<1x16xf32>, vector<1x64xf32>, vector<16x64xf32> -> vector<16x64xf32>
    %477 = vector.extract_strided_slice %426 {offsets = [7, 0], sizes = [1, 64], strides = [1, 1]} : vector<16x64xf32> to vector<1x64xf32>
    %478 = vector.broadcast %477 : vector<1x64xf32> to vector<16x64xf32>
    %479 = arith.mulf %478, %350 : vector<16x64xf32>
    %480 = math.exp %479 : vector<16x64xf32>
    %481 = vector.extract_strided_slice %408 {offsets = [7, 0], sizes = [1, 16], strides = [1, 1]} : vector<16x16xf32> to vector<1x16xf32>
    %482 = vector.extract_strided_slice %427 {offsets = [7, 0], sizes = [1, 64], strides = [1, 1]} : vector<16x64xf32> to vector<1x64xf32>
    %cst_135 = arith.constant dense<0.000000e+00> : vector<16x64xf32>
    %483 = tpu.matmul %481, %482, %cst_135 {dimension_numbers = #tpu.dot_dimension_numbers<[0], [0], [1], [1], [0, 1, 1, 1], [], []>} : vector<1x16xf32>, vector<1x64xf32>, vector<16x64xf32> -> vector<16x64xf32>
    %484 = vector.extract_strided_slice %426 {offsets = [8, 0], sizes = [1, 64], strides = [1, 1]} : vector<16x64xf32> to vector<1x64xf32>
    %485 = vector.broadcast %484 : vector<1x64xf32> to vector<16x64xf32>
    %486 = arith.mulf %485, %350 : vector<16x64xf32>
    %487 = math.exp %486 : vector<16x64xf32>
    %488 = vector.extract_strided_slice %408 {offsets = [8, 0], sizes = [1, 16], strides = [1, 1]} : vector<16x16xf32> to vector<1x16xf32>
    %489 = vector.extract_strided_slice %427 {offsets = [8, 0], sizes = [1, 64], strides = [1, 1]} : vector<16x64xf32> to vector<1x64xf32>
    %cst_136 = arith.constant dense<0.000000e+00> : vector<16x64xf32>
    %490 = tpu.matmul %488, %489, %cst_136 {dimension_numbers = #tpu.dot_dimension_numbers<[0], [0], [1], [1], [0, 1, 1, 1], [], []>} : vector<1x16xf32>, vector<1x64xf32>, vector<16x64xf32> -> vector<16x64xf32>
    %491 = vector.extract_strided_slice %426 {offsets = [9, 0], sizes = [1, 64], strides = [1, 1]} : vector<16x64xf32> to vector<1x64xf32>
    %492 = vector.broadcast %491 : vector<1x64xf32> to vector<16x64xf32>
    %493 = arith.mulf %492, %350 : vector<16x64xf32>
    %494 = math.exp %493 : vector<16x64xf32>
    %495 = vector.extract_strided_slice %408 {offsets = [9, 0], sizes = [1, 16], strides = [1, 1]} : vector<16x16xf32> to vector<1x16xf32>
    %496 = vector.extract_strided_slice %427 {offsets = [9, 0], sizes = [1, 64], strides = [1, 1]} : vector<16x64xf32> to vector<1x64xf32>
    %cst_137 = arith.constant dense<0.000000e+00> : vector<16x64xf32>
    %497 = tpu.matmul %495, %496, %cst_137 {dimension_numbers = #tpu.dot_dimension_numbers<[0], [0], [1], [1], [0, 1, 1, 1], [], []>} : vector<1x16xf32>, vector<1x64xf32>, vector<16x64xf32> -> vector<16x64xf32>
    %498 = vector.extract_strided_slice %426 {offsets = [10, 0], sizes = [1, 64], strides = [1, 1]} : vector<16x64xf32> to vector<1x64xf32>
    %499 = vector.broadcast %498 : vector<1x64xf32> to vector<16x64xf32>
    %500 = arith.mulf %499, %350 : vector<16x64xf32>
    %501 = math.exp %500 : vector<16x64xf32>
    %502 = vector.extract_strided_slice %408 {offsets = [10, 0], sizes = [1, 16], strides = [1, 1]} : vector<16x16xf32> to vector<1x16xf32>
    %503 = vector.extract_strided_slice %427 {offsets = [10, 0], sizes = [1, 64], strides = [1, 1]} : vector<16x64xf32> to vector<1x64xf32>
    %cst_138 = arith.constant dense<0.000000e+00> : vector<16x64xf32>
    %504 = tpu.matmul %502, %503, %cst_138 {dimension_numbers = #tpu.dot_dimension_numbers<[0], [0], [1], [1], [0, 1, 1, 1], [], []>} : vector<1x16xf32>, vector<1x64xf32>, vector<16x64xf32> -> vector<16x64xf32>
    %505 = vector.extract_strided_slice %426 {offsets = [11, 0], sizes = [1, 64], strides = [1, 1]} : vector<16x64xf32> to vector<1x64xf32>
    %506 = vector.broadcast %505 : vector<1x64xf32> to vector<16x64xf32>
    %507 = arith.mulf %506, %350 : vector<16x64xf32>
    %508 = math.exp %507 : vector<16x64xf32>
    %509 = vector.extract_strided_slice %408 {offsets = [11, 0], sizes = [1, 16], strides = [1, 1]} : vector<16x16xf32> to vector<1x16xf32>
    %510 = vector.extract_strided_slice %427 {offsets = [11, 0], sizes = [1, 64], strides = [1, 1]} : vector<16x64xf32> to vector<1x64xf32>
    %cst_139 = arith.constant dense<0.000000e+00> : vector<16x64xf32>
    %511 = tpu.matmul %509, %510, %cst_139 {dimension_numbers = #tpu.dot_dimension_numbers<[0], [0], [1], [1], [0, 1, 1, 1], [], []>} : vector<1x16xf32>, vector<1x64xf32>, vector<16x64xf32> -> vector<16x64xf32>
    %512 = vector.extract_strided_slice %426 {offsets = [12, 0], sizes = [1, 64], strides = [1, 1]} : vector<16x64xf32> to vector<1x64xf32>
    %513 = vector.broadcast %512 : vector<1x64xf32> to vector<16x64xf32>
    %514 = arith.mulf %513, %350 : vector<16x64xf32>
    %515 = math.exp %514 : vector<16x64xf32>
    %516 = vector.extract_strided_slice %408 {offsets = [12, 0], sizes = [1, 16], strides = [1, 1]} : vector<16x16xf32> to vector<1x16xf32>
    %517 = vector.extract_strided_slice %427 {offsets = [12, 0], sizes = [1, 64], strides = [1, 1]} : vector<16x64xf32> to vector<1x64xf32>
    %cst_140 = arith.constant dense<0.000000e+00> : vector<16x64xf32>
    %518 = tpu.matmul %516, %517, %cst_140 {dimension_numbers = #tpu.dot_dimension_numbers<[0], [0], [1], [1], [0, 1, 1, 1], [], []>} : vector<1x16xf32>, vector<1x64xf32>, vector<16x64xf32> -> vector<16x64xf32>
    %519 = vector.extract_strided_slice %426 {offsets = [13, 0], sizes = [1, 64], strides = [1, 1]} : vector<16x64xf32> to vector<1x64xf32>
    %520 = vector.broadcast %519 : vector<1x64xf32> to vector<16x64xf32>
    %521 = arith.mulf %520, %350 : vector<16x64xf32>
    %522 = math.exp %521 : vector<16x64xf32>
    %523 = vector.extract_strided_slice %408 {offsets = [13, 0], sizes = [1, 16], strides = [1, 1]} : vector<16x16xf32> to vector<1x16xf32>
    %524 = vector.extract_strided_slice %427 {offsets = [13, 0], sizes = [1, 64], strides = [1, 1]} : vector<16x64xf32> to vector<1x64xf32>
    %cst_141 = arith.constant dense<0.000000e+00> : vector<16x64xf32>
    %525 = tpu.matmul %523, %524, %cst_141 {dimension_numbers = #tpu.dot_dimension_numbers<[0], [0], [1], [1], [0, 1, 1, 1], [], []>} : vector<1x16xf32>, vector<1x64xf32>, vector<16x64xf32> -> vector<16x64xf32>
    %526 = vector.extract_strided_slice %426 {offsets = [14, 0], sizes = [1, 64], strides = [1, 1]} : vector<16x64xf32> to vector<1x64xf32>
    %527 = vector.broadcast %526 : vector<1x64xf32> to vector<16x64xf32>
    %528 = arith.mulf %527, %350 : vector<16x64xf32>
    %529 = math.exp %528 : vector<16x64xf32>
    %530 = vector.extract_strided_slice %408 {offsets = [14, 0], sizes = [1, 16], strides = [1, 1]} : vector<16x16xf32> to vector<1x16xf32>
    %531 = vector.extract_strided_slice %427 {offsets = [14, 0], sizes = [1, 64], strides = [1, 1]} : vector<16x64xf32> to vector<1x64xf32>
    %cst_142 = arith.constant dense<0.000000e+00> : vector<16x64xf32>
    %532 = tpu.matmul %530, %531, %cst_142 {dimension_numbers = #tpu.dot_dimension_numbers<[0], [0], [1], [1], [0, 1, 1, 1], [], []>} : vector<1x16xf32>, vector<1x64xf32>, vector<16x64xf32> -> vector<16x64xf32>
    %533 = vector.extract_strided_slice %426 {offsets = [15, 0], sizes = [1, 64], strides = [1, 1]} : vector<16x64xf32> to vector<1x64xf32>
    %534 = vector.broadcast %533 : vector<1x64xf32> to vector<16x64xf32>
    %535 = arith.mulf %534, %350 : vector<16x64xf32>
    %536 = math.exp %535 : vector<16x64xf32>
    %537 = vector.extract_strided_slice %408 {offsets = [15, 0], sizes = [1, 16], strides = [1, 1]} : vector<16x16xf32> to vector<1x16xf32>
    %538 = vector.extract_strided_slice %427 {offsets = [15, 0], sizes = [1, 64], strides = [1, 1]} : vector<16x64xf32> to vector<1x64xf32>
    %cst_143 = arith.constant dense<0.000000e+00> : vector<16x64xf32>
    %539 = tpu.matmul %537, %538, %cst_143 {dimension_numbers = #tpu.dot_dimension_numbers<[0], [0], [1], [1], [0, 1, 1, 1], [], []>} : vector<1x16xf32>, vector<1x64xf32>, vector<16x64xf32> -> vector<16x64xf32>
    %cst_144 = arith.constant 0.000000e+00 : f32
    %540 = vector.broadcast %cst_144 : f32 to vector<16x64xf32>
    %541 = arith.mulf %431, %540 : vector<16x64xf32>
    %542 = arith.addf %541, %434 : vector<16x64xf32>
    %543 = vector.extract_strided_slice %409 {offsets = [0, 0], sizes = [1, 16], strides = [1, 1]} : vector<16x16xf32> to vector<1x16xf32>
    %cst_145 = arith.constant dense<0.000000e+00> : vector<1x64xf32>
    %544 = tpu.matmul %543, %542, %cst_145 {dimension_numbers = #tpu.dot_dimension_numbers<[1], [0], [0], [1], [0, 0, 1, 1], [], []>} : vector<1x16xf32>, vector<16x64xf32>, vector<1x64xf32> -> vector<1x64xf32>
    %545 = arith.mulf %438, %542 : vector<16x64xf32>
    %546 = arith.addf %545, %441 : vector<16x64xf32>
    %547 = vector.extract_strided_slice %409 {offsets = [1, 0], sizes = [1, 16], strides = [1, 1]} : vector<16x16xf32> to vector<1x16xf32>
    %cst_146 = arith.constant dense<0.000000e+00> : vector<1x64xf32>
    %548 = tpu.matmul %547, %546, %cst_146 {dimension_numbers = #tpu.dot_dimension_numbers<[1], [0], [0], [1], [0, 0, 1, 1], [], []>} : vector<1x16xf32>, vector<16x64xf32>, vector<1x64xf32> -> vector<1x64xf32>
    %549 = arith.mulf %445, %546 : vector<16x64xf32>
    %550 = arith.addf %549, %448 : vector<16x64xf32>
    %551 = vector.extract_strided_slice %409 {offsets = [2, 0], sizes = [1, 16], strides = [1, 1]} : vector<16x16xf32> to vector<1x16xf32>
    %cst_147 = arith.constant dense<0.000000e+00> : vector<1x64xf32>
    %552 = tpu.matmul %551, %550, %cst_147 {dimension_numbers = #tpu.dot_dimension_numbers<[1], [0], [0], [1], [0, 0, 1, 1], [], []>} : vector<1x16xf32>, vector<16x64xf32>, vector<1x64xf32> -> vector<1x64xf32>
    %553 = arith.mulf %452, %550 : vector<16x64xf32>
    %554 = arith.addf %553, %455 : vector<16x64xf32>
    %555 = vector.extract_strided_slice %409 {offsets = [3, 0], sizes = [1, 16], strides = [1, 1]} : vector<16x16xf32> to vector<1x16xf32>
    %cst_148 = arith.constant dense<0.000000e+00> : vector<1x64xf32>
    %556 = tpu.matmul %555, %554, %cst_148 {dimension_numbers = #tpu.dot_dimension_numbers<[1], [0], [0], [1], [0, 0, 1, 1], [], []>} : vector<1x16xf32>, vector<16x64xf32>, vector<1x64xf32> -> vector<1x64xf32>
    %557 = arith.mulf %459, %554 : vector<16x64xf32>
    %558 = arith.addf %557, %462 : vector<16x64xf32>
    %559 = vector.extract_strided_slice %409 {offsets = [4, 0], sizes = [1, 16], strides = [1, 1]} : vector<16x16xf32> to vector<1x16xf32>
    %cst_149 = arith.constant dense<0.000000e+00> : vector<1x64xf32>
    %560 = tpu.matmul %559, %558, %cst_149 {dimension_numbers = #tpu.dot_dimension_numbers<[1], [0], [0], [1], [0, 0, 1, 1], [], []>} : vector<1x16xf32>, vector<16x64xf32>, vector<1x64xf32> -> vector<1x64xf32>
    %561 = arith.mulf %466, %558 : vector<16x64xf32>
    %562 = arith.addf %561, %469 : vector<16x64xf32>
    %563 = vector.extract_strided_slice %409 {offsets = [5, 0], sizes = [1, 16], strides = [1, 1]} : vector<16x16xf32> to vector<1x16xf32>
    %cst_150 = arith.constant dense<0.000000e+00> : vector<1x64xf32>
    %564 = tpu.matmul %563, %562, %cst_150 {dimension_numbers = #tpu.dot_dimension_numbers<[1], [0], [0], [1], [0, 0, 1, 1], [], []>} : vector<1x16xf32>, vector<16x64xf32>, vector<1x64xf32> -> vector<1x64xf32>
    %565 = arith.mulf %473, %562 : vector<16x64xf32>
    %566 = arith.addf %565, %476 : vector<16x64xf32>
    %567 = vector.extract_strided_slice %409 {offsets = [6, 0], sizes = [1, 16], strides = [1, 1]} : vector<16x16xf32> to vector<1x16xf32>
    %cst_151 = arith.constant dense<0.000000e+00> : vector<1x64xf32>
    %568 = tpu.matmul %567, %566, %cst_151 {dimension_numbers = #tpu.dot_dimension_numbers<[1], [0], [0], [1], [0, 0, 1, 1], [], []>} : vector<1x16xf32>, vector<16x64xf32>, vector<1x64xf32> -> vector<1x64xf32>
    %569 = arith.mulf %480, %566 : vector<16x64xf32>
    %570 = arith.addf %569, %483 : vector<16x64xf32>
    %571 = vector.extract_strided_slice %409 {offsets = [7, 0], sizes = [1, 16], strides = [1, 1]} : vector<16x16xf32> to vector<1x16xf32>
    %cst_152 = arith.constant dense<0.000000e+00> : vector<1x64xf32>
    %572 = tpu.matmul %571, %570, %cst_152 {dimension_numbers = #tpu.dot_dimension_numbers<[1], [0], [0], [1], [0, 0, 1, 1], [], []>} : vector<1x16xf32>, vector<16x64xf32>, vector<1x64xf32> -> vector<1x64xf32>
    %cst_153 = arith.constant 0.000000e+00 : f32
    %573 = vector.broadcast %cst_153 : f32 to vector<16x64xf32>
    %574 = arith.mulf %487, %573 : vector<16x64xf32>
    %575 = arith.addf %574, %490 : vector<16x64xf32>
    %576 = vector.extract_strided_slice %409 {offsets = [8, 0], sizes = [1, 16], strides = [1, 1]} : vector<16x16xf32> to vector<1x16xf32>
    %cst_154 = arith.constant dense<0.000000e+00> : vector<1x64xf32>
    %577 = tpu.matmul %576, %575, %cst_154 {dimension_numbers = #tpu.dot_dimension_numbers<[1], [0], [0], [1], [0, 0, 1, 1], [], []>} : vector<1x16xf32>, vector<16x64xf32>, vector<1x64xf32> -> vector<1x64xf32>
    %578 = arith.mulf %494, %575 : vector<16x64xf32>
    %579 = arith.addf %578, %497 : vector<16x64xf32>
    %580 = vector.extract_strided_slice %409 {offsets = [9, 0], sizes = [1, 16], strides = [1, 1]} : vector<16x16xf32> to vector<1x16xf32>
    %cst_155 = arith.constant dense<0.000000e+00> : vector<1x64xf32>
    %581 = tpu.matmul %580, %579, %cst_155 {dimension_numbers = #tpu.dot_dimension_numbers<[1], [0], [0], [1], [0, 0, 1, 1], [], []>} : vector<1x16xf32>, vector<16x64xf32>, vector<1x64xf32> -> vector<1x64xf32>
    %582 = arith.mulf %501, %579 : vector<16x64xf32>
    %583 = arith.addf %582, %504 : vector<16x64xf32>
    %584 = vector.extract_strided_slice %409 {offsets = [10, 0], sizes = [1, 16], strides = [1, 1]} : vector<16x16xf32> to vector<1x16xf32>
    %cst_156 = arith.constant dense<0.000000e+00> : vector<1x64xf32>
    %585 = tpu.matmul %584, %583, %cst_156 {dimension_numbers = #tpu.dot_dimension_numbers<[1], [0], [0], [1], [0, 0, 1, 1], [], []>} : vector<1x16xf32>, vector<16x64xf32>, vector<1x64xf32> -> vector<1x64xf32>
    %586 = arith.mulf %508, %583 : vector<16x64xf32>
    %587 = arith.addf %586, %511 : vector<16x64xf32>
    %588 = vector.extract_strided_slice %409 {offsets = [11, 0], sizes = [1, 16], strides = [1, 1]} : vector<16x16xf32> to vector<1x16xf32>
    %cst_157 = arith.constant dense<0.000000e+00> : vector<1x64xf32>
    %589 = tpu.matmul %588, %587, %cst_157 {dimension_numbers = #tpu.dot_dimension_numbers<[1], [0], [0], [1], [0, 0, 1, 1], [], []>} : vector<1x16xf32>, vector<16x64xf32>, vector<1x64xf32> -> vector<1x64xf32>
    %590 = arith.mulf %515, %587 : vector<16x64xf32>
    %591 = arith.addf %590, %518 : vector<16x64xf32>
    %592 = vector.extract_strided_slice %409 {offsets = [12, 0], sizes = [1, 16], strides = [1, 1]} : vector<16x16xf32> to vector<1x16xf32>
    %cst_158 = arith.constant dense<0.000000e+00> : vector<1x64xf32>
    %593 = tpu.matmul %592, %591, %cst_158 {dimension_numbers = #tpu.dot_dimension_numbers<[1], [0], [0], [1], [0, 0, 1, 1], [], []>} : vector<1x16xf32>, vector<16x64xf32>, vector<1x64xf32> -> vector<1x64xf32>
    %594 = arith.mulf %522, %591 : vector<16x64xf32>
    %595 = arith.addf %594, %525 : vector<16x64xf32>
    %596 = vector.extract_strided_slice %409 {offsets = [13, 0], sizes = [1, 16], strides = [1, 1]} : vector<16x16xf32> to vector<1x16xf32>
    %cst_159 = arith.constant dense<0.000000e+00> : vector<1x64xf32>
    %597 = tpu.matmul %596, %595, %cst_159 {dimension_numbers = #tpu.dot_dimension_numbers<[1], [0], [0], [1], [0, 0, 1, 1], [], []>} : vector<1x16xf32>, vector<16x64xf32>, vector<1x64xf32> -> vector<1x64xf32>
    %598 = arith.mulf %529, %595 : vector<16x64xf32>
    %599 = arith.addf %598, %532 : vector<16x64xf32>
    %600 = vector.extract_strided_slice %409 {offsets = [14, 0], sizes = [1, 16], strides = [1, 1]} : vector<16x16xf32> to vector<1x16xf32>
    %cst_160 = arith.constant dense<0.000000e+00> : vector<1x64xf32>
    %601 = tpu.matmul %600, %599, %cst_160 {dimension_numbers = #tpu.dot_dimension_numbers<[1], [0], [0], [1], [0, 0, 1, 1], [], []>} : vector<1x16xf32>, vector<16x64xf32>, vector<1x64xf32> -> vector<1x64xf32>
    %602 = arith.mulf %536, %599 : vector<16x64xf32>
    %603 = arith.addf %602, %539 : vector<16x64xf32>
    %604 = vector.extract_strided_slice %409 {offsets = [15, 0], sizes = [1, 16], strides = [1, 1]} : vector<16x16xf32> to vector<1x16xf32>
    %cst_161 = arith.constant dense<0.000000e+00> : vector<1x64xf32>
    %605 = tpu.matmul %604, %603, %cst_161 {dimension_numbers = #tpu.dot_dimension_numbers<[1], [0], [0], [1], [0, 0, 1, 1], [], []>} : vector<1x16xf32>, vector<16x64xf32>, vector<1x64xf32> -> vector<1x64xf32>
    %606 = tpu.concatenate %544, %548, %552, %556, %560, %564, %568, %572, %577, %581, %585, %589, %593, %597, %601, %605 in 0 : vector<1x64xf32>, vector<1x64xf32>, vector<1x64xf32>, vector<1x64xf32>, vector<1x64xf32>, vector<1x64xf32>, vector<1x64xf32>, vector<1x64xf32>, vector<1x64xf32>, vector<1x64xf32>, vector<1x64xf32>, vector<1x64xf32>, vector<1x64xf32>, vector<1x64xf32>, vector<1x64xf32>, vector<1x64xf32> -> vector<16x64xf32>
    %607 = vector.broadcast %348 : vector<1x64xf32> to vector<16x64xf32>
    %608 = arith.mulf %607, %405 : vector<16x64xf32>
    %609 = arith.addf %606, %608 : vector<16x64xf32>
    %610 = arith.negf %367 : vector<16x64xf32>
    %611 = math.exp %610 : vector<16x64xf32>
    %cst_162 = arith.constant 1.000000e+00 : f32
    %612 = vector.broadcast %cst_162 : f32 to vector<16x64xf32>
    %613 = arith.addf %612, %611 : vector<16x64xf32>
    %614 = arith.divf %612, %613 : vector<16x64xf32>
    %615 = arith.mulf %367, %614 : vector<16x64xf32>
    %616 = arith.mulf %609, %615 : vector<16x64xf32>
    %cst_163 = arith.constant dense<0.000000e+00> : vector<16x32xf32>
    %617 = tpu.matmul %616, %352, %cst_163 {dimension_numbers = #tpu.dot_dimension_numbers<[1], [0], [0], [1], [0, 0, 1, 1], [], []>} : vector<16x64xf32>, vector<64x32xf32>, vector<16x32xf32> -> vector<16x32xf32>
    %618 = arith.addf %333, %617 : vector<16x32xf32>
    %c0_164 = arith.constant 0 : index
    %c0_165 = arith.constant 0 : index
    %619 = vector.load %arg12[%c0_164, %c0_165] : memref<1x32xf32, #tpu.memory_space<vmem>>, vector<1x32xf32>
    %620 = arith.mulf %618, %618 : vector<16x32xf32>
    %cst_166 = arith.constant dense<0.000000e+00> : vector<16xf32>
    %621 = vector.multi_reduction <add>, %620, %cst_166 [1] : vector<16x32xf32> to vector<16xf32>
    %622 = vector.shape_cast %621 : vector<16xf32> to vector<16x1xf32>
    %cst_167 = arith.constant 3.200000e+01 : f32
    %623 = vector.broadcast %cst_167 : f32 to vector<16x1xf32>
    %624 = arith.divf %622, %623 : vector<16x1xf32>
    %cst_168 = arith.constant 9.99999974E-6 : f32
    %625 = vector.broadcast %cst_168 : f32 to vector<16x1xf32>
    %626 = arith.addf %624, %625 : vector<16x1xf32>
    %627 = math.rsqrt %626 : vector<16x1xf32>
    %628 = vector.broadcast %627 : vector<16x1xf32> to vector<16x32xf32>
    %629 = arith.mulf %618, %628 : vector<16x32xf32>
    %630 = vector.broadcast %619 : vector<1x32xf32> to vector<16x32xf32>
    %631 = arith.mulf %629, %630 : vector<16x32xf32>
    %c0_169 = arith.constant 0 : index
    %c0_170 = arith.constant 0 : index
    %632 = vector.load %arg13[%c0_169, %c0_170] : memref<32x512xf32, #tpu.memory_space<vmem>>, vector<32x512xf32>
    %cst_171 = arith.constant dense<0.000000e+00> : vector<16x512xf32>
    %633 = tpu.matmul %631, %632, %cst_171 {dimension_numbers = #tpu.dot_dimension_numbers<[1], [0], [0], [1], [0, 0, 1, 1], [], []>} : vector<16x32xf32>, vector<32x512xf32>, vector<16x512xf32> -> vector<16x512xf32>
    %c0_172 = arith.constant 0 : index
    %c0_173 = arith.constant 0 : index
    %634 = vector.load %arg14[%c0_172, %c0_173] : memref<16x512xf32, #tpu.memory_space<vmem>>, vector<16x512xf32>
    tpu.vector_store %arg14[%c0_172, %c0_173], %633 {strides = array<i32>} : memref<16x512xf32, #tpu.memory_space<vmem>>, vector<16x512xf32>,
    return
  }
}

</mosaic_0001>

<bundles_post_ra>
// kernel: tpu_custom_call.1
= control target key start
LH: loop header
LB: loop body
LE: loop exit
PB: predicated region body
PF: predicated region fallthrough
CT: control target
= control target key end

     0   :  { %v4905_v1 = vmov 0   ;;  %v4906_v2 = vmov 1500.0   ;;  %s6137_s0 = inlined_call_operand.vmem [shape: s32[16,1], index: 0, kind: input, shape index: {}]   ;;  %s6138_s1 = inlined_call_operand.vmem [shape: f32[16,1], index: 1, kind: input, shape index: {}]   ;;  %s6139_s2 = inlined_call_operand.vmem [shape: f32[16,1], index: 2, kind: input, shape index: {}]   ;;  %s6140_s3 = inlined_call_operand.vmem [shape: f32[16,32], index: 3, kind: input, shape index: {}]   ;;  %s6141_s4 = inlined_call_operand.vmem [shape: f32[2,1,32], index: 4, kind: input, shape index: {}]   ;;  %s6142_s5 = inlined_call_operand.vmem [shape: f32[2,32,128], index: 5, kind: input, shape index: {}]   ;;  %s6143_s6 = inlined_call_operand.vmem [shape: f32[2,4,64], index: 6, kind: input, shape index: {}]   ;;  %s6144_s7 = inlined_call_operand.vmem [shape: f32[2,64,34], index: 7, kind: input, shape index: {}]   ;;  %s6145_s8 = inlined_call_operand.vmem [shape: f32[2,2,64], index: 8, kind: input, shape index: {}]   ;;  %s6146_s9 = inlined_call_operand.vmem [shape: f32[2,3,64], index: 9, kind: input, shape index: {}]   ;;  %s6147_s10 = inlined_call_operand.vmem [shape: f32[2,16,64], index: 10, kind: input, shape index: {}]   ;;  %s6148_s11 = inlined_call_operand.vmem [shape: f32[2,64,32], index: 11, kind: input, shape index: {}]   ;;  %s6149_s12 = inlined_call_operand.vmem [shape: f32[1,32], index: 12, kind: input, shape index: {}]   ;;  %s6150_s13 = inlined_call_operand.vmem [shape: f32[32,512], index: 13, kind: input, shape index: {}]   ;;  %s6151_s14 = inlined_call_operand.hbm [shape: f32[16,512], index: 14, kind: output, shape index: {}]  }
   0x1   :  { %v48_v0 = vld [vmem:[%s6137_s0] sm:$0xff]  ;;  %4681 = vset.pattern.permute.xlu0 %v4905_v1  ;;  %4685 = vrcp.f32 %v4906_v2  ;;  %v49_v3 = vld [vmem:[%s6137_s0 + $0x8] sm:$0xff] }
   0x2   :  { %vm69_vm0 = vcmp.eq.s32.totalorder %v48_v0, 78  ;;  %vm71_vm1 = vcmp.eq.s32.totalorder %v48_v0, 79  ;;  %vm93_vm2 = vcmp.eq.s32.totalorder %v48_v0, 81  ;;  %vm95_vm3 = vcmp.eq.s32.totalorder %v48_v0, 82  ;;  %v50_v8 = vld [vmem:[%s6138_s1] sm:$0xff]  ;;  %v51_v11 = vld [vmem:[%s6138_s1 + $0x8] sm:$0xff] }
   0x3   :  { %vm73_vm4 = vmor %vm69_vm0, %vm71_vm1  ;;  %vm75_vm5 = vcmp.eq.s32.totalorder %v48_v0, 80  ;;  %vm99_vm7 = vcmp.eq.s32.totalorder %v48_v0, 83  ;;  %vm70_vm8 = vcmp.eq.s32.totalorder %v49_v3, 78  ;;  %vm72_vm9 = vcmp.eq.s32.totalorder %v49_v3, 79  ;;  %v63_v9 = vld [vmem:[%s6139_s2] sm:$0xff]  ;;  %v64_v12 = vld [vmem:[%s6139_s2 + $0x8] sm:$0xff] }
   0x4   :  { %vm97_vm6 = vmor %vm93_vm2, %vm95_vm3  ;;  %vm94_vm11 = vcmp.eq.s32.totalorder %v49_v3, 81  ;;  %vm96_vm12 = vcmp.eq.s32.totalorder %v49_v3, 82  ;;  %vm76_vm15 = vcmp.eq.s32.totalorder %v49_v3, 80  ;;  %vm100_vm1 = vcmp.eq.s32.totalorder %v49_v3, 83 }
   0x5   :  { %vm4996_vm10 = vmor %vm73_vm4, %vm75_vm5 }
   0x6   :  { %vm5000_vm13 = vmor %vm97_vm6, %vm99_vm7 }
   0x7   :  { %v4686_v4 = vpop.eup %4685  ;;  %vm74_vm14 = vmor %vm70_vm8, %vm72_vm9 }
   0x8   :  { %v55_v6 = vmul.f32 1500.0, %v4686_v4  ;;  %vm98_vm0 = vmor %vm94_vm11, %vm96_vm12 }
   0xa   :  { %v56_v10 = vsub.f32 1.0, %v55_v6 }
   0xb   :  { %19 = vsyncpa [#allocation3], 0  ;;  %v4470_v13 = vadd.f32 -1500.0, %v50_v8  ;;  %vm59_vm3 = vweird.f32 %v4686_v4  ;;  %v4472_v15 = vadd.f32 -1500.0, %v63_v9  ;;  %v4471_v16 = vadd.f32 -1500.0, %v51_v11  ;;  %v117_v43 = vld [vmem:[%s6140_s3] sm:$0xff] }
   0xc   :  { %v57_v14 = vmul.f32 %v4686_v4, %v56_v10  ;;  %vm78_vm2 = vmor %vm74_vm14, %vm76_vm15  ;;  %v4473_v17 = vadd.f32 -1500.0, %v64_v12  ;;  %v4907_v19 = vmov 0.0   ;;  %vm163_vm9 = vcmask 261120   ;;  %v118_v48 = vld [vmem:[%s6140_s3 + $0x8] sm:$0xff]  ;;  %v139_v57 = vld [vmem:[%s6142_s5 + $0x18] sm:$0xff]  ;;  %s4909_s20 = smov 126  }
   0xd   :  { %vm102_vm4 = vmor %vm98_vm0, %vm100_vm1  ;;  %v4474_v20 = vsel %vm4996_vm10, 1.0, %v4907_v19  ;;  %v4478_v22 = vsel %vm5000_vm13, 1.0, %v4907_v19  ;;  %v4475_v23 = vsel %vm78_vm2, 1.0, %v4907_v19  ;;  %v4908_v53 = vmov 32.0   ;;  %226 = vmatpush.msra.mxu1 %v139_v57  ;;  %v138_v58 = vld [vmem:[%s6142_s5 + $0x10] sm:$0xff]  ;;  %v137_v60 = vld [vmem:[%s6142_s5 + $0x8] sm:$0xff] }
   0xe   :  { %v58_v18 = vadd.f32 %v4686_v4, %v57_v14  ;;  %v4479_v24 = vsel %vm102_vm4, 1.0, %v4907_v19  ;;  %4687 = vrcp.f32 %v4908_v53  ;;  %v136_v61 = vld [vmem:[%s6142_s5] sm:$0xff]  ;;  %s4910_s2 = smov 110   ;;  %s4911_s24 = smov 64  }
   0xf   :  { %227 = vmatpush.msra.mxu1 %v138_v58  ;;  %v4682_v14 = vld [vmem:[%s6141_s4] ss:$0 sm:$0xff]  ;;  %s4458_s18 = sshll.u32 %s6151_s14, 4  ;;  %s4913_s19 = smov 512   ;;  %s4459_s18 = int_to_ptr.hbm [resolvable:$true] %s4458_s18 }
  0x10   :  { %v60_v21 = vsel %vm59_vm3, %v4686_v4, %v58_v18 }
  0x11   :  { %v61_v25 = vmul.f32 %v4470_v13, %v60_v21  ;;  %v67_v26 = vmul.f32 %v4472_v15, %v60_v21  ;;  %v62_v27 = vmul.f32 %v4471_v16, %v60_v21  ;;  %v68_v28 = vmul.f32 %v4473_v17, %v60_v21  ;;  %228 = vmatpush.msra.mxu1 %v137_v60 }
  0x13   :  { %v83_v29 = vmul.f32 %v4474_v20, %v61_v25  ;;  %v107_v30 = vmul.f32 %v4478_v22, %v67_v26  ;;  %v84_v31 = vmul.f32 %v4475_v23, %v62_v27  ;;  %v108_v32 = vmul.f32 %v4479_v24, %v68_v28  ;;  %229 = vmatpush.msra.mxu1 %v136_v61  ;;  %v148_v25 = vld [vmem:[%s6144_s7 + $0x38] sm:$0xff]  ;;  %v147_v26 = vld [vmem:[%s6144_s7 + $0x30] sm:$0xff]  ;;  %v146_v27 = vld [vmem:[%s6144_s7 + $0x28] sm:$0xff] }
  0x14   :  { %v4688_v54 = vpop.eup %4687  ;;  %v145_v28 = vld [vmem:[%s6144_s7 + $0x20] sm:$0xff] }
  0x15   :  { %vm85_vm5 = vcmp.eq.f32.partialorder %v83_v29, 0.0  ;;  %vm109_vm6 = vcmp.eq.f32.partialorder %v107_v30, 0.0  ;;  %vm86_vm7 = vcmp.eq.f32.partialorder %v84_v31, 0.0  ;;  %vm110_vm8 = vcmp.eq.f32.partialorder %v108_v32, 0.0  ;;  %337 = vmatpush.msrb.mxu1 %v148_v25 }
  0x16   :  { %v4476_v33 = vsel %vm85_vm5, 1.0, %v4907_v19  ;;  %v4480_v34 = vsel %vm109_vm6, 1.0, %v4907_v19  ;;  %v4477_v37 = vsel %vm86_vm7, 1.0, %v4907_v19  ;;  %v4481_v38 = vsel %vm110_vm8, 1.0, %v4907_v19 }
  0x17   :  { %v91_v35 = vadd.f32 %v4476_v33, %v83_v29  ;;  %v115_v36 = vadd.f32 %v4480_v34, %v107_v30  ;;  %v92_v40 = vadd.f32 %v4477_v37, %v84_v31  ;;  %v116_v41 = vadd.f32 %v4481_v38, %v108_v32  ;;  %338 = vmatpush.msrb.mxu1 %v147_v26  ;;  %v144_v29 = vld [vmem:[%s6144_s7 + $0x18] sm:$0xff]  ;;  %v143_v30 = vld [vmem:[%s6144_s7 + $0x10] sm:$0xff]  ;;  %v142_v31 = vld [vmem:[%s6144_s7 + $0x8] sm:$0xff] }
  0x18   :  { %v171_v55 = vmul.f32 32.0, %v4688_v54  ;;  %vm175_vm10 = vweird.f32 %v4688_v54  ;;  %v133_v32 = vlaneseq  ;;  %v141_v34 = vld [vmem:[%s6144_s7] sm:$0xff] }
  0x19   :  { %v119_v39 = vmul.f32 %v115_v36, %v91_v35  ;;  %v120_v42 = vmul.f32 %v116_v41, %v92_v40  ;;  %339 = vmatpush.msrb.mxu1 %v146_v27  ;;  %v140_v36 = vld [vmem:[%s6143_s6] sm:$0xf] }
  0x1a   :  { %v172_v56 = vsub.f32 1.0, %v171_v55  ;;  %v5085_v35 = vshrl.u32 %v133_v32, 7  ;;  %v237_v37 = vperm.slane %v140_v36, 3  ;;  %v248_v40 = vperm.slane %v140_v36, 2 }
  0x1b   :  { %123 = vperm.xlu0 %4681, %v119_v39   ;;  %340 = vmatpush.msrb.mxu1 %v145_v28  ;;  %v274_v58 = vperm.slane %v140_v36, 0 }
  0x1c   :  { %v173_v59 = vmul.f32 %v4688_v54, %v172_v56  ;;  %vm242_vm1 = vcmp.lt.s32.totalorder %v5085_v35, 1  ;;  %vm255_vm2 = vcmp.lt.s32.totalorder %v5085_v35, 2  ;;  %vm268_vm3 = vcmp.lt.s32.totalorder %v5085_v35, 3  ;;  %v5120_v56 = vld [vmem:[%s6146_s9] sm:$0x7] }
  0x1d   :  { %341 = vmatpush.msrb.mxu1 %v144_v29  ;;  %vm245_vm4 = vcmp.ge.s32.totalorder %v5085_v35, 1  ;;  %vm258_vm5 = vcmp.ge.s32.totalorder %v5085_v35, 2  ;;  %vm271_vm6 = vcmp.ge.s32.totalorder %v5085_v35, 3 }
  0x1e   :  { %v174_v62 = vadd.f32 %v4688_v54, %v173_v59 }
  0x1f   :  { %342 = vmatpush.msrb.mxu1 %v143_v30 }
  0x20   :  { %v5048_v63 = vsel %vm175_vm10, %v4688_v54, %v174_v62 }
  0x21   :  { %343 = vmatpush.msrb.mxu1 %v142_v31 }
  0x23   :  { %128 = vperm.xlu0 %4681, %v120_v42   ;;  %344 = vmatpush.msrb.mxu1 %v141_v34 }
  0x8d   :  { %v124_v44 = vpop.permute.xlu0 %123 }
  0x8e   :  { %v5023_v45 = vmul.f32 %v124_v44, %v117_v43 }
  0x90   :  { %v161_v46 = vmul.f32 %v5023_v45, %v5023_v45 }
  0x92   :  { %v164_v47 = vsel %vm163_vm9, %v161_v46, 0.0 }
  0x93   :  { %165 = vadd.xlane.f32.xlu1 %v164_v47 }
  0x95   :  { %v129_v49 = vpop.permute.xlu0 %128 }
  0x96   :  { %v5031_v50 = vmul.f32 %v129_v49, %v118_v48  ;;  %v261_v49 = vperm.slane %v140_v36, 1 }
  0x98   :  { %v162_v51 = vmul.f32 %v5031_v50, %v5031_v50 }
  0x9a   :  { %v167_v52 = vsel %vm163_vm9, %v162_v51, 0.0 }
  0x9b   :  { %168 = vadd.xlane.f32.xlu1 %v167_v52 }
 0x106   :  { %v166_v0 = vpop.xlane.xlu1 %165 }
 0x107   :  { %v177_v1 = vmul.f32 %v5048_v63, %v166_v0 }
 0x109   :  { %v179_v2 = vadd.f32 1e-05, %v177_v1 }
 0x10b   :  { %4689 = vrsqrt.f32 %v179_v2  ;;  %vm187_vm12 = vweird.f32 %v179_v2 }
 0x10e   :  { %v169_v3 = vpop.xlane.xlu1 %168 }
 0x10f   :  { %v178_v4 = vmul.f32 %v5048_v63, %v169_v3 }
 0x111   :  { %v4690_v5 = vpop.eup %4689  ;;  %v180_v6 = vadd.f32 1e-05, %v178_v4 }
 0x112   :  { %v182_v7 = vmul.f32 %v4690_v5, %v179_v2  ;;  %vm188_vm11 = vweird.f32 %v4690_v5 }
 0x113   :  { %4691 = vrsqrt.f32 %v180_v6  ;;  %vm189_vm13 = vmor %vm187_vm12, %vm188_vm11  ;;  %vm197_vm15 = vweird.f32 %v180_v6 }
 0x114   :  { %v183_v8 = vmul.f32 %v4690_v5, %v182_v7 }
 0x116   :  { %v184_v9 = vmul.f32 0.5, %v183_v8 }
 0x118   :  { %v185_v10 = vsub.f32 1.5, %v184_v9 }
 0x119   :  { %v4692_v11 = vpop.eup %4691 }
 0x11a   :  { %v192_v12 = vmul.f32 %v4692_v11, %v180_v6  ;;  %v186_v13 = vmul.f32 %v4690_v5, %v185_v10  ;;  %vm198_vm14 = vweird.f32 %v4692_v11 }
 0x11b   :  { %vm199_vm0 = vmor %vm197_vm15, %vm198_vm14 }
 0x11c   :  { %v193_v15 = vmul.f32 %v4692_v11, %v192_v12  ;;  %v190_v16 = vsel %vm189_vm13, %v4690_v5, %v186_v13  ;;  %v279_v5 = vperm.slane %v5120_v56, 0  ;;  %vm322_vm13 = vcmask 523264  }
 0x11d   :  { %v201_v17 = vmul.f32 %v190_v16, %v5023_v45 }
 0x11e   :  { %v194_v18 = vmul.f32 0.5, %v193_v15 }
 0x11f   :  { %v206_v19 = vmul.f32 %v4682_v14, %v201_v17 }
 0x120   :  { %v195_v20 = vsub.f32 1.5, %v194_v18 }
 0x121   :  { %4482 = vmatmul.msk.f32.vlgmr.msra.gmra.mxu1 %vm163_vm9, %v206_v19 }
 0x122   :  { %v196_v21 = vmul.f32 %v4692_v11, %v195_v20 }
 0x124   :  { %v200_v22 = vsel %vm199_vm0, %v4692_v11, %v196_v21 }
 0x125   :  { %v202_v23 = vmul.f32 %v200_v22, %v5031_v50 }
 0x127   :  { %v207_v24 = vmul.f32 %v4682_v14, %v202_v23 }
 0x129   :  { %4483 = vmatmul.msk.f32.gmra.mxu1 %vm163_vm9, %v207_v24 }
 0x19e   :  { %v5080_v33 = vpop.f32.mrf.mxu1 }
 0x19f   :  { %v240_v38 = vrot.slane %v5080_v33, 7  ;;  %v253_v41 = vrot.slane %v5080_v33, 6  ;;  %v266_v46 = vrot.slane %v5080_v33, 5  ;;  %v238_v55 = vmul.f32 %v237_v37, %v5080_v33 }
 0x1a6   :  { %v5094_v39 = vpop.f32.mrf.mxu1 }
 0x1a7   :  { %v241_v42 = vrot.slane %v5094_v39, 7  ;;  %v254_v43 = vrot.slane %v5094_v39, 6  ;;  %v267_v44 = vrot.slane %v5094_v39, 5  ;;  %v239_v59 = vmul.f32 %v237_v37, %v5094_v39 }
 0x1a9   :  { %v244_v47 = vsel %vm242_vm1, %v241_v42, %v240_v38  ;;  %v257_v48 = vsel %vm255_vm2, %v254_v43, %v253_v41  ;;  %v270_v53 = vsel %vm268_vm3, %v267_v44, %v266_v46  ;;  %v243_v54 = vsel %vm242_vm1, %v240_v38, %v241_v42 }
 0x1aa   :  { %v246_v51 = vsel %vm245_vm4, %v244_v47, 0.0  ;;  %v259_v52 = vsel %vm258_vm5, %v257_v48, 0.0  ;;  %v272_v60 = vsel %vm271_vm6, %v270_v53, 0.0  ;;  %v247_v61 = vsel %vm245_vm4, %v243_v54, 0.0 }
 0x1ab   :  { %v249_v57 = vmul.f32 %v248_v40, %v246_v51  ;;  %v256_v62 = vsel %vm255_vm2, %v253_v41, %v254_v43  ;;  %v269_v0 = vsel %vm268_vm3, %v266_v46, %v267_v44  ;;  %v262_v2 = vmul.f32 %v261_v49, %v259_v52 }
 0x1ac   :  { %v250_v3 = vmul.f32 %v248_v40, %v247_v61  ;;  %v260_v4 = vsel %vm258_vm5, %v256_v62, 0.0  ;;  %v273_v6 = vsel %vm271_vm6, %v269_v0, 0.0  ;;  %v275_v8 = vmul.f32 %v274_v58, %v272_v60 }
 0x1ad   :  { %v251_v1 = vadd.f32 %v249_v57, %v238_v55  ;;  %v263_v10 = vmul.f32 %v261_v49, %v260_v4  ;;  %v276_v13 = vmul.f32 %v274_v58, %v273_v6  ;;  %v149_v49 = vld [vmem:[%s6145_s8] sm:$0x3] }
 0x1ae   :  { %v252_v9 = vadd.f32 %v250_v3, %v239_v59 }
 0x1af   :  { %v264_v7 = vadd.f32 %v262_v2, %v251_v1 }
 0x1b0   :  { %v265_v12 = vadd.f32 %v263_v10, %v252_v9 }
 0x1b1   :  { %v277_v11 = vadd.f32 %v275_v8, %v264_v7  ;;  %v352_v8 = vperm.slane %v5120_v56, 1 }
 0x1b2   :  { %v278_v15 = vadd.f32 %v276_v13, %v265_v12 }
 0x1b3   :  { %v280_v14 = vadd.f32 %v279_v5, %v277_v11 }
 0x1b4   :  { %v281_v17 = vadd.f32 %v279_v5, %v278_v15 }
 0x1b5   :  { %v4484_v16 = vmul.f32 -1.442695, %v280_v14 }
 0x1b6   :  { %v4485_v18 = vmul.f32 -1.442695, %v281_v17 }
 0x1b7   :  { %4693 = vpow2.f32 %v4484_v16 }
 0x1b8   :  { %4695 = vpow2.f32 %v4485_v18 }
 0x1bd   :  { %v4694_v19 = vpop.eup %4693 }
 0x1be   :  { %v288_v20 = vadd.f32 1.0, %v4694_v19  ;;  %v4696_v21 = vpop.eup %4695 }
 0x1bf   :  { %v289_v22 = vadd.f32 1.0, %v4696_v21 }
 0x1c0   :  { %4697 = vrcp.f32 %v288_v20  ;;  %v301_v27 = vand.u32 2147483648, %v288_v20  ;;  %v299_v30 = vand.u32 2147483647, %v288_v20  ;;  %vm295_vm8 = vweird.f32 %v288_v20 }
 0x1c1   :  { %4699 = vrcp.f32 %v289_v22  ;;  %v316_v41 = vand.u32 2147483648, %v289_v22  ;;  %vm310_vm14 = vweird.f32 %v289_v22  ;;  %v314_v43 = vand.u32 2147483647, %v289_v22 }
 0x1c2   :  { %v302_v34 = vor.u32 1.1754944e-38, %v301_v27  ;;  %vm300_vm11 = vcmp.eq.f32.partialorder %v299_v30, 8.507059e+37 }
 0x1c3   :  { %v317_v46 = vor.u32 1.1754944e-38, %v316_v41  ;;  %vm315_vm0 = vcmp.eq.f32.partialorder %v314_v43, 8.507059e+37 }
 0x1c6   :  { %v4698_v23 = vpop.eup %4697 }
 0x1c7   :  { %v291_v24 = vmul.f32 %v4698_v23, %v288_v20  ;;  %v4700_v25 = vpop.eup %4699  ;;  %vm296_vm7 = vweird.f32 %v4698_v23 }
 0x1c8   :  { %v306_v28 = vmul.f32 %v4700_v25, %v289_v22  ;;  %vm297_vm10 = vmor %vm295_vm8, %vm296_vm7  ;;  %vm311_vm12 = vweird.f32 %v4700_v25  ;;  %vm360_vm7 = vcmask 1041408   ;;  %vm353_vm8 = vcmask 15360  }
 0x1c9   :  { %v292_v26 = vsub.f32 1.0, %v291_v24  ;;  %vm312_vm15 = vmor %vm310_vm14, %vm311_vm12  ;;  %4488 = vmatpush.msk.msra.mxu2 %vm360_vm7, %v149_v49  ;;  %vm474_vm12 = vcmask 1040384  }
 0x1ca   :  { %v307_v31 = vsub.f32 1.0, %v306_v28 }
 0x1cb   :  { %v293_v29 = vmul.f32 %v4698_v23, %v292_v26 }
 0x1cc   :  { %v308_v36 = vmul.f32 %v4700_v25, %v307_v31 }
 0x1cd   :  { %v294_v32 = vadd.f32 %v4698_v23, %v293_v29 }
 0x1ce   :  { %v309_v40 = vadd.f32 %v4700_v25, %v308_v36 }
 0x1cf   :  { %v298_v37 = vsel %vm297_vm10, %v4698_v23, %v294_v32 }
 0x1d0   :  { %v303_v38 = vsel %vm300_vm11, %v302_v34, %v298_v37  ;;  %v313_v44 = vsel %vm312_vm15, %v4700_v25, %v309_v40 }
 0x1d1   :  { %v5136_v42 = vmul.f32 %v303_v38, %v280_v14  ;;  %v318_v47 = vsel %vm315_vm0, %v317_v46, %v313_v44  ;;  %vm6153_vm0 = vcmask 7168  }
 0x1d2   :  { %v5140_v48 = vmul.f32 %v318_v47, %v281_v17 }
 0x1d3   :  { %4486 = vmatmul.msk.f32.vlgmr.msrb.gmra.mxu1 %vm322_vm13, %v5136_v42 }
 0x1db   :  { %4487 = vmatmul.msk.f32.gmra.mxu1 %vm322_vm13, %v5140_v48 }
 0x250   :  { %v5148_v51 = vpop.f32.mrf.mxu1 }
 0x251   :  { %432 = vrot.lane.b32.xlu2 %v5148_v51, %s4909_s20  ;;  %4489 = vmatmul.msk.f32.vlgmr.msra.gmra.mxu2 %vm353_vm8, %v5148_v51  ;;  %v508_v52 = vrot.slane %v5148_v51, 1  ;;  %v883_v53 = vrot.slane %v5148_v51, 6  ;;  %v583_v55 = vrot.slane %v5148_v51, 2  ;;  %v658_v59 = vrot.slane %v5148_v51, 3 }
 0x252   :  { %v808_v62 = vrot.slane %v5148_v51, 5  ;;  %v733_v1 = vrot.slane %v5148_v51, 4  ;;  %v958_v2 = vrot.slane %v5148_v51, 7 }
 0x253   :  { %509 = vrot.lane.b32.xlu0 %v508_v52, %s4909_s20 }
 0x258   :  { %v5159_v54 = vpop.f32.mrf.mxu1 }
 0x259   :  { %884 = vrot.lane.b32.xlu2 %v883_v53, %s4909_s20  ;;  %4490 = vmatmul.msk.f32.gmra.mxu2 %vm353_vm8, %v5159_v54  ;;  %v1182_v57 = vrot.slane %v5159_v54, 2  ;;  %v1407_v58 = vrot.slane %v5159_v54, 5  ;;  %v1482_v60 = vrot.slane %v5159_v54, 6  ;;  %v1332_v61 = vrot.slane %v5159_v54, 4 }
 0x25a   :  { %v1557_v0 = vrot.slane %v5159_v54, 7  ;;  %v1107_v3 = vrot.slane %v5159_v54, 1  ;;  %v1257_v4 = vrot.slane %v5159_v54, 3 }
 0x25b   :  { %584 = vrot.lane.b32.xlu0 %v583_v55, %s4909_s20  ;;  %1183 = vrot.lane.b32.xlu1 %v1182_v57, %s4909_s20 }
 0x261   :  { %1408 = vrot.lane.b32.xlu2 %v1407_v58, %s4909_s20 }
 0x263   :  { %659 = vrot.lane.b32.xlu0 %v658_v59, %s4909_s20  ;;  %1483 = vrot.lane.b32.xlu1 %v1482_v60, %s4909_s20 }
 0x269   :  { %1333 = vrot.lane.b32.xlu2 %v1332_v61, %s4909_s20 }
 0x26b   :  { %809 = vrot.lane.b32.xlu0 %v808_v62, %s4909_s20 }
 0x271   :  { %1558 = vrot.lane.b32.xlu2 %v1557_v0, %s4909_s20 }
 0x273   :  { %734 = vrot.lane.b32.xlu0 %v733_v1, %s4909_s20 }
 0x27b   :  { %959 = vrot.lane.b32.xlu0 %v958_v2, %s4909_s20 }
 0x283   :  { %1033 = vrot.lane.b32.xlu0 %v5159_v54, %s4909_s20 }
 0x28b   :  { %1108 = vrot.lane.b32.xlu0 %v1107_v3, %s4909_s20 }
 0x293   :  { %1258 = vrot.lane.b32.xlu0 %v1257_v4, %s4909_s20 }
 0x2ab   :  { %v433_v5 = vpop.permute.xlu2 %432 }
 0x2ac   :  { %435 = vxpose.xlu2.b32.start.end [1/1] (short) (narrow) %v433_v5, 16 }
 0x2b3   :  { %v885_v10 = vpop.permute.xlu2 %884 }
 0x2c5   :  { %v510_v6 = vpop.permute.xlu0 %509 }
 0x2c6   :  { %512 = vxpose.xlu1.b32.start.end [1/1] (short) (narrow) %v510_v6, 16 }
 0x2cd   :  { %v585_v7 = vpop.permute.xlu0 %584 }
 0x2ce   :  { %587 = vxpose.xlu0.b32.start.end [1/1] (short) (narrow) %v585_v7, 16 }
 0x2d4   :  { %v381_v9 = vpop.f32.mrf.mxu2 }
 0x2d5   :  { %v382_v11 = vadd.f32 %v381_v9, %v352_v8  ;;  %v660_v12 = vpop.permute.xlu0 %659 }
 0x2d6   :  { %887 = vxpose.xlu1.b32.start.end [1/1] (short) (narrow) %v885_v10, 16 }
 0x2d7   :  { %v393_v13 = vand.u32 2147483647, %v382_v11  ;;  %v387_v36 = vmax.f32 %v382_v11, 0.0  ;;  %vm389_vm11 = vcmp.ne.f32.partialorder %v382_v11, %v382_v11 }
 0x2d9   :  { %v395_v14 = vsub.f32 0.0, %v393_v13 }
 0x2db   :  { %v397_v15 = vmul.f32 1.442695, %v395_v14 }
 0x2dc   :  { %v384_v16 = vpop.f32.mrf.mxu2 }
 0x2dd   :  { %4701 = vpow2.f32 %v397_v15  ;;  %v385_v17 = vadd.f32 %v384_v16, %v352_v8  ;;  %v810_v18 = vpop.permute.xlu0 %809 }
 0x2de   :  { %812 = vxpose.xlu2.b32.start.end [1/1] (short) (narrow) %v810_v18, 16  ;;  %662 = vxpose.xlu0.b32.start.end [1/1] (short) (narrow) %v660_v12, 16 }
 0x2df   :  { %v394_v19 = vand.u32 2147483647, %v385_v17  ;;  %v388_v9 = vmax.f32 %v385_v17, 0.0  ;;  %vm390_vm15 = vcmp.ne.f32.partialorder %v385_v17, %v385_v17 }
 0x2e1   :  { %v396_v20 = vsub.f32 0.0, %v394_v19 }
 0x2e3   :  { %v4702_v21 = vpop.eup %4701  ;;  %v399_v22 = vmul.f32 1.442695, %v396_v20  ;;  %v5246_v20 = vld [vmem:[%s6147_s10] sm:$0xff] }
 0x2e4   :  { %v401_v23 = vadd.f32 1.0, %v4702_v21  ;;  %v404_v56 = vmul.f32 -0.5, %v4702_v21  ;;  %v407_v26 = vand.u32 2147483647, %v4702_v21 }
 0x2e5   :  { %4703 = vpow2.f32 %v399_v22  ;;  %v735_v24 = vpop.permute.xlu0 %734 }
 0x2e6   :  { %4705 = vlog2.f32 %v401_v23  ;;  %v405_v25 = vadd.f32 1.0, %v404_v56  ;;  %vm408_vm10 = vcmp.lt.f32.partialorder %v407_v26, 0.0004427343 }
 0x2e8   :  { %v406_v32 = vmul.f32 %v4702_v21, %v405_v25 }
 0x2eb   :  { %v4704_v27 = vpop.eup %4703 }
 0x2ec   :  { %v4706_v28 = vpop.eup %4705  ;;  %v410_v29 = vadd.f32 1.0, %v4704_v27  ;;  %v413_v30 = vmul.f32 -0.5, %v4704_v27  ;;  %v416_v43 = vand.u32 2147483647, %v4704_v27 }
 0x2ed   :  { %v403_v31 = vmul.f32 0.6931472, %v4706_v28  ;;  %v960_v34 = vpop.permute.xlu0 %959 }
 0x2ee   :  { %4707 = vlog2.f32 %v410_v29  ;;  %737 = vxpose.xlu2.b32.start.end [1/1] (short) (narrow) %v735_v24, 16  ;;  %962 = vxpose.xlu1.b32.start.end [1/1] (short) (narrow) %v960_v34, 16  ;;  %v414_v40 = vadd.f32 1.0, %v413_v30  ;;  %vm417_vm14 = vcmp.lt.f32.partialorder %v416_v43, 0.0004427343 }
 0x2ef   :  { %v409_v37 = vsel %vm408_vm10, %v406_v32, %v403_v31 }
 0x2f0   :  { %v419_v38 = vadd.f32 %v409_v37, %v387_v36  ;;  %v415_v47 = vmul.f32 %v4704_v27, %v414_v40 }
 0x2f2   :  { %v5217_v41 = vsel %vm389_vm11, %v382_v11, %v419_v38 }
 0x2f3   :  { %v5221_v44 = vmul.f32 %v5217_v41, %v5136_v42  ;;  %v801_v16 = vperm.slane %v5217_v41, 5  ;;  %v876_v18 = vperm.slane %v5217_v41, 6  ;;  %v951_v21 = vperm.slane %v5217_v41, 7 }
 0x2f4   :  { %v4708_v46 = vpop.eup %4707 }
 0x2f5   :  { %v412_v49 = vmul.f32 0.6931472, %v4708_v46  ;;  %4491 = vmatpush.msk.msra.mxu3 %vm474_vm12, %v5221_v44  ;;  %v1034_v5 = vpop.permute.xlu0 %1033  ;;  %v544_v6 = vrot.slane %v5221_v44, 1  ;;  %v619_v7 = vrot.slane %v5221_v44, 2  ;;  %v694_v8 = vrot.slane %v5221_v44, 3 }
 0x2f6   :  { %v769_v10 = vrot.slane %v5221_v44, 4  ;;  %v844_v11 = vrot.slane %v5221_v44, 5  ;;  %v5255_v22 = vmul.f32 %v801_v16, %v5246_v20  ;;  %v5264_v24 = vmul.f32 %v876_v18, %v5246_v20 }
 0x2f7   :  { %v418_v12 = vsel %vm417_vm14, %v415_v47, %v412_v49  ;;  %4494 = vmatpush.msk.msrb.mxu2 %vm474_vm12, %v544_v6  ;;  %4497 = vmatpush.msk.msrb.mxu3 %vm474_vm12, %v619_v7  ;;  %v5267_v25 = vmul.f32 %v951_v21, %v5246_v20  ;;  %v1184_v6 = vpop.permute.xlu1 %1183 }
 0x2f8   :  { %v420_v13 = vadd.f32 %v418_v12, %v388_v9  ;;  %4500 = vmatpush.msk.msra.mxu0 %vm474_vm12, %v694_v8  ;;  %4670 = vmatpush.msk.msra.mxu1 %vm474_vm12, %v769_v10 }
 0x2f9   :  { %4506 = vmatpush.msk.msra.mxu2 %vm474_vm12, %v844_v11 }
 0x2fa   :  { %4503 = vmatpush.msk.msrb.mxu0 %vm474_vm12, %v769_v10  ;;  %v422_v14 = vsel %vm390_vm15, %v385_v17, %v420_v13  ;;  %v5251_v17 = vld [vmem:[%s6147_s10 + $0x8] sm:$0xff] }
 0x2fb   :  { %v5237_v15 = vmul.f32 %v422_v14, %v5140_v48  ;;  %v5258_v23 = vmul.f32 %v801_v16, %v5251_v17  ;;  %v5261_v56 = vmul.f32 %v876_v18, %v5251_v17  ;;  %v5270_v26 = vmul.f32 %v951_v21, %v5251_v17 }
 0x2fc   :  { %v1026_v27 = vperm.slane %v422_v14, 0  ;;  %v1100_v28 = vperm.slane %v422_v14, 1  ;;  %v1175_v29 = vperm.slane %v422_v14, 2  ;;  %v1250_v30 = vperm.slane %v422_v14, 3 }
 0x2fd   :  { %v1109_v19 = vpop.permute.xlu0 %1108  ;;  %4515 = vmatpush.msk.msrb.mxu1 %vm474_vm12, %v5237_v15  ;;  %v1325_v46 = vperm.slane %v422_v14, 4  ;;  %v1400_v47 = vperm.slane %v422_v14, 5  ;;  %v1475_v49 = vperm.slane %v422_v14, 6  ;;  %v1550_v10 = vperm.slane %v422_v14, 7 }
 0x2fe   :  { %1036 = vxpose.xlu1.b32.start.end [1/1] (short) (narrow) %v1034_v5, 16  ;;  %1111 = vxpose.xlu0.b32.start.end [1/1] (short) (narrow) %v1109_v19, 16  ;;  %v5273_v31 = vmul.f32 %v1026_v27, %v5246_v20  ;;  %v5276_v32 = vmul.f32 %v1026_v27, %v5251_v17  ;;  %v5279_v34 = vmul.f32 %v1100_v28, %v5246_v20  ;;  %v1409_v5 = vpop.permute.xlu2 %1408 }
 0x2ff   :  { %v5282_v36 = vmul.f32 %v1100_v28, %v5251_v17  ;;  %v5285_v37 = vmul.f32 %v1175_v29, %v5246_v20  ;;  %v5288_v38 = vmul.f32 %v1250_v30, %v5246_v20  ;;  %v5291_v40 = vmul.f32 %v1175_v29, %v5251_v17  ;;  %v1484_v19 = vpop.permute.xlu1 %1483 }
 0x300   :  { %v5294_v43 = vmul.f32 %v1250_v30, %v5251_v17  ;;  %v5297_v7 = vmul.f32 %v1325_v46, %v5246_v20  ;;  %v5300_v8 = vmul.f32 %v1400_v47, %v5246_v20  ;;  %v5303_v9 = vmul.f32 %v1325_v46, %v5251_v17 }
 0x301   :  { %v5306_v11 = vmul.f32 %v1400_v47, %v5251_v17  ;;  %v5309_v12 = vmul.f32 %v1475_v49, %v5246_v20  ;;  %v5312_v13 = vmul.f32 %v1475_v49, %v5251_v17  ;;  %v5315_v16 = vmul.f32 %v1550_v10, %v5246_v20 }
 0x302   :  { %v5318_v18 = vmul.f32 %v1550_v10, %v5251_v17  ;;  %v919_v29 = vrot.slane %v5221_v44, 6  ;;  %v1143_v47 = vrot.slane %v5237_v15, 1 }
 0x305   :  { %v1259_v21 = vpop.permute.xlu0 %1258 }
 0x306   :  { %v1334_v14 = vpop.permute.xlu2 %1333 }
 0x30e   :  { %1186 = vxpose.xlu1.b32.start.end [1/1] (short) (narrow) %v1184_v6, 16  ;;  %1411 = vxpose.xlu0.b32.start.end [1/1] (short) (narrow) %v1409_v5, 16  ;;  %v1559_v27 = vpop.permute.xlu2 %1558  ;;  %v1218_v6 = vrot.slane %v5237_v15, 2 }
 0x31e   :  { %1486 = vxpose.xlu0.b32.start.end [1/1] (short) (narrow) %v1484_v19, 16  ;;  %1261 = vxpose.xlu1.b32.start.end [1/1] (short) (narrow) %v1259_v21, 16  ;;  %v1443_v19 = vrot.slane %v5237_v15, 5 }
 0x32e   :  { %1336 = vxpose.xlu1.b32.start.end [1/1] (short) (narrow) %v1334_v14, 16 }
 0x33e   :  { %1561 = vxpose.xlu1.b32.start.end [1/1] (short) (narrow) %v1559_v27, 16  ;;  %v994_v27 = vrot.slane %v5221_v44, 7 }
 0x345   :  { %v451_v28 = vpop.trf.xlu2 }
 0x346   :  { %4492 = vmatmul.msk.f32.vlgmr.msra.gmra.mxu3 %vm6153_vm0, %v451_v28  ;;  %v1518_v28 = vrot.slane %v5237_v15, 6 }
 0x347   :  { %4509 = vmatpush.msk.msra.mxu3 %vm474_vm12, %v919_v29 }
 0x34d   :  { %v452_v30 = vpop.trf.xlu2 }
 0x34e   :  { %4493 = vmatmul.msk.f32.gmra.mxu3 %vm6153_vm0, %v452_v30 }
 0x35f   :  { %1629 = vrot.lane.b32.xlu2 %v5148_v51, %s4910_s2 }
 0x367   :  { %1714 = vrot.lane.b32.xlu2 %v658_v59, %s4910_s2 }
 0x36a   :  { %v528_v46 = vpop.trf.xlu1 }
 0x36b   :  { %4495 = vmatmul.msk.f32.vlgmr.msrb.gmra.mxu2 %vm6153_vm0, %v528_v46 }
 0x36c   :  { %4518 = vmatpush.msk.msrb.mxu2 %vm474_vm12, %v1143_v47  ;;  %v4556_v47 = vmul.f32 -1.442695, %v5094_v39 }
 0x36f   :  { %1770 = vrot.lane.b32.xlu2 %v808_v62, %s4910_s2  ;;  %v4555_v62 = vmul.f32 -1.442695, %v5080_v33 }
 0x371   :  { %4709 = vpow2.f32 %v4555_v62 }
 0x372   :  { %v529_v49 = vpop.trf.xlu1  ;;  %v603_v5 = vpop.trf.xlu0 }
 0x373   :  { %4496 = vmatmul.msk.f32.gmra.mxu2 %vm6153_vm0, %v529_v49  ;;  %4498 = vmatmul.msk.f32.vlgmr.msrb.gmra.mxu3 %vm6153_vm0, %v603_v5  ;;  %v1368_v5 = vrot.slane %v5237_v15, 4 }
 0x374   :  { %4521 = vmatpush.msk.msrb.mxu3 %vm474_vm12, %v1218_v6  ;;  %v1293_v6 = vrot.slane %v5237_v15, 3 }
 0x377   :  { %1798 = vrot.lane.b32.xlu2 %v883_v53, %s4910_s2  ;;  %v828_v59 = vpop.trf.xlu2  ;;  %v4710_v29 = vpop.eup %4709 }
 0x378   :  { %v2146_v46 = vadd.f32 1.0, %v4710_v29 }
 0x37a   :  { %v604_v10 = vpop.trf.xlu0  ;;  %v903_v21 = vpop.trf.xlu1  ;;  %4711 = vrcp.f32 %v2146_v46  ;;  %vm2153_vm11 = vweird.f32 %v2146_v46 }
 0x37b   :  { %4499 = vmatmul.msk.f32.gmra.mxu3 %vm6153_vm0, %v604_v10  ;;  %4507 = vmatmul.msk.f32.vlgmr.msra.gmra.mxu2 %vm6153_vm0, %v828_v59  ;;  %4713 = vpow2.f32 %v4556_v47 }
 0x37c   :  { %4530 = vmatpush.msk.msra.mxu2 %vm474_vm12, %v1443_v19 }
 0x37f   :  { %1742 = vrot.lane.b32.xlu2 %v733_v1, %s4910_s2  ;;  %v829_v14 = vpop.trf.xlu2 }
 0x380   :  { %v4712_v59 = vpop.eup %4711 }
 0x381   :  { %v2149_v10 = vmul.f32 %v4712_v59, %v2146_v46  ;;  %vm2154_vm10 = vweird.f32 %v4712_v59 }
 0x382   :  { %v678_v53 = vpop.trf.xlu0  ;;  %v904_v30 = vpop.trf.xlu1  ;;  %vm2155_vm14 = vmor %vm2153_vm11, %vm2154_vm10 }
 0x383   :  { %4501 = vmatmul.msk.f32.vlgmr.msra.gmra.mxu0 %vm6153_vm0, %v678_v53  ;;  %4510 = vmatmul.msk.f32.vlgmr.msra.gmra.mxu3 %vm6153_vm0, %v903_v21  ;;  %v1593_v21 = vrot.slane %v5237_v15, 7 }
 0x384   :  { %4512 = vmatpush.msk.msra.mxu0 %vm474_vm12, %v994_v27  ;;  %4533 = vmatpush.msk.msra.mxu3 %vm474_vm12, %v1518_v28  ;;  %v2159_v27 = vand.u32 2147483648, %v2146_v46  ;;  %v2157_v28 = vand.u32 2147483647, %v2146_v46 }
 0x385   :  { %4508 = vmatmul.msk.f32.gmra.mxu2 %vm6153_vm0, %v829_v14 }
 0x386   :  { %vm2158_vm15 = vcmp.eq.f32.partialorder %v2157_v28, 8.507059e+37 }
 0x387   :  { %1826 = vrot.lane.b32.xlu2 %v958_v2, %s4910_s2  ;;  %v753_v1 = vpop.trf.xlu2 }
 0x38a   :  { %v679_v44 = vpop.trf.xlu0 }
 0x38b   :  { %4502 = vmatmul.msk.f32.gmra.mxu0 %vm6153_vm0, %v679_v44  ;;  %4511 = vmatmul.msk.f32.gmra.mxu3 %vm6153_vm0, %v904_v30 }
 0x38f   :  { %v754_v49 = vpop.trf.xlu2  ;;  %1882 = vrot.lane.b32.xlu2 %v1107_v3, %s4910_s2  ;;  %v4714_v3 = vpop.eup %4713 }
 0x390   :  { %4505 = vmatmul.msk.f32.vlgmr.msra.gmra.mxu1 %vm6153_vm0, %v754_v49  ;;  %v2147_v19 = vadd.f32 1.0, %v4714_v3 }
 0x391   :  { %4527 = vmatpush.msk.msra.mxu1 %vm474_vm12, %v1368_v5 }
 0x392   :  { %v978_v2 = vpop.trf.xlu1  ;;  %4715 = vrcp.f32 %v2147_v19  ;;  %vm2168_vm11 = vweird.f32 %v2147_v19 }
 0x393   :  { %4504 = vmatmul.msk.f32.vlgmr.msrb.gmra.mxu0 %vm6153_vm0, %v753_v1  ;;  %v2160_v1 = vor.u32 1.1754944e-38, %v2159_v27 }
 0x394   :  { %4524 = vmatpush.msk.msrb.mxu0 %vm474_vm12, %v1293_v6  ;;  %1658 = vrot.lane.b32.xlu0 %v508_v52, %s4910_s2  ;;  %v2150_v52 = vsub.f32 1.0, %v2149_v10  ;;  %v2172_v6 = vand.u32 2147483647, %v2147_v19 }
 0x397   :  { %1910 = vrot.lane.b32.xlu2 %v1182_v57, %s4910_s2  ;;  %v2151_v57 = vmul.f32 %v4712_v59, %v2150_v52 }
 0x398   :  { %v4716_v53 = vpop.eup %4715 }
 0x399   :  { %v2164_v51 = vmul.f32 %v4716_v53, %v2147_v19  ;;  %vm2169_vm10 = vweird.f32 %v4716_v53 }
 0x39a   :  { %v979_v62 = vpop.trf.xlu1 }
 0x39b   :  { %4513 = vmatmul.msk.f32.vlgmr.msra.gmra.mxu0 %vm6153_vm0, %v978_v2  ;;  %v2165_v47 = vsub.f32 1.0, %v2164_v51  ;;  %v2174_v2 = vand.u32 2147483648, %v2147_v19 }
 0x39c   :  { %4536 = vmatpush.msk.msra.mxu0 %vm474_vm12, %v1593_v21  ;;  %2050 = vrot.lane.b32.xlu0 %v1557_v0, %s4910_s2  ;;  %v2152_v0 = vadd.f32 %v4712_v59, %v2151_v57 }
 0x39f   :  { %1854 = vrot.lane.b32.xlu2 %v5159_v54, %s4910_s2 }
 0x3a0   :  { %1686 = vrot.lane.b32.xlu1 %v583_v55, %s4910_s2  ;;  %v2156_v55 = vsel %vm2155_vm14, %v4712_v59, %v2152_v0  ;;  %vm2170_vm14 = vmor %vm2168_vm11, %vm2169_vm10  ;;  %vm6152_vm10 = vcmask 130048   ;;  %vm6158_vm11 = vcmask 1042432  }
 0x3a1   :  { %v2161_v44 = vsel %vm2158_vm15, %v2160_v1, %v2156_v55  ;;  %vm2173_vm15 = vcmp.eq.f32.partialorder %v2172_v6, 8.507059e+37 }
 0x3a2   :  { %v1052_v14 = vpop.trf.xlu1  ;;  %v1127_v15 = vpop.trf.xlu0  ;;  %v2178_v46 = vmul.f32 %v2161_v44, %v5080_v33 }
 0x3a3   :  { %4514 = vmatmul.msk.f32.gmra.mxu0 %vm6153_vm0, %v979_v62  ;;  %4516 = vmatmul.msk.f32.vlgmr.msrb.gmra.mxu1 %vm6153_vm0, %v1052_v14  ;;  %v425_v62 = vperm.slane %v5217_v41, 0 }
 0x3a4   :  { %4519 = vmatmul.msk.f32.vlgmr.msrb.gmra.mxu2 %vm6153_vm0, %v1127_v15 }
 0x3a5   :  { %v427_v19 = vmul.f32 %v425_v62, %v5251_v17  ;;  %v426_v54 = vmul.f32 %v425_v62, %v5246_v20 }
 0x3a7   :  { %1938 = vrot.lane.b32.xlu2 %v1257_v4, %s4910_s2  ;;  %v2166_v4 = vmul.f32 %v4716_v53, %v2165_v47  ;;  %v430_v57 = vmul.f32 1.442695, %v427_v19  ;;  %v428_v14 = vmul.f32 1.442695, %v426_v54 }
 0x3a8   :  { %2022 = vrot.lane.b32.xlu1 %v1482_v60, %s4910_s2 }
 0x3a9   :  { %v2167_v5 = vadd.f32 %v4716_v53, %v2166_v4  ;;  %4717 = vpow2.f32 %v430_v57  ;;  %v501_v4 = vperm.slane %v5217_v41, 1 }
 0x3aa   :  { %v1053_v29 = vpop.trf.xlu1  ;;  %v1128_v30 = vpop.trf.xlu0  ;;  %4719 = vpow2.f32 %v428_v14 }
 0x3ab   :  { %4517 = vmatmul.msk.f32.gmra.mxu1 %vm6153_vm0, %v1053_v29  ;;  %v2171_v33 = vsel %vm2170_vm14, %v4716_v53, %v2167_v5  ;;  %v502_v5 = vmul.f32 %v501_v4, %v5246_v20  ;;  %vm6157_vm14 = vcmask 1043456  }
 0x3ac   :  { %4520 = vmatmul.msk.f32.gmra.mxu2 %vm6153_vm0, %v1128_v30 }
 0x3af   :  { %1994 = vrot.lane.b32.xlu2 %v1407_v58, %s4910_s2  ;;  %v2175_v58 = vor.u32 1.1754944e-38, %v2174_v2 }
 0x3b0   :  { %2182 = vrot.lane.b32.xlu1 %v2178_v46, %s4911_s24 }
 0x3b1   :  { %v2176_v3 = vsel %vm2173_vm15, %v2175_v58, %v2171_v33  ;;  %v576_v33 = vperm.slane %v5217_v41, 2  ;;  %v504_v58 = vmul.f32 1.442695, %v502_v5  ;;  %vm6156_vm15 = vcmask 1044480  }
 0x3b2   :  { %v1202_v60 = vpop.trf.xlu1  ;;  %v1427_v49 = vpop.trf.xlu0  ;;  %v2179_v21 = vmul.f32 %v2176_v3, %v5094_v39 }
 0x3b3   :  { %4522 = vmatmul.msk.f32.vlgmr.msrb.gmra.mxu3 %vm6153_vm0, %v1202_v60  ;;  %v4718_v39 = vpop.eup %4717  ;;  %v503_v60 = vmul.f32 %v501_v4, %v5251_v17  ;;  %v578_v3 = vmul.f32 %v576_v33, %v5251_v17 }
 0x3b4   :  { %4531 = vmatmul.msk.f32.vlgmr.msra.gmra.mxu2 %vm6153_vm0, %v1427_v49  ;;  %v4720_v27 = vpop.eup %4719  ;;  %v1626_v28 = vmul.f32 0.0, %v4718_v39 }
 0x3b5   :  { %v1625_v55 = vmul.f32 0.0, %v4720_v27  ;;  %v506_v6 = vmul.f32 1.442695, %v503_v60  ;;  %v726_v27 = vperm.slane %v5217_v41, 4 }
 0x3b7   :  { %1966 = vrot.lane.b32.xlu2 %v1332_v61, %s4910_s2  ;;  %4721 = vpow2.f32 %v506_v6  ;;  %v727_v6 = vmul.f32 %v726_v27, %v5246_v20 }
 0x3b8   :  { %4723 = vpow2.f32 %v504_v58 }
 0x3b9   :  { %v1630_v47 = vpop.permute.xlu2 %1629  ;;  %v729_v58 = vmul.f32 1.442695, %v727_v6 }
 0x3ba   :  { %v1203_v59 = vpop.trf.xlu1  ;;  %v1428_v10 = vpop.trf.xlu0 }
 0x3bb   :  { %4523 = vmatmul.msk.f32.gmra.mxu3 %vm6153_vm0, %v1203_v59 }
 0x3bc   :  { %4532 = vmatmul.msk.f32.gmra.mxu2 %vm6153_vm0, %v1428_v10  ;;  %v577_v10 = vmul.f32 %v576_v33, %v5246_v20 }
 0x3bd   :  { %v4722_v19 = vpop.eup %4721 }
 0x3be   :  { %v579_v54 = vmul.f32 1.442695, %v577_v10  ;;  %v4724_v57 = vpop.eup %4723 }
 0x3bf   :  { %2184 = vrot.lane.b32.xlu2 %v2179_v21, %s4911_s24  ;;  %v581_v21 = vmul.f32 1.442695, %v578_v3 }
 0x3c1   :  { %v5427_v49 = vpop.permute.xlu2 %1714  ;;  %4725 = vpow2.f32 %v581_v21 }
 0x3c2   :  { %v1277_v61 = vpop.trf.xlu1  ;;  %v1502_v52 = vpop.trf.xlu0  ;;  %4727 = vpow2.f32 %v579_v54 }
 0x3c3   :  { %4525 = vmatmul.msk.f32.vlgmr.msrb.gmra.mxu0 %vm6153_vm0, %v1277_v61  ;;  %4534 = vmatmul.msk.f32.vlgmr.msra.gmra.mxu3 %vm6153_vm0, %v1502_v52  ;;  %v651_v61 = vperm.slane %v5217_v41, 3 }
 0x3c5   :  { %v653_v39 = vmul.f32 %v651_v61, %v5251_v17 }
 0x3c9   :  { %v495_v15 = vpop.f32.mrf.mxu3  ;;  %v5434_v62 = vpop.permute.xlu2 %1770 }
 0x3ca   :  { %v1278_v53 = vpop.trf.xlu1  ;;  %v1503_v0 = vpop.trf.xlu0  ;;  %v1627_v30 = vadd.f32 %v1625_v55, %v495_v15 }
 0x3cb   :  { %4526 = vmatmul.msk.f32.gmra.mxu0 %vm6153_vm0, %v1278_v53  ;;  %4535 = vmatmul.msk.f32.gmra.mxu3 %vm6153_vm0, %v1503_v0 }
 0x3cc   :  { %v1654_v53 = vmul.f32 %v4724_v57, %v1627_v30 }
 0x3d1   :  { %v498_v51 = vpop.f32.mrf.mxu3  ;;  %v5440_v55 = vpop.permute.xlu2 %1798 }
 0x3d2   :  { %v1628_v1 = vadd.f32 %v1626_v28, %v498_v51  ;;  %v1352_v29 = vpop.trf.xlu1  ;;  %v652_v51 = vmul.f32 %v651_v61, %v5246_v20  ;;  %v804_v20 = vmul.f32 1.442695, %v5255_v22 }
 0x3d3   :  { %4528 = vmatmul.msk.f32.vlgmr.msra.gmra.mxu1 %vm6153_vm0, %v1352_v29  ;;  %v4726_v29 = vpop.eup %4725 }
 0x3d4   :  { %1648 = vmatpush.msrb.mxu1 %v1628_v1  ;;  %v1655_v52 = vmul.f32 %v4722_v19, %v1628_v1  ;;  %v656_v1 = vmul.f32 1.442695, %v653_v39  ;;  %v654_v4 = vmul.f32 1.442695, %v652_v51  ;;  %v879_v39 = vmul.f32 1.442695, %v5264_v24 }
 0x3d5   :  { %v954_v24 = vmul.f32 1.442695, %v5267_v25 }
 0x3d6   :  { %1649 = vmatpush.msrb.mxu1 %v1627_v30  ;;  %4729 = vpow2.f32 %v656_v1 }
 0x3d7   :  { %4731 = vpow2.f32 %v654_v4 }
 0x3da   :  { %v1353_v44 = vpop.trf.xlu1 }
 0x3db   :  { %4529 = vmatmul.msk.f32.gmra.mxu1 %vm6153_vm0, %v1353_v44  ;;  %v728_v44 = vmul.f32 %v726_v27, %v5251_v17  ;;  %v806_v17 = vmul.f32 1.442695, %v5258_v23 }
 0x3dd   :  { %v731_v41 = vmul.f32 1.442695, %v728_v44 }
 0x3df   :  { %4733 = vpow2.f32 %v731_v41 }
 0x3e0   :  { %4735 = vpow2.f32 %v729_v58 }
 0x3e1   :  { %4737 = vpow2.f32 %v806_v17 }
 0x3e2   :  { %v1577_v46 = vpop.trf.xlu1  ;;  %4739 = vpow2.f32 %v804_v20  ;;  %v1031_v20 = vmul.f32 1.442695, %v5276_v32 }
 0x3e3   :  { %4537 = vmatmul.msk.f32.vlgmr.msra.gmra.mxu0 %vm6153_vm0, %v1577_v46  ;;  %4539 = vmatmul.msk.f32.vlgmr.msrb.gmra.mxu1 %vm6152_vm10, %v1630_v47  ;;  %v4728_v46 = vpop.eup %4727 }
 0x3e4   :  { %v4730_v10 = vpop.eup %4729 }
 0x3e5   :  { %v4732_v54 = vpop.eup %4731 }
 0x3ea   :  { %v1578_v2 = vpop.trf.xlu1 }
 0x3eb   :  { %4538 = vmatmul.msk.f32.gmra.mxu0 %vm6153_vm0, %v1578_v2  ;;  %vm6154_vm0 = vcmask 1046528  }
 0x3ee   :  { %v570_v59 = vpop.f32.mrf.mxu2 }
 0x3ef   :  { %v1656_v28 = vadd.f32 %v1654_v53, %v570_v59  ;;  %v1743_v59 = vpop.permute.xlu2 %1742 }
 0x3f1   :  { %v1682_v60 = vmul.f32 %v4728_v46, %v1656_v28 }
 0x3f6   :  { %v573_v14 = vpop.f32.mrf.mxu2  ;;  %v645_v15 = vpop.f32.mrf.mxu3 }
 0x3f7   :  { %v1657_v0 = vadd.f32 %v1655_v52, %v573_v14  ;;  %v1684_v33 = vadd.f32 %v1682_v60, %v645_v15  ;;  %v881_v14 = vmul.f32 1.442695, %v5261_v56  ;;  %v4734_v15 = vpop.eup %4733  ;;  %v1827_v56 = vpop.permute.xlu2 %1826 }
 0x3f8   :  { %v4736_v51 = vpop.eup %4735 }
 0x3f9   :  { %1676 = vmatpush.msrb.mxu2 %v1657_v0  ;;  %v1683_v47 = vmul.f32 %v4726_v29, %v1657_v0  ;;  %v1710_v52 = vmul.f32 %v4732_v54, %v1684_v33  ;;  %4741 = vpow2.f32 %v881_v14  ;;  %v4738_v29 = vpop.eup %4737 }
 0x3fa   :  { %4743 = vpow2.f32 %v879_v39  ;;  %v4740_v4 = vpop.eup %4739 }
 0x3fb   :  { %1677 = vmatpush.msrb.mxu2 %v1656_v28  ;;  %v956_v28 = vmul.f32 1.442695, %v5270_v26 }
 0x3fd   :  { %4745 = vpow2.f32 %v956_v28 }
 0x3fe   :  { %v648_v30 = vpop.f32.mrf.mxu3  ;;  %v870_v3 = vpop.f32.mrf.mxu2  ;;  %4747 = vpow2.f32 %v954_v24 }
 0x3ff   :  { %v1685_v5 = vadd.f32 %v1683_v47, %v648_v30  ;;  %v1883_v54 = vpop.permute.xlu2 %1882 }
 0x400   :  { %v720_v2 = vpop.f32.mrf.mxu0 }
 0x401   :  { %1704 = vmatpush.msrb.mxu3 %v1685_v5  ;;  %v1711_v19 = vmul.f32 %v4730_v10, %v1685_v5  ;;  %v1712_v53 = vadd.f32 %v1710_v52, %v720_v2  ;;  %v1029_v5 = vmul.f32 1.442695, %v5273_v31  ;;  %v4742_v2 = vpop.eup %4741 }
 0x402   :  { %v4744_v25 = vpop.eup %4743 }
 0x403   :  { %1705 = vmatpush.msrb.mxu3 %v1684_v33  ;;  %v1738_v1 = vmul.f32 %v4736_v51, %v1712_v53  ;;  %4749 = vpow2.f32 %v1029_v5  ;;  %v4746_v17 = vpop.eup %4745  ;;  %v1255_v5 = vmul.f32 1.442695, %v5294_v43 }
 0x406   :  { %v1659_v21 = vpop.permute.xlu0 %1658  ;;  %v945_v0 = vpop.f32.mrf.mxu3 }
 0x407   :  { %4540 = vmatmul.msk.f32.vlgmr.msrb.gmra.mxu2 %vm6152_vm10, %v1659_v21  ;;  %v1911_v39 = vpop.permute.xlu2 %1910 }
 0x408   :  { %v723_v61 = vpop.f32.mrf.mxu0  ;;  %v873_v44 = vpop.f32.mrf.mxu2 }
 0x409   :  { %v1713_v57 = vadd.f32 %v1711_v19, %v723_v61  ;;  %v1103_v19 = vmul.f32 1.442695, %v5279_v34  ;;  %v4748_v61 = vpop.eup %4747  ;;  %v1105_v34 = vmul.f32 1.442695, %v5282_v36 }
 0x40a   :  { %v4750_v52 = vpop.eup %4749 }
 0x40b   :  { %1732 = vmatpush.msrb.mxu0 %v1713_v57  ;;  %v1739_v23 = vmul.f32 %v4734_v15, %v1713_v57  ;;  %4751 = vpow2.f32 %v1103_v19  ;;  %v1850_v57 = vmul.f32 0.0, %v4750_v52 }
 0x40c   :  { %4753 = vpow2.f32 %v1031_v20 }
 0x40d   :  { %v798_v27 = vpop.f32.mrf.mxu1  ;;  %1733 = vmatpush.msrb.mxu0 %v1712_v53 }
 0x40e   :  { %v1741_v22 = vadd.f32 %v1739_v23, %v798_v27  ;;  %4542 = vmatmul.msk.f32.vlgmr.msrb.gmra.mxu0 %vm6152_vm10, %v5427_v49  ;;  %v948_v6 = vpop.f32.mrf.mxu3 }
 0x40f   :  { %v1855_v24 = vpop.permute.xlu2 %1854 }
 0x410   :  { %v795_v47 = vpop.f32.mrf.mxu0  ;;  %1760 = vmatpush.msra.mxu1 %v1741_v22  ;;  %v1767_v46 = vmul.f32 %v4738_v29, %v1741_v22 }
 0x411   :  { %v1740_v30 = vadd.f32 %v1738_v1, %v795_v47  ;;  %v4752_v23 = vpop.eup %4751 }
 0x412   :  { %v1769_v60 = vadd.f32 %v1767_v46, %v873_v44  ;;  %v1687_v26 = vpop.permute.xlu1 %1686  ;;  %v4754_v28 = vpop.eup %4753 }
 0x413   :  { %v1766_v41 = vmul.f32 %v4740_v4, %v1740_v30  ;;  %4541 = vmatmul.msk.f32.vlgmr.msrb.gmra.mxu3 %vm6152_vm10, %v1687_v26  ;;  %1761 = vmatpush.msra.mxu1 %v1740_v30  ;;  %v1851_v51 = vmul.f32 0.0, %v4754_v28  ;;  %v1253_v30 = vmul.f32 1.442695, %v5288_v38 }
 0x414   :  { %v1795_v49 = vmul.f32 %v4742_v2, %v1769_v60  ;;  %4543 = vmatmul.msk.f32.vlgmr.msra.gmra.mxu1 %vm6152_vm10, %v1743_v59  ;;  %1788 = vmatpush.msra.mxu2 %v1769_v60 }
 0x415   :  { %v1768_v33 = vadd.f32 %v1766_v41, %v870_v3 }
 0x416   :  { %v1797_v58 = vadd.f32 %v1795_v49, %v948_v6  ;;  %v1328_v49 = vmul.f32 1.442695, %v5297_v7  ;;  %v1403_v7 = vmul.f32 1.442695, %v5300_v8 }
 0x417   :  { %1789 = vmatpush.msra.mxu2 %v1768_v33  ;;  %v1794_v10 = vmul.f32 %v4744_v25, %v1768_v33 }
 0x418   :  { %v1020_v21 = vpop.f32.mrf.mxu0  ;;  %4544 = vmatmul.msk.f32.vlgmr.msra.gmra.mxu2 %vm6152_vm10, %v5434_v62  ;;  %1816 = vmatpush.msra.mxu3 %v1797_v58  ;;  %v1823_v31 = vmul.f32 %v4746_v17, %v1797_v58  ;;  %v1178_v62 = vmul.f32 1.442695, %v5285_v37  ;;  %v1180_v37 = vmul.f32 1.442695, %v5291_v40  ;;  %v1330_v17 = vmul.f32 1.442695, %v5303_v9 }
 0x419   :  { %v1796_v59 = vadd.f32 %v1794_v10, %v945_v0  ;;  %v1478_v9 = vmul.f32 1.442695, %v5309_v12 }
 0x41a   :  { %4755 = vpow2.f32 %v1178_v62 }
 0x41b   :  { %v1822_v3 = vmul.f32 %v4748_v61, %v1796_v59  ;;  %1817 = vmatpush.msra.mxu3 %v1796_v59  ;;  %4757 = vpow2.f32 %v1105_v34 }
 0x41c   :  { %4545 = vmatmul.msk.f32.vlgmr.msra.gmra.mxu3 %vm6152_vm10, %v5440_v55  ;;  %4759 = vpow2.f32 %v1180_v37 }
 0x41d   :  { %v1824_v32 = vadd.f32 %v1822_v3, %v1020_v21  ;;  %4761 = vpow2.f32 %v1253_v30  ;;  %v1405_v3 = vmul.f32 1.442695, %v5306_v11  ;;  %v1555_v11 = vmul.f32 1.442695, %v5318_v18  ;;  %v2023_v30 = vpop.permute.xlu1 %2022 }
 0x41e   :  { %4763 = vpow2.f32 %v1255_v5  ;;  %v159_v5 = vld [vmem:[%s6148_s11 + $0x30] sm:$0xff] }
 0x41f   :  { %4765 = vpow2.f32 %v1328_v49  ;;  %v156_v49 = vld [vmem:[%s6148_s11 + $0x18] sm:$0xff] }
 0x420   :  { %v1023_v14 = vpop.f32.mrf.mxu0  ;;  %v1094_v15 = vpop.f32.mrf.mxu1  ;;  %4767 = vpow2.f32 %v1330_v17 }
 0x421   :  { %v1825_v53 = vadd.f32 %v1823_v31, %v1023_v14  ;;  %v1852_v0 = vadd.f32 %v1850_v57, %v1094_v15  ;;  %v4756_v36 = vpop.eup %4755  ;;  %4769 = vpow2.f32 %v1403_v7  ;;  %v1553_v57 = vmul.f32 1.442695, %v5315_v16 }
 0x422   :  { %v4758_v44 = vpop.eup %4757  ;;  %4771 = vpow2.f32 %v1478_v9 }
 0x423   :  { %v1878_v27 = vmul.f32 %v4752_v23, %v1852_v0  ;;  %1844 = vmatpush.msra.mxu0 %v1825_v53  ;;  %v4760_v60 = vpop.eup %4759  ;;  %4773 = vpow2.f32 %v1405_v3 }
 0x424   :  { %v4762_v41 = vpop.eup %4761  ;;  %4775 = vpow2.f32 %v1553_v57  ;;  %v4877_v57 = vld [vmem:[%s6146_s9] sm:$0x7] }
 0x425   :  { %1845 = vmatpush.msra.mxu0 %v1824_v32  ;;  %v4764_v25 = vpop.eup %4763 }
 0x426   :  { %4546 = vmatmul.msk.f32.vlgmr.msra.gmra.mxu0 %vm6152_vm10, %v1827_v56  ;;  %v4766_v31 = vpop.eup %4765 }
 0x427   :  { %v1169_v55 = vpop.f32.mrf.mxu2  ;;  %v4768_v61 = vpop.eup %4767 }
 0x428   :  { %v1880_v22 = vadd.f32 %v1878_v27, %v1169_v55  ;;  %v1097_v29 = vpop.f32.mrf.mxu1  ;;  %v4770_v14 = vpop.eup %4769 }
 0x429   :  { %v1853_v1 = vadd.f32 %v1851_v51, %v1097_v29  ;;  %v4772_v23 = vpop.eup %4771 }
 0x42a   :  { %v1906_v47 = vmul.f32 %v4756_v36, %v1880_v22  ;;  %v4774_v27 = vpop.eup %4773 }
 0x42b   :  { %1872 = vmatpush.msrb.mxu1 %v1853_v1  ;;  %v1879_v46 = vmul.f32 %v4758_v44, %v1853_v1  ;;  %v4776_v55 = vpop.eup %4775 }
 0x42d   :  { %1873 = vmatpush.msrb.mxu1 %v1852_v0  ;;  %v1480_v0 = vmul.f32 1.442695, %v5312_v13 }
 0x42e   :  { %4547 = vmatmul.msk.f32.vlgmr.msrb.gmra.mxu1 %vm6152_vm10, %v1855_v24 }
 0x42f   :  { %v1172_v56 = vpop.f32.mrf.mxu2  ;;  %4777 = vpow2.f32 %v1480_v0 }
 0x430   :  { %v1881_v4 = vadd.f32 %v1879_v46, %v1172_v56  ;;  %4779 = vpow2.f32 %v1555_v11 }
 0x432   :  { %1900 = vmatpush.msrb.mxu2 %v1881_v4  ;;  %v1907_v40 = vmul.f32 %v4760_v60, %v1881_v4 }
 0x434   :  { %1901 = vmatpush.msrb.mxu2 %v1880_v22 }
 0x435   :  { %4548 = vmatmul.msk.f32.vlgmr.msrb.gmra.mxu2 %vm6152_vm10, %v1883_v54  ;;  %v1939_v54 = vpop.permute.xlu2 %1938  ;;  %v4778_v13 = vpop.eup %4777 }
 0x436   :  { %v1244_v26 = vpop.f32.mrf.mxu3  ;;  %v4780_v46 = vpop.eup %4779 }
 0x437   :  { %v1908_v2 = vadd.f32 %v1906_v47, %v1244_v26  ;;  %v1469_v8 = vpop.f32.mrf.mxu2  ;;  %v160_v26 = vld [vmem:[%s6148_s11 + $0x38] sm:$0xff] }
 0x439   :  { %v1934_v6 = vmul.f32 %v4762_v41, %v1908_v2  ;;  %v157_v41 = vld [vmem:[%s6148_s11 + $0x20] sm:$0xff] }
 0x43d   :  { %v1995_v15 = vpop.permute.xlu2 %1994 }
 0x43e   :  { %v1247_v38 = vpop.f32.mrf.mxu3 }
 0x43f   :  { %v1909_v33 = vadd.f32 %v1907_v40, %v1247_v38  ;;  %v1472_v22 = vpop.f32.mrf.mxu2  ;;  %v2051_v40 = vpop.permute.xlu0 %2050  ;;  %v154_v38 = vld [vmem:[%s6148_s11 + $0x8] sm:$0xff] }
 0x440   :  { %v1319_v58 = vpop.f32.mrf.mxu0 }
 0x441   :  { %v1935_v10 = vmul.f32 %v4764_v25, %v1909_v33  ;;  %v1936_v21 = vadd.f32 %v1934_v6, %v1319_v58  ;;  %1928 = vmatpush.msrb.mxu3 %v1909_v33  ;;  %v155_v6 = vld [vmem:[%s6148_s11 + $0x10] sm:$0xff]  ;;  %v153_v33 = vld [vmem:[%s6148_s11] sm:$0xff] }
 0x443   :  { %1929 = vmatpush.msrb.mxu3 %v1908_v2  ;;  %v1962_v19 = vmul.f32 %v4766_v31, %v1936_v21  ;;  %v158_v2 = vld [vmem:[%s6148_s11 + $0x28] sm:$0xff] }
 0x444   :  { %4549 = vmatmul.msk.f32.vlgmr.msrb.gmra.mxu3 %vm6152_vm10, %v1911_v39 }
 0x445   :  { %v1967_v29 = vpop.permute.xlu2 %1966 }
 0x446   :  { %v1544_v53 = vpop.f32.mrf.mxu3 }
 0x448   :  { %v1322_v43 = vpop.f32.mrf.mxu0 }
 0x449   :  { %v1937_v59 = vadd.f32 %v1935_v10, %v1322_v43 }
 0x44b   :  { %1956 = vmatpush.msrb.mxu0 %v1937_v59  ;;  %v1963_v20 = vmul.f32 %v4768_v61, %v1937_v59 }
 0x44d   :  { %1957 = vmatpush.msrb.mxu0 %v1936_v21 }
 0x44e   :  { %4550 = vmatmul.msk.f32.vlgmr.msrb.gmra.mxu0 %vm6152_vm10, %v1939_v54  ;;  %v1547_v1 = vpop.f32.mrf.mxu3 }
 0x450   :  { %v1394_v52 = vpop.f32.mrf.mxu1 }
 0x451   :  { %v1964_v62 = vadd.f32 %v1962_v19, %v1394_v52 }
 0x453   :  { %v1990_v34 = vmul.f32 %v4770_v14, %v1964_v62 }
 0x455   :  { %v1992_v12 = vadd.f32 %v1990_v34, %v1469_v8 }
 0x457   :  { %v2018_v39 = vmul.f32 %v4772_v23, %v1992_v12 }
 0x458   :  { %v1397_v32 = vpop.f32.mrf.mxu1 }
 0x459   :  { %v1965_v28 = vadd.f32 %v1963_v20, %v1397_v32  ;;  %v2020_v16 = vadd.f32 %v2018_v39, %v1544_v53  ;;  %v2183_v39 = vpop.permute.xlu1 %2182 }
 0x45b   :  { %v1991_v51 = vmul.f32 %v4774_v27, %v1965_v28  ;;  %1984 = vmatpush.msra.mxu1 %v1965_v28  ;;  %v2046_v37 = vmul.f32 %v4776_v55, %v2020_v16 }
 0x45d   :  { %v1993_v36 = vadd.f32 %v1991_v51, %v1472_v22  ;;  %1985 = vmatpush.msra.mxu1 %v1964_v62  ;;  %v2135_v62 = vperm.slane %v4877_v57, 2 }
 0x45e   :  { %4551 = vmatmul.msk.f32.vlgmr.msra.gmra.mxu1 %vm6152_vm10, %v1967_v29 }
 0x45f   :  { %2012 = vmatpush.msra.mxu2 %v1993_v36  ;;  %v2019_v44 = vmul.f32 %v4778_v13, %v1993_v36  ;;  %2204 = vmatpush.msrb.mxu1 %v160_v26  ;;  %v2136_v0 = vmul.f32 %v2135_v62, %v5136_v42 }
 0x460   :  { %v1619_v47 = vpop.f32.mrf.mxu0  ;;  %v1651_v58 = vpop.f32.mrf.mxu1 }
 0x461   :  { %v2021_v18 = vadd.f32 %v2019_v44, %v1547_v1  ;;  %2013 = vmatpush.msra.mxu2 %v1992_v12  ;;  %v2048_v60 = vadd.f32 %v2046_v37, %v1619_v47  ;;  %2205 = vmatpush.msrb.mxu1 %v159_v5  ;;  %v2185_v5 = vpop.permute.xlu2 %2184 }
 0x462   :  { %4552 = vmatmul.msk.f32.vlgmr.msra.gmra.mxu2 %vm6152_vm10, %v1995_v15 }
 0x463   :  { %2040 = vmatpush.msra.mxu3 %v2021_v18  ;;  %v2047_v24 = vmul.f32 %v4780_v46, %v2021_v18  ;;  %2206 = vmatpush.msrb.mxu1 %v158_v2 }
 0x465   :  { %2041 = vmatpush.msra.mxu3 %v2020_v16  ;;  %2207 = vmatpush.msrb.mxu1 %v157_v41 }
 0x466   :  { %4553 = vmatmul.msk.f32.vlgmr.msra.gmra.mxu3 %vm6152_vm10, %v2023_v30 }
 0x467   :  { %2208 = vmatpush.msrb.mxu1 %v156_v49 }
 0x468   :  { %v1622_v56 = vpop.f32.mrf.mxu0 }
 0x469   :  { %v2049_v4 = vadd.f32 %v2047_v24, %v1622_v56  ;;  %2209 = vmatpush.msrb.mxu1 %v155_v6 }
 0x46b   :  { %2068 = vmatpush.msra.mxu0 %v2049_v4  ;;  %2210 = vmatpush.msrb.mxu1 %v154_v38 }
 0x46d   :  { %2069 = vmatpush.msra.mxu0 %v2048_v60  ;;  %2211 = vmatpush.msrb.mxu1 %v153_v33  ;;  %v2137_v60 = vmul.f32 %v2135_v62, %v5140_v48 }
 0x46e   :  { %4554 = vmatmul.msk.f32.vlgmr.msra.gmra.mxu0 %vm6152_vm10, %v2051_v40  ;;  %vm6155_vm10 = vcmask 1045504  }
 0x48a   :  { %v1679_v25 = vpop.f32.mrf.mxu2 }
 0x48b   :  { %v2075_v10 = vrot.slane %v1679_v25, 7  ;;  %v1735_v31 = vpop.f32.mrf.mxu0 }
 0x48c   :  { %v2081_v54 = vrot.slane %v1735_v31, 5 }
 0x48d   :  { %v2116_v19 = vsel %vm474_vm12, %v1651_v58, %v2075_v10  ;;  %v4560_v10 = vld [vmem:[%s6142_s5 + $0x20] sm:$0xff] }
 0x491   :  { %v1763_v59 = vpop.f32.mrf.mxu1 }
 0x492   :  { %v2084_v3 = vrot.slane %v1763_v59, 4 }
 0x496   :  { %v1707_v17 = vpop.f32.mrf.mxu3 }
 0x497   :  { %v2078_v21 = vrot.slane %v1707_v17, 6  ;;  %v4562_v17 = vld [vmem:[%s6142_s5 + $0x30] sm:$0xff] }
 0x499   :  { %v2117_v43 = vsel %vm360_vm7, %v2116_v19, %v2078_v21 }
 0x49a   :  { %v2119_v20 = vsel %vm6158_vm11, %v2117_v43, %v2081_v54 }
 0x49b   :  { %v1791_v7 = vpop.f32.mrf.mxu2  ;;  %v2121_v14 = vsel %vm6157_vm14, %v2119_v20, %v2084_v3 }
 0x49c   :  { %v2087_v9 = vrot.slane %v1791_v7, 3 }
 0x49e   :  { %v2123_v15 = vsel %vm6156_vm15, %v2121_v14, %v2087_v9  ;;  %v4683_v9 = vld [vmem:[%s6141_s4 + $0x1] ss:$0 sm:$0xff] }
 0x49f   :  { %v1819_v61 = vpop.f32.mrf.mxu3 }
 0x4a0   :  { %v2090_v52 = vrot.slane %v1819_v61, 2 }
 0x4a2   :  { %v2125_v53 = vsel %vm6155_vm10, %v2123_v15, %v2090_v52 }
 0x4a3   :  { %v1847_v8 = vpop.f32.mrf.mxu0 }
 0x4a4   :  { %v2093_v34 = vrot.slane %v1847_v8, 1 }
 0x4a6   :  { %v2127_v12 = vsel %vm6154_vm0, %v2125_v53, %v2093_v34 }
 0x4a7   :  { %v2138_v23 = vadd.f32 %v2136_v0, %v2127_v12 }
 0x4a9   :  { %v2188_v32 = vmul.f32 %v2183_v39, %v2138_v23 }
 0x4ab   :  { %4557 = vmatmul.msk.f32.vlgmr.msrb.gmra.mxu1 %vm322_vm13, %v2188_v32  ;;  %v1875_v11 = vpop.f32.mrf.mxu1 }
 0x4b8   :  { %v1903_v27 = vpop.f32.mrf.mxu2 }
 0x4b9   :  { %v2096_v55 = vrot.slane %v1903_v27, 7  ;;  %v4572_v27 = vld [vmem:[%s6144_s7 + $0x78] sm:$0xff] }
 0x4ba   :  { %2416 = vmatpush.msrb.mxu3 %v4572_v27 }
 0x4bb   :  { %v2128_v13 = vsel %vm474_vm12, %v1875_v11, %v2096_v55  ;;  %v4569_v55 = vld [vmem:[%s6144_s7 + $0x60] sm:$0xff] }
 0x4c7   :  { %v1931_v28 = vpop.f32.mrf.mxu3 }
 0x4c8   :  { %v2099_v37 = vrot.slane %v1931_v28, 6  ;;  %v4571_v28 = vld [vmem:[%s6144_s7 + $0x70] sm:$0xff] }
 0x4c9   :  { %2417 = vmatpush.msrb.mxu3 %v4571_v28 }
 0x4ca   :  { %v2129_v1 = vsel %vm360_vm7, %v2128_v13, %v2099_v37  ;;  %v4567_v37 = vld [vmem:[%s6144_s7 + $0x50] sm:$0xff]  ;;  %v4564_v13 = vld [vmem:[%s6143_s6 + $0x4] sm:$0xf] }
 0x4cb   :  { %v1959_v16 = vpop.f32.mrf.mxu0 }
 0x4cc   :  { %v2102_v22 = vrot.slane %v1959_v16, 5  ;;  %v4570_v16 = vld [vmem:[%s6144_s7 + $0x68] sm:$0xff] }
 0x4cd   :  { %2418 = vmatpush.msrb.mxu3 %v4570_v16 }
 0x4ce   :  { %v2130_v44 = vsel %vm6158_vm11, %v2129_v1, %v2102_v22  ;;  %v4566_v22 = vld [vmem:[%s6144_s7 + $0x48] sm:$0xff] }
 0x4cf   :  { %2419 = vmatpush.msrb.mxu3 %v4569_v55 }
 0x4db   :  { %v1987_v51 = vpop.f32.mrf.mxu1 }
 0x4dc   :  { %v2105_v36 = vrot.slane %v1987_v51, 4  ;;  %v4568_v51 = vld [vmem:[%s6144_s7 + $0x58] sm:$0xff] }
 0x4dd   :  { %2420 = vmatpush.msrb.mxu3 %v4568_v51 }
 0x4de   :  { %v2131_v18 = vsel %vm6157_vm14, %v2130_v44, %v2105_v36  ;;  %v4565_v36 = vld [vmem:[%s6144_s7 + $0x40] sm:$0xff] }
 0x4df   :  { %2421 = vmatpush.msrb.mxu3 %v4567_v37 }
 0x4e1   :  { %2422 = vmatpush.msrb.mxu3 %v4566_v22 }
 0x4e3   :  { %2423 = vmatpush.msrb.mxu3 %v4565_v36 }
 0x4e5   :  { %v2015_v29 = vpop.f32.mrf.mxu2 }
 0x4e6   :  { %v2108_v42 = vrot.slane %v2015_v29, 3 }
 0x4e8   :  { %v2132_v24 = vsel %vm6156_vm15, %v2131_v18, %v2108_v42  ;;  %v2323_v42 = vperm.slane %v4564_v13, 3 }
 0x4e9   :  { %v2043_v47 = vpop.f32.mrf.mxu3 }
 0x4ea   :  { %v2111_v46 = vrot.slane %v2043_v47, 2 }
 0x4eb   :  { %v2071_v30 = vpop.f32.mrf.mxu0 }
 0x4ec   :  { %v2133_v56 = vsel %vm6155_vm10, %v2132_v24, %v2111_v46  ;;  %v2114_v4 = vrot.slane %v2071_v30, 1  ;;  %v2332_v24 = vperm.slane %v4564_v13, 2 }
 0x4ee   :  { %v2134_v40 = vsel %vm6154_vm0, %v2133_v56, %v2114_v4  ;;  %v2343_v4 = vperm.slane %v4564_v13, 1 }
 0x4ef   :  { %v2139_v26 = vadd.f32 %v2137_v60, %v2134_v40 }
 0x4f1   :  { %v2189_v2 = vmul.f32 %v2185_v5, %v2139_v26 }
 0x4f3   :  { %4558 = vmatmul.msk.f32.gmra.mxu1 %vm322_vm13, %v2189_v2 }
 0x528   :  { %v2213_v41 = vpop.f32.mrf.mxu1 }
 0x529   :  { %v5530_v49 = vadd.f32 %v2213_v41, %v5023_v45  ;;  %v4563_v45 = vld [vmem:[%s6142_s5 + $0x38] sm:$0xff] }
 0x52a   :  { %2312 = vmatpush.msrb.mxu2 %v4563_v45 }
 0x52b   :  { %v2255_v6 = vmul.f32 %v5530_v49, %v5530_v49 }
 0x52c   :  { %2313 = vmatpush.msrb.mxu2 %v4562_v17  ;;  %v5620_v17 = vld [vmem:[%s6146_s9 + $0x4] sm:$0x7] }
 0x52d   :  { %v2257_v38 = vsel %vm163_vm9, %v2255_v6, 0.0 }
 0x52e   :  { %2258 = vadd.xlane.f32.xlu0 %v2257_v38 }
 0x570   :  { %v2216_v33 = vpop.f32.mrf.mxu1 }
 0x571   :  { %v5536_v48 = vadd.f32 %v2216_v33, %v5031_v50  ;;  %v4561_v50 = vld [vmem:[%s6142_s5 + $0x28] sm:$0xff] }
 0x572   :  { %2314 = vmatpush.msrb.mxu2 %v4561_v50 }
 0x573   :  { %v2256_v25 = vmul.f32 %v5536_v48, %v5536_v48 }
 0x574   :  { %2315 = vmatpush.msrb.mxu2 %v4560_v10 }
 0x575   :  { %v2260_v58 = vsel %vm163_vm9, %v2256_v25, 0.0  ;;  %v2354_v25 = vperm.slane %v4564_v13, 0 }
 0x576   :  { %2261 = vadd.xlane.f32.xlu1 %v2260_v58 }
 0x5a1   :  { %v2259_v21 = vpop.xlane.xlu0 %2258 }
 0x5a2   :  { %v2263_v31 = vmul.f32 %v2259_v21, %v5048_v63 }
 0x5a4   :  { %v2265_v19 = vadd.f32 1e-05, %v2263_v31 }
 0x5a6   :  { %4781 = vrsqrt.f32 %v2265_v19  ;;  %vm2273_vm10 = vweird.f32 %v2265_v19 }
 0x5ac   :  { %v4782_v43 = vpop.eup %4781 }
 0x5ad   :  { %v2268_v7 = vmul.f32 %v4782_v43, %v2265_v19  ;;  %vm2274_vm0 = vweird.f32 %v4782_v43 }
 0x5ae   :  { %vm2275_vm15 = vmor %vm2273_vm10, %vm2274_vm0 }
 0x5af   :  { %v2269_v54 = vmul.f32 %v4782_v43, %v2268_v7 }
 0x5b1   :  { %v2270_v59 = vmul.f32 0.5, %v2269_v54 }
 0x5b3   :  { %v2271_v61 = vsub.f32 1.5, %v2270_v59 }
 0x5b5   :  { %v2272_v20 = vmul.f32 %v4782_v43, %v2271_v61 }
 0x5b7   :  { %v2276_v3 = vsel %vm2275_vm15, %v4782_v43, %v2272_v20 }
 0x5b8   :  { %v2287_v52 = vmul.f32 %v2276_v3, %v5530_v49 }
 0x5ba   :  { %v2292_v57 = vmul.f32 %v4683_v9, %v2287_v52 }
 0x5bc   :  { %4585 = vmatmul.msk.f32.vlgmr.msrb.gmra.mxu2 %vm163_vm9, %v2292_v57 }
 0x5e9   :  { %v2262_v62 = vpop.xlane.xlu1 %2261 }
 0x5ea   :  { %v2264_v14 = vmul.f32 %v2262_v62, %v5048_v63 }
 0x5ec   :  { %v2266_v8 = vadd.f32 1e-05, %v2264_v14 }
 0x5ee   :  { %4783 = vrsqrt.f32 %v2266_v8  ;;  %vm2283_vm11 = vweird.f32 %v2266_v8 }
 0x5f4   :  { %v4784_v15 = vpop.eup %4783 }
 0x5f5   :  { %v2278_v34 = vmul.f32 %v4784_v15, %v2266_v8  ;;  %vm2284_vm14 = vweird.f32 %v4784_v15 }
 0x5f6   :  { %vm2285_vm0 = vmor %vm2283_vm11, %vm2284_vm14 }
 0x5f7   :  { %v2279_v53 = vmul.f32 %v4784_v15, %v2278_v34 }
 0x5f9   :  { %v2280_v0 = vmul.f32 0.5, %v2279_v53 }
 0x5fb   :  { %v2281_v12 = vsub.f32 1.5, %v2280_v0 }
 0x5fd   :  { %v2282_v23 = vmul.f32 %v4784_v15, %v2281_v12 }
 0x5ff   :  { %v2286_v39 = vsel %vm2285_vm0, %v4784_v15, %v2282_v23 }
 0x600   :  { %v2288_v32 = vmul.f32 %v2286_v39, %v5536_v48 }
 0x602   :  { %v2293_v11 = vmul.f32 %v4683_v9, %v2288_v32  ;;  %v2359_v9 = vperm.slane %v5620_v17, 0 }
 0x604   :  { %4586 = vmatmul.msk.f32.gmra.mxu2 %vm163_vm9, %v2293_v11 }
 0x63f   :  { %v5583_v29 = vpop.f32.mrf.mxu2 }
 0x640   :  { %v2326_v1 = vrot.slane %v5583_v29, 7  ;;  %v2337_v44 = vrot.slane %v5583_v29, 6  ;;  %v2348_v47 = vrot.slane %v5583_v29, 5  ;;  %v2324_v2 = vmul.f32 %v2323_v42, %v5583_v29 }
 0x687   :  { %v5594_v18 = vpop.f32.mrf.mxu2 }
 0x688   :  { %v2327_v46 = vrot.slane %v5594_v18, 7  ;;  %v2338_v30 = vrot.slane %v5594_v18, 6  ;;  %v2349_v56 = vrot.slane %v5594_v18, 5  ;;  %v2325_v38 = vmul.f32 %v2323_v42, %v5594_v18 }
 0x68a   :  { %v2329_v60 = vsel %vm242_vm1, %v2327_v46, %v2326_v1  ;;  %v2340_v40 = vsel %vm255_vm2, %v2338_v30, %v2337_v44  ;;  %v2351_v26 = vsel %vm268_vm3, %v2349_v56, %v2348_v47  ;;  %v2328_v5 = vsel %vm242_vm1, %v2326_v1, %v2327_v46 }
 0x68b   :  { %v2330_v41 = vsel %vm245_vm4, %v2329_v60, 0.0  ;;  %v2341_v6 = vsel %vm258_vm5, %v2340_v40, 0.0  ;;  %v2331_v58 = vsel %vm245_vm4, %v2328_v5, 0.0  ;;  %v2352_v45 = vsel %vm271_vm6, %v2351_v26, 0.0  ;;  %v4573_v60 = vld [vmem:[%s6145_s8 + $0x2] sm:$0x3] }
 0x68c   :  { %v2333_v33 = vmul.f32 %v2332_v24, %v2330_v41  ;;  %v2334_v50 = vmul.f32 %v2332_v24, %v2331_v58  ;;  %v2339_v10 = vsel %vm255_vm2, %v2337_v44, %v2338_v30  ;;  %v2350_v21 = vsel %vm268_vm3, %v2348_v47, %v2349_v56  ;;  %4591 = vmatpush.msk.msrb.mxu0 %vm360_vm7, %v4573_v60 }
 0x68d   :  { %v2344_v31 = vmul.f32 %v2343_v4, %v2341_v6  ;;  %v2342_v43 = vsel %vm258_vm5, %v2339_v10, 0.0  ;;  %v2353_v7 = vsel %vm271_vm6, %v2350_v21, 0.0  ;;  %v2355_v20 = vmul.f32 %v2354_v25, %v2352_v45 }
 0x68e   :  { %v2335_v19 = vadd.f32 %v2333_v33, %v2324_v2  ;;  %v2336_v54 = vadd.f32 %v2334_v50, %v2325_v38  ;;  %v2345_v59 = vmul.f32 %v2343_v4, %v2342_v43  ;;  %v2356_v52 = vmul.f32 %v2354_v25, %v2353_v7 }
 0x690   :  { %v2346_v61 = vadd.f32 %v2344_v31, %v2335_v19  ;;  %v2347_v3 = vadd.f32 %v2345_v59, %v2336_v54 }
 0x692   :  { %v2357_v57 = vadd.f32 %v2355_v20, %v2346_v61  ;;  %v2358_v62 = vadd.f32 %v2356_v52, %v2347_v3  ;;  %v2431_v61 = vperm.slane %v5620_v17, 1 }
 0x694   :  { %v2360_v14 = vadd.f32 %v2359_v9, %v2357_v57  ;;  %v2361_v8 = vadd.f32 %v2359_v9, %v2358_v62 }
 0x696   :  { %v4587_v15 = vmul.f32 -1.442695, %v2360_v14  ;;  %v4588_v34 = vmul.f32 -1.442695, %v2361_v8 }
 0x698   :  { %4785 = vpow2.f32 %v4587_v15 }
 0x699   :  { %4787 = vpow2.f32 %v4588_v34 }
 0x69e   :  { %v4786_v53 = vpop.eup %4785 }
 0x69f   :  { %v4788_v0 = vpop.eup %4787  ;;  %v2368_v35 = vadd.f32 1.0, %v4786_v53 }
 0x6a0   :  { %v2369_v12 = vadd.f32 1.0, %v4788_v0 }
 0x6a1   :  { %4789 = vrcp.f32 %v2368_v35  ;;  %v2381_v28 = vand.u32 2147483648, %v2368_v35  ;;  %v2379_v51 = vand.u32 2147483647, %v2368_v35  ;;  %vm2375_vm2 = vweird.f32 %v2368_v35 }
 0x6a2   :  { %4791 = vrcp.f32 %v2369_v12  ;;  %v2396_v44 = vand.u32 2147483648, %v2369_v12  ;;  %vm2390_vm6 = vweird.f32 %v2369_v12  ;;  %v2394_v46 = vand.u32 2147483647, %v2369_v12 }
 0x6a3   :  { %v2382_v36 = vor.u32 1.1754944e-38, %v2381_v28  ;;  %vm2380_vm4 = vcmp.eq.f32.partialorder %v2379_v51, 8.507059e+37 }
 0x6a4   :  { %v2397_v30 = vor.u32 1.1754944e-38, %v2396_v44  ;;  %vm2395_vm11 = vcmp.eq.f32.partialorder %v2394_v46, 8.507059e+37 }
 0x6a7   :  { %v4790_v23 = vpop.eup %4789 }
 0x6a8   :  { %v4792_v39 = vpop.eup %4791  ;;  %v2371_v32 = vmul.f32 %v4790_v23, %v2368_v35  ;;  %vm2376_vm1 = vweird.f32 %v4790_v23 }
 0x6a9   :  { %v2386_v11 = vmul.f32 %v4792_v39, %v2369_v12  ;;  %vm2377_vm3 = vmor %vm2375_vm2, %vm2376_vm1  ;;  %vm2391_vm5 = vweird.f32 %v4792_v39  ;;  %vm6163_vm1 = vcmask 7168  }
 0x6aa   :  { %v2372_v27 = vsub.f32 1.0, %v2371_v32  ;;  %vm2392_vm10 = vmor %vm2390_vm6, %vm2391_vm5 }
 0x6ab   :  { %v2387_v16 = vsub.f32 1.0, %v2386_v11  ;;  %vm6164_vm2 = vmmov %vm6163_vm1 }
 0x6ac   :  { %v2373_v55 = vmul.f32 %v4790_v23, %v2372_v27  ;;  %vm6167_vm5 = vmmov %vm6163_vm1 }
 0x6ad   :  { %v2388_v37 = vmul.f32 %v4792_v39, %v2387_v16  ;;  %vm6168_vm6 = vmmov %vm6163_vm1 }
 0x6ae   :  { %v2374_v22 = vadd.f32 %v4790_v23, %v2373_v55 }
 0x6af   :  { %v2389_v42 = vadd.f32 %v4792_v39, %v2388_v37 }
 0x6b0   :  { %v2378_v13 = vsel %vm2377_vm3, %v4790_v23, %v2374_v22  ;;  %vm6165_vm3 = vmmov %vm6163_vm1 }
 0x6b1   :  { %v2383_v1 = vsel %vm2380_vm4, %v2382_v36, %v2378_v13  ;;  %v2393_v24 = vsel %vm2392_vm10, %v4792_v39, %v2389_v42  ;;  %vm6166_vm4 = vmmov %vm6163_vm1 }
 0x6b2   :  { %v5631_v47 = vmul.f32 %v2383_v1, %v2360_v14  ;;  %v2398_v56 = vsel %vm2395_vm11, %v2397_v30, %v2393_v24  ;;  %vm6169_vm10 = vmmov %vm6163_vm1 }
 0x6b3   :  { %v5635_v4 = vmul.f32 %v2398_v56, %v2361_v8  ;;  %vm6170_vm11 = vmmov %vm6163_vm1 }
 0x6b4   :  { %4589 = vmatmul.msk.f32.vlgmr.msrb.gmra.mxu3 %vm322_vm13, %v5631_v47 }
 0x6bc   :  { %4590 = vmatmul.msk.f32.gmra.mxu3 %vm322_vm13, %v5635_v4 }
 0x737   :  { %v5643_v40 = vpop.f32.mrf.mxu3 }
 0x738   :  { %2509 = vrot.lane.b32.xlu2 %v5643_v40, %s4909_s20  ;;  %4592 = vmatmul.msk.f32.vlgmr.msrb.gmra.mxu0 %vm353_vm8, %v5643_v40  ;;  %v2808_v26 = vrot.slane %v5643_v40, 4  ;;  %v2583_v5 = vrot.slane %v5643_v40, 1  ;;  %v2658_v2 = vrot.slane %v5643_v40, 2  ;;  %v2958_v6 = vrot.slane %v5643_v40, 6 }
 0x739   :  { %v2733_v38 = vrot.slane %v5643_v40, 3  ;;  %v2883_v33 = vrot.slane %v5643_v40, 5  ;;  %v3033_v25 = vrot.slane %v5643_v40, 7 }
 0x73a   :  { %2809 = vrot.lane.b32.xlu1 %v2808_v26, %s4909_s20  ;;  %2584 = vrot.lane.b32.xlu0 %v2583_v5, %s4909_s20 }
 0x73f   :  { %v5656_v41 = vpop.f32.mrf.mxu3 }
 0x740   :  { %2659 = vrot.lane.b32.xlu2 %v2658_v2, %s4909_s20  ;;  %4593 = vmatmul.msk.f32.gmra.mxu0 %vm353_vm8, %v5656_v41  ;;  %v3182_v58 = vrot.slane %v5656_v41, 1  ;;  %v3407_v45 = vrot.slane %v5656_v41, 4  ;;  %v3257_v50 = vrot.slane %v5656_v41, 2  ;;  %v3482_v10 = vrot.slane %v5656_v41, 5 }
 0x741   :  { %v3332_v21 = vrot.slane %v5656_v41, 3  ;;  %v3632_v31 = vrot.slane %v5656_v41, 7 }
 0x742   :  { %2959 = vrot.lane.b32.xlu1 %v2958_v6, %s4909_s20  ;;  %2734 = vrot.lane.b32.xlu0 %v2733_v38, %s4909_s20 }
 0x748   :  { %2884 = vrot.lane.b32.xlu2 %v2883_v33, %s4909_s20 }
 0x74a   :  { %3034 = vrot.lane.b32.xlu0 %v3033_v25, %s4909_s20  ;;  %3108 = vrot.lane.b32.xlu1 %v5656_v41, %s4909_s20 }
 0x750   :  { %3183 = vrot.lane.b32.xlu2 %v3182_v58, %s4909_s20 }
 0x752   :  { %3408 = vrot.lane.b32.xlu0 %v3407_v45, %s4909_s20  ;;  %3258 = vrot.lane.b32.xlu1 %v3257_v50, %s4909_s20 }
 0x758   :  { %3483 = vrot.lane.b32.xlu2 %v3482_v10, %s4909_s20 }
 0x75a   :  { %3333 = vrot.lane.b32.xlu1 %v3332_v21, %s4909_s20 }
 0x762   :  { %3633 = vrot.lane.b32.xlu1 %v3632_v31, %s4909_s20 }
 0x76a   :  { %3704 = vrot.lane.b32.xlu1 %v5643_v40, %s4910_s2 }
 0x772   :  { %3732 = vrot.lane.b32.xlu1 %v2583_v5, %s4910_s2 }
 0x792   :  { %v2510_v19 = vpop.permute.xlu2 %2509 }
 0x793   :  { %2512 = vxpose.xlu2.b32.start.end [1/1] (short) (narrow) %v2510_v19, 16 }
 0x79a   :  { %v2660_v43 = vpop.permute.xlu2 %2659 }
 0x79b   :  { %2662 = vxpose.xlu0.b32.start.end [1/1] (short) (narrow) %v2660_v43, 16 }
 0x7a2   :  { %v2885_v7 = vpop.permute.xlu2 %2884 }
 0x7aa   :  { %v3184_v57 = vpop.permute.xlu2 %3183 }
 0x7ab   :  { %2887 = vxpose.xlu0.b32.start.end [1/1] (short) (narrow) %v2885_v7, 16 }
 0x7ac   :  { %v2810_v54 = vpop.permute.xlu1 %2809  ;;  %v2585_v59 = vpop.permute.xlu0 %2584 }
 0x7ad   :  { %2587 = vxpose.xlu1.b32.start.end [1/1] (short) (narrow) %v2585_v59, 16  ;;  %2812 = vxpose.xlu2.b32.start.end [1/1] (short) (narrow) %v2810_v54, 16 }
 0x7b4   :  { %v2960_v20 = vpop.permute.xlu1 %2959  ;;  %v2735_v14 = vpop.permute.xlu0 %2734 }
 0x7b5   :  { %v2458_v9 = vpop.f32.mrf.mxu0 }
 0x7b6   :  { %v2459_v3 = vadd.f32 %v2458_v9, %v2431_v61 }
 0x7b8   :  { %v2470_v52 = vand.u32 2147483647, %v2459_v3  ;;  %v2464_v22 = vmax.f32 %v2459_v3, 0.0  ;;  %vm2466_vm14 = vcmp.ne.f32.partialorder %v2459_v3, %v2459_v3 }
 0x7ba   :  { %v2472_v62 = vsub.f32 0.0, %v2470_v52 }
 0x7bb   :  { %3186 = vxpose.xlu0.b32.start.end [1/1] (short) (narrow) %v3184_v57, 16 }
 0x7bc   :  { %v2474_v8 = vmul.f32 1.442695, %v2472_v62  ;;  %v3109_v15 = vpop.permute.xlu1 %3108  ;;  %v3035_v52 = vpop.permute.xlu0 %3034 }
 0x7bd   :  { %2737 = vxpose.xlu1.b32.start.end [1/1] (short) (narrow) %v2735_v14, 16  ;;  %3111 = vxpose.xlu2.b32.start.end [1/1] (short) (narrow) %v3109_v15, 16  ;;  %v2461_v34 = vpop.f32.mrf.mxu0 }
 0x7be   :  { %4793 = vpow2.f32 %v2474_v8  ;;  %v2462_v53 = vadd.f32 %v2461_v34, %v2431_v61  ;;  %v5725_v8 = vld [vmem:[%s6147_s10 + $0x10] sm:$0xff]  ;;  %v5732_v34 = vld [vmem:[%s6147_s10 + $0x18] sm:$0xff]  ;;  %s4914_s10 = smov 32  }
 0x7c0   :  { %v2471_v0 = vand.u32 2147483647, %v2462_v53  ;;  %v2465_v57 = vmax.f32 %v2462_v53, 0.0  ;;  %vm2467_vm0 = vcmp.ne.f32.partialorder %v2462_v53, %v2462_v53 }
 0x7c2   :  { %v2473_v35 = vsub.f32 0.0, %v2471_v0 }
 0x7c4   :  { %v4794_v12 = vpop.eup %4793  ;;  %v2476_v23 = vmul.f32 1.442695, %v2473_v35  ;;  %v3259_v32 = vpop.permute.xlu1 %3258 }
 0x7c5   :  { %v2478_v17 = vadd.f32 1.0, %v4794_v12  ;;  %v2481_v39 = vmul.f32 -0.5, %v4794_v12  ;;  %v2484_v27 = vand.u32 2147483647, %v4794_v12 }
 0x7c6   :  { %4795 = vpow2.f32 %v2476_v23 }
 0x7c7   :  { %4797 = vlog2.f32 %v2478_v17  ;;  %v2482_v11 = vadd.f32 1.0, %v2481_v39  ;;  %vm2485_vm8 = vcmp.lt.f32.partialorder %v2484_v27, 0.0004427343 }
 0x7c9   :  { %v2483_v37 = vmul.f32 %v4794_v12, %v2482_v11 }
 0x7cb   :  { %3261 = vxpose.xlu0.b32.start.end [1/1] (short) (narrow) %v3259_v32, 16 }
 0x7cc   :  { %v4796_v28 = vpop.eup %4795  ;;  %v3334_v13 = vpop.permute.xlu1 %3333 }
 0x7cd   :  { %v4798_v16 = vpop.eup %4797  ;;  %v2487_v55 = vadd.f32 1.0, %v4796_v28  ;;  %2962 = vxpose.xlu1.b32.start.end [1/1] (short) (narrow) %v2960_v20, 16  ;;  %v2490_v1 = vmul.f32 -0.5, %v4796_v28  ;;  %v2493_v56 = vand.u32 2147483647, %v4796_v28 }
 0x7ce   :  { %v2480_v51 = vmul.f32 0.6931472, %v4798_v16 }
 0x7cf   :  { %4799 = vlog2.f32 %v2487_v55  ;;  %v2491_v30 = vadd.f32 1.0, %v2490_v1  ;;  %vm2494_vm15 = vcmp.lt.f32.partialorder %v2493_v56, 0.0004427343 }
 0x7d0   :  { %v2486_v36 = vsel %vm2485_vm8, %v2483_v37, %v2480_v51  ;;  %vm6171_vm8 = vmmov %vm6163_vm1 }
 0x7d1   :  { %v2496_v42 = vadd.f32 %v2486_v36, %v2464_v22  ;;  %v2492_v20 = vmul.f32 %v4796_v28, %v2491_v30 }
 0x7d3   :  { %v5709_v44 = vsel %vm2466_vm14, %v2459_v3, %v2496_v42  ;;  %vm6172_vm14 = vmmov %vm6163_vm1 }
 0x7d4   :  { %v2500_v46 = vmul.f32 %v5709_v44, %v5631_v47  ;;  %v3634_v9 = vpop.permute.xlu1 %3633  ;;  %v2951_v14 = vperm.slane %v5709_v44, 6  ;;  %v3026_v35 = vperm.slane %v5709_v44, 7 }
 0x7d5   :  { %v4800_v24 = vpop.eup %4799 }
 0x7d6   :  { %v2489_v60 = vmul.f32 0.6931472, %v4800_v24  ;;  %4594 = vmatpush.msk.msra.mxu2 %vm474_vm12, %v2500_v46  ;;  %v2619_v5 = vrot.slane %v2500_v46, 1  ;;  %v2694_v19 = vrot.slane %v2500_v46, 2  ;;  %v2769_v43 = vrot.slane %v2500_v46, 3 }
 0x7d7   :  { %v2844_v7 = vrot.slane %v2500_v46, 4  ;;  %v2919_v54 = vrot.slane %v2500_v46, 5  ;;  %v2994_v59 = vrot.slane %v2500_v46, 6  ;;  %v3069_v61 = vrot.slane %v2500_v46, 7 }
 0x7d8   :  { %4597 = vmatpush.msk.msra.mxu0 %vm474_vm12, %v2619_v5  ;;  %4600 = vmatpush.msk.msra.mxu1 %vm474_vm12, %v2694_v19  ;;  %v2495_v3 = vsel %vm2494_vm15, %v2492_v20, %v2489_v60  ;;  %v5735_v0 = vmul.f32 %v5725_v8, %v2951_v14  ;;  %v5740_v23 = vmul.f32 %v5732_v34, %v2951_v14  ;;  %v3409_v19 = vpop.permute.xlu0 %3408  ;;  %vm6173_vm15 = vmmov %vm6163_vm1 }
 0x7d9   :  { %4603 = vmatpush.msk.msra.mxu3 %vm474_vm12, %v2769_v43  ;;  %4606 = vmatpush.msk.msrb.mxu2 %vm474_vm12, %v2844_v7  ;;  %v2497_v62 = vadd.f32 %v2495_v3, %v2465_v57  ;;  %v5747_v39 = vmul.f32 %v5732_v34, %v3026_v35  ;;  %v3484_v43 = vpop.permute.xlu2 %3483 }
 0x7da   :  { %4609 = vmatpush.msk.msrb.mxu0 %vm474_vm12, %v2919_v54  ;;  %4612 = vmatpush.msk.msrb.mxu1 %vm474_vm12, %v2994_v59  ;;  %v3557_v59 = vrot.slane %v5656_v41, 6 }
 0x7db   :  { %4615 = vmatpush.msk.msrb.mxu3 %vm474_vm12, %v3069_v61  ;;  %3636 = vxpose.xlu0.b32.start.end [1/1] (short) (narrow) %v3634_v9, 16  ;;  %v5727_v15 = vsel %vm2467_vm0, %v2462_v53, %v2497_v62  ;;  %v5744_v53 = vmul.f32 %v5725_v8, %v3026_v35  ;;  %vm6174_vm0 = vmmov %vm6163_vm1 }
 0x7dc   :  { %v3175_v12 = vperm.slane %v5727_v15, 1  ;;  %v3250_v17 = vperm.slane %v5727_v15, 2  ;;  %v3325_v16 = vperm.slane %v5727_v15, 3  ;;  %v3400_v55 = vperm.slane %v5727_v15, 4  ;;  %v5808_v20 = vpop.permute.xlu1 %3704 }
 0x7dd   :  { %3037 = vxpose.xlu1.b32.start.end [1/1] (short) (narrow) %v3035_v52, 16  ;;  %v3475_v42 = vperm.slane %v5727_v15, 5  ;;  %v3550_v1 = vperm.slane %v5727_v15, 6  ;;  %v5798_v7 = vmul.f32 %v5727_v15, %v5635_v4 }
 0x7de   :  { %v5750_v32 = vmul.f32 %v5725_v8, %v3175_v12  ;;  %v5753_v11 = vmul.f32 %v5732_v34, %v3175_v12  ;;  %v5756_v27 = vmul.f32 %v5725_v8, %v3250_v17  ;;  %v5759_v28 = vmul.f32 %v5732_v34, %v3250_v17 }
 0x7df   :  { %v5764_v51 = vmul.f32 %v5725_v8, %v3325_v16  ;;  %v5767_v37 = vmul.f32 %v5732_v34, %v3325_v16  ;;  %v5770_v22 = vmul.f32 %v5725_v8, %v3400_v55  ;;  %v5773_v36 = vmul.f32 %v5732_v34, %v3400_v55 }
 0x7e0   :  { %v5778_v46 = vmul.f32 %v5725_v8, %v3475_v42  ;;  %v5781_v24 = vmul.f32 %v5732_v34, %v3475_v42  ;;  %v5784_v30 = vmul.f32 %v5725_v8, %v3550_v1  ;;  %v5788_v56 = vmul.f32 %v5732_v34, %v3550_v1 }
 0x7e1   :  { %v3293_v3 = vrot.slane %v5798_v7, 2  ;;  %v3443_v57 = vrot.slane %v5798_v7, 4  ;;  %v3218_v17 = vrot.slane %v5798_v7, 1 }
 0x7e4   :  { %v5817_v14 = vpop.permute.xlu1 %3732 }
 0x7ed   :  { %3336 = vxpose.xlu1.b32.start.end [1/1] (short) (narrow) %v3334_v13, 16  ;;  %v3625_v13 = vperm.slane %v5727_v15, 7 }
 0x7ef   :  { %v5791_v60 = vmul.f32 %v5725_v8, %v3625_v13  ;;  %v5794_v5 = vmul.f32 %v5732_v34, %v3625_v13 }
 0x7fd   :  { %3411 = vxpose.xlu1.b32.start.end [1/1] (short) (narrow) %v3409_v19, 16 }
 0x82c   :  { %v2528_v54 = vpop.trf.xlu2 }
 0x82d   :  { %4595 = vmatmul.msk.f32.vlgmr.msra.gmra.mxu2 %vm6163_vm1, %v2528_v54  ;;  %v3368_v54 = vrot.slane %v5798_v7, 3  ;;  %vm6175_vm1 = vmmov %vm6174_vm0 }
 0x82e   :  { %4618 = vmatpush.msk.msra.mxu2 %vm474_vm12, %v5798_v7  ;;  %3558 = vrot.lane.b32.xlu2 %v3557_v59, %s4909_s20 }
 0x834   :  { %v2529_v61 = vpop.trf.xlu2 }
 0x835   :  { %4596 = vmatmul.msk.f32.gmra.mxu2 %vm6164_vm2, %v2529_v61  ;;  %vm6176_vm2 = vmmov %vm6174_vm0 }
 0x83f   :  { %v2678_v9 = vpop.trf.xlu0 }
 0x840   :  { %4601 = vmatmul.msk.f32.vlgmr.msra.gmra.mxu1 %vm6165_vm3, %v2678_v9  ;;  %vm6177_vm3 = vmmov %vm6174_vm0 }
 0x841   :  { %4624 = vmatpush.msk.msra.mxu1 %vm474_vm12, %v3293_v3  ;;  %v3593_v3 = vrot.slane %v5798_v7, 6 }
 0x846   :  { %v2828_v52 = vpop.trf.xlu2 }
 0x847   :  { %4607 = vmatmul.msk.f32.vlgmr.msrb.gmra.mxu2 %vm6166_vm4, %v2828_v52  ;;  %v2679_v62 = vpop.trf.xlu0  ;;  %vm6178_vm4 = vmmov %vm6174_vm0  ;;  %v4659_v52 = vmul.f32 -1.442695, %v5594_v18 }
 0x848   :  { %4630 = vmatpush.msk.msrb.mxu2 %vm474_vm12, %v3443_v57  ;;  %4602 = vmatmul.msk.f32.gmra.mxu1 %vm6167_vm5, %v2679_v62  ;;  %vm6179_vm5 = vmmov %vm6174_vm0 }
 0x849   :  { %4801 = vpow2.f32 %v4659_v52 }
 0x84e   :  { %v2829_v35 = vpop.trf.xlu2 }
 0x84f   :  { %4608 = vmatmul.msk.f32.gmra.mxu2 %vm6168_vm6, %v2829_v35  ;;  %v2903_v16 = vpop.trf.xlu0  ;;  %vm6180_vm6 = vmmov %vm6174_vm0  ;;  %v4802_v62 = vpop.eup %4801 }
 0x851   :  { %v2603_v12 = vpop.trf.xlu1 }
 0x852   :  { %4598 = vmatmul.msk.f32.vlgmr.msra.gmra.mxu0 %vm6169_vm10, %v2603_v12  ;;  %v3668_v12 = vrot.slane %v5798_v7, 7  ;;  %vm6181_vm10 = vmmov %vm6174_vm0 }
 0x853   :  { %4621 = vmatpush.msk.msra.mxu0 %vm474_vm12, %v3218_v17  ;;  %v4216_v17 = vadd.f32 1.0, %v4802_v62 }
 0x854   :  { %3486 = vxpose.xlu2.b32.start.end [1/1] (short) (narrow) %v3484_v43, 16  ;;  %v3518_v43 = vrot.slane %v5798_v7, 5 }
 0x855   :  { %4803 = vrcp.f32 %v4216_v17 }
 0x856   :  { %v3127_v55 = vpop.trf.xlu2 }
 0x857   :  { %4619 = vmatmul.msk.f32.vlgmr.msra.gmra.mxu2 %vm6170_vm11, %v3127_v55  ;;  %v2904_v13 = vpop.trf.xlu0  ;;  %vm6182_vm11 = vmmov %vm6174_vm0 }
 0x859   :  { %v2604_v42 = vpop.trf.xlu1 }
 0x85a   :  { %4599 = vmatmul.msk.f32.gmra.mxu0 %vm6171_vm8, %v2604_v42  ;;  %vm6183_vm8 = vmmov %vm6174_vm0 }
 0x85e   :  { %v3128_v1 = vpop.trf.xlu2 }
 0x85f   :  { %3788 = vrot.lane.b32.xlu1 %v2733_v38, %s4910_s2  ;;  %4620 = vmatmul.msk.f32.gmra.mxu2 %vm6172_vm14, %v3128_v1  ;;  %v3202_v61 = vpop.trf.xlu0  ;;  %vm6184_vm14 = vmmov %vm6174_vm0 }
 0x861   :  { %v2753_v19 = vpop.trf.xlu1 }
 0x862   :  { %4604 = vmatmul.msk.f32.vlgmr.msra.gmra.mxu3 %vm6173_vm15, %v2753_v19  ;;  %4610 = vmatmul.msk.f32.vlgmr.msrb.gmra.mxu0 %vm6174_vm0, %v2903_v16  ;;  %vm6185_vm15 = vmmov %vm6174_vm0 }
 0x863   :  { %4627 = vmatpush.msk.msra.mxu3 %vm474_vm12, %v3368_v54  ;;  %4633 = vmatpush.msk.msrb.mxu0 %vm474_vm12, %v3518_v43  ;;  %v4243_v54 = vand.u32 2147483648, %v4216_v17  ;;  %v4241_v43 = vand.u32 2147483647, %v4216_v17 }
 0x867   :  { %3816 = vrot.lane.b32.xlu1 %v2808_v26, %s4910_s2  ;;  %v3203_v26 = vpop.trf.xlu0 }
 0x869   :  { %v2754_v38 = vpop.trf.xlu1 }
 0x86a   :  { %4605 = vmatmul.msk.f32.gmra.mxu3 %vm6175_vm1, %v2754_v38  ;;  %4611 = vmatmul.msk.f32.gmra.mxu0 %vm6176_vm2, %v2904_v13  ;;  %vm4237_vm2 = vweird.f32 %v4216_v17  ;;  %v4244_v38 = vor.u32 1.1754944e-38, %v4243_v54 }
 0x86f   :  { %3844 = vrot.lane.b32.xlu1 %v2883_v33, %s4910_s2  ;;  %v3277_v33 = vpop.trf.xlu0 }
 0x871   :  { %v2978_v9 = vpop.trf.xlu1 }
 0x872   :  { %4613 = vmatmul.msk.f32.vlgmr.msrb.gmra.mxu1 %vm6177_vm3, %v2978_v9  ;;  %4622 = vmatmul.msk.f32.vlgmr.msra.gmra.mxu0 %vm6178_vm4, %v3202_v61  ;;  %vm4242_vm4 = vcmp.eq.f32.partialorder %v4241_v43, 8.507059e+37  ;;  %v2502_v9 = vperm.slane %v5709_v44, 0 }
 0x873   :  { %4636 = vmatpush.msk.msrb.mxu1 %vm474_vm12, %v3593_v3 }
 0x874   :  { %v2503_v52 = vmul.f32 %v5725_v8, %v2502_v9 }
 0x877   :  { %3872 = vrot.lane.b32.xlu1 %v2958_v6, %s4910_s2  ;;  %v3278_v6 = vpop.trf.xlu0 }
 0x879   :  { %v2979_v57 = vpop.trf.xlu1 }
 0x87a   :  { %4614 = vmatmul.msk.f32.gmra.mxu1 %vm6179_vm5, %v2979_v57  ;;  %4623 = vmatmul.msk.f32.gmra.mxu0 %vm6180_vm6, %v3203_v26  ;;  %vm6186_vm5 = vmmov %vm6174_vm0  ;;  %v2504_v26 = vmul.f32 %v5732_v34, %v2502_v9 }
 0x87b   :  { %vm6187_vm6 = vmmov %vm6174_vm0 }
 0x87f   :  { %3900 = vrot.lane.b32.xlu1 %v3033_v25, %s4910_s2  ;;  %v4804_v25 = vpop.eup %4803 }
 0x880   :  { %v4233_v7 = vmul.f32 %v4804_v25, %v4216_v17  ;;  %vm4238_vm1 = vweird.f32 %v4804_v25 }
 0x881   :  { %v3053_v35 = vpop.trf.xlu1  ;;  %vm4239_vm3 = vmor %vm4237_vm2, %vm4238_vm1 }
 0x882   :  { %4616 = vmatmul.msk.f32.vlgmr.msrb.gmra.mxu3 %vm6181_vm10, %v3053_v35  ;;  %4625 = vmatmul.msk.f32.vlgmr.msra.gmra.mxu1 %vm6182_vm11, %v3277_v33  ;;  %v4234_v1 = vsub.f32 1.0, %v4233_v7  ;;  %v2505_v33 = vmul.f32 1.442695, %v2503_v52  ;;  %v4658_v35 = vmul.f32 -1.442695, %v5583_v29  ;;  %vm6188_vm10 = vcmask 130048   ;;  %vm6189_vm11 = vmmov %vm6174_vm0 }
 0x883   :  { %4639 = vmatpush.msk.msrb.mxu3 %vm474_vm12, %v3668_v12  ;;  %vm6193_vm2 = vmmov %vm6186_vm5 }
 0x887   :  { %3956 = vrot.lane.b32.xlu1 %v3182_v58, %s4910_s2  ;;  %v4235_v58 = vmul.f32 %v4804_v25, %v4234_v1  ;;  %v2576_v1 = vperm.slane %v5709_v44, 1 }
 0x888   :  { %v3559_v16 = vpop.permute.xlu2 %3558 }
 0x889   :  { %v3054_v55 = vpop.trf.xlu1  ;;  %3561 = vxpose.xlu0.b32.start.end [1/1] (short) (narrow) %v3559_v16, 16  ;;  %v4236_v19 = vadd.f32 %v4804_v25, %v4235_v58  ;;  %v3101_v58 = vperm.slane %v5727_v15, 0  ;;  %v2578_v54 = vmul.f32 %v5732_v34, %v2576_v1 }
 0x88a   :  { %4617 = vmatmul.msk.f32.gmra.mxu3 %vm6183_vm8, %v3054_v55  ;;  %4626 = vmatmul.msk.f32.gmra.mxu1 %vm6184_vm14, %v3278_v6  ;;  %vm6190_vm8 = vmmov %vm6174_vm0 }
 0x88b   :  { %v3102_v43 = vmul.f32 %v5725_v8, %v3101_v58  ;;  %v2581_v15 = vmul.f32 1.442695, %v2578_v54 }
 0x88f   :  { %4012 = vrot.lane.b32.xlu1 %v3332_v21, %s4910_s2  ;;  %v4240_v21 = vsel %vm4239_vm3, %v4804_v25, %v4236_v19  ;;  %v2651_v19 = vperm.slane %v5709_v44, 2  ;;  %vm6194_vm3 = vmmov %vm6188_vm10 }
 0x891   :  { %v3352_v42 = vpop.trf.xlu1  ;;  %v2653_v9 = vmul.f32 %v5732_v34, %v2651_v19 }
 0x892   :  { %4628 = vmatmul.msk.f32.vlgmr.msra.gmra.mxu3 %vm6185_vm15, %v3352_v42 }
 0x897   :  { %4068 = vrot.lane.b32.xlu1 %v3482_v10, %s4910_s2  ;;  %v4245_v10 = vsel %vm4242_vm4, %v4244_v38, %v4240_v21  ;;  %vm6195_vm4 = vmmov %vm6193_vm2 }
 0x898   :  { %v4248_v3 = vmul.f32 %v4245_v10, %v5594_v18  ;;  %v3652_v10 = vpop.trf.xlu0 }
 0x899   :  { %v3353_v13 = vpop.trf.xlu1 }
 0x89a   :  { %4629 = vmatmul.msk.f32.gmra.mxu3 %vm6174_vm0, %v3353_v13  ;;  %v2577_v13 = vmul.f32 %v5725_v8, %v2576_v1 }
 0x89c   :  { %v2579_v21 = vmul.f32 1.442695, %v2577_v13 }
 0x89f   :  { %4124 = vrot.lane.b32.xlu1 %v3632_v31, %s4910_s2  ;;  %v2507_v31 = vmul.f32 1.442695, %v2504_v26 }
 0x8a1   :  { %v3427_v61 = vpop.trf.xlu1  ;;  %4805 = vpow2.f32 %v2507_v31 }
 0x8a2   :  { %4631 = vmatmul.msk.f32.vlgmr.msrb.gmra.mxu2 %vm6186_vm5, %v3427_v61  ;;  %4807 = vpow2.f32 %v2505_v33  ;;  %v2652_v61 = vmul.f32 %v5725_v8, %v2651_v19  ;;  %4640 = vmatmul.msk.f32.vlgmr.msrb.gmra.mxu3 %vm6189_vm11, %v3652_v10  ;;  %v2656_v33 = vmul.f32 1.442695, %v2653_v9  ;;  %v2801_v19 = vperm.slane %v5709_v44, 4  ;;  %vm6196_vm5 = vmmov %vm6194_vm3 }
 0x8a3   :  { %4809 = vpow2.f32 %v4658_v35  ;;  %vm6199_vm11 = vmmov %vm6194_vm3 }
 0x8a4   :  { %v2654_v52 = vmul.f32 1.442695, %v2652_v61 }
 0x8a7   :  { %4253 = vrot.lane.b32.xlu1 %v4248_v3, %s4911_s24  ;;  %v4806_v12 = vpop.eup %4805  ;;  %v3104_v3 = vmul.f32 1.442695, %v3102_v43 }
 0x8a8   :  { %v4808_v17 = vpop.eup %4807  ;;  %v3701_v18 = vmul.f32 0.0, %v4806_v12  ;;  %v2726_v12 = vperm.slane %v5709_v44, 3 }
 0x8a9   :  { %v3428_v57 = vpop.trf.xlu1  ;;  %v3700_v16 = vmul.f32 0.0, %v4808_v17  ;;  %v4810_v7 = vpop.eup %4809 }
 0x8aa   :  { %4632 = vmatmul.msk.f32.gmra.mxu2 %vm6187_vm6, %v3428_v57  ;;  %v5886_v42 = vadd.f32 1.0, %v4810_v7  ;;  %vm6197_vm6 = vmmov %vm6194_vm3 }
 0x8ac   :  { %4811 = vrcp.f32 %v5886_v42  ;;  %vm4222_vm14 = vweird.f32 %v5886_v42 }
 0x8ad   :  { %4813 = vpow2.f32 %v2579_v21 }
 0x8ae   :  { %4815 = vpow2.f32 %v2581_v15 }
 0x8af   :  { %4817 = vpow2.f32 %v3104_v3 }
 0x8b0   :  { %v2570_v62 = vpop.f32.mrf.mxu2  ;;  %4819 = vpow2.f32 %v2654_v52  ;;  %v2876_v52 = vperm.slane %v5709_v44, 5  ;;  %v4226_v44 = vand.u32 2147483647, %v5886_v42 }
 0x8b1   :  { %v3702_v25 = vadd.f32 %v3700_v16, %v2570_v62  ;;  %v3103_v62 = vmul.f32 %v5732_v34, %v3101_v58  ;;  %4821 = vpow2.f32 %v2656_v33  ;;  %v2727_v58 = vmul.f32 %v5725_v8, %v2726_v12 }
 0x8b2   :  { %vm4227_vm1 = vcmp.eq.f32.partialorder %v4226_v44, 8.507059e+37 }
 0x8b3   :  { %v3106_v7 = vmul.f32 1.442695, %v3103_v62  ;;  %v2729_v3 = vmul.f32 1.442695, %v2727_v58  ;;  %v2877_v58 = vmul.f32 %v5725_v8, %v2876_v52 }
 0x8b8   :  { %v2573_v6 = vpop.f32.mrf.mxu2 }
 0x8b9   :  { %v3703_v55 = vadd.f32 %v3701_v18, %v2573_v6  ;;  %v3653_v18 = vpop.trf.xlu0  ;;  %v3178_v6 = vmul.f32 1.442695, %v5750_v32 }
 0x8ba   :  { %4641 = vmatmul.msk.f32.gmra.mxu3 %vm6190_vm8, %v3653_v18  ;;  %v3180_v18 = vmul.f32 1.442695, %v5753_v11  ;;  %v2728_v11 = vmul.f32 %v5732_v34, %v2726_v12  ;;  %vm6200_vm8 = vmmov %vm6194_vm3 }
 0x8bb   :  { %3722 = vmatpush.msra.mxu2 %v3703_v55  ;;  %4823 = vpow2.f32 %v3178_v6 }
 0x8bc   :  { %4825 = vpow2.f32 %v3106_v7  ;;  %v2731_v12 = vmul.f32 1.442695, %v2728_v11 }
 0x8bd   :  { %3723 = vmatpush.msra.mxu2 %v3702_v25  ;;  %v2720_v31 = vpop.f32.mrf.mxu1  ;;  %4827 = vpow2.f32 %v2729_v3 }
 0x8be   :  { %4642 = vmatmul.msk.f32.vlgmr.msra.gmra.mxu2 %vm6188_vm10, %v5808_v20  ;;  %v5897_v20 = vpop.eup %4811  ;;  %4829 = vpow2.f32 %v3180_v18  ;;  %vm6198_vm10 = vmmov %vm6194_vm3 }
 0x8bf   :  { %v4218_v26 = vmul.f32 %v5897_v20, %v5886_v42  ;;  %v4814_v16 = vpop.eup %4813  ;;  %vm4223_vm15 = vweird.f32 %v5897_v20 }
 0x8c0   :  { %v4816_v13 = vpop.eup %4815  ;;  %vm5936_vm0 = vmor %vm4222_vm14, %vm4223_vm15 }
 0x8c1   :  { %v4219_v35 = vsub.f32 1.0, %v4218_v26  ;;  %v4818_v54 = vpop.eup %4817  ;;  %v3729_v32 = vmul.f32 %v4816_v13, %v3703_v55  ;;  %v2802_v26 = vmul.f32 %v5725_v8, %v2801_v19  ;;  %vm6201_vm14 = vmmov %vm6194_vm3 }
 0x8c2   :  { %vm6202_vm15 = vmmov %vm6194_vm3 }
 0x8c3   :  { %v4220_v1 = vmul.f32 %v5897_v20, %v4219_v35  ;;  %v4228_v35 = vand.u32 2147483648, %v5886_v42  ;;  %v2804_v13 = vmul.f32 1.442695, %v2802_v26  ;;  %v2878_v26 = vmul.f32 %v5732_v34, %v2876_v52 }
 0x8c5   :  { %3928 = vrot.lane.b32.xlu2 %v5656_v41, %s4910_s2  ;;  %v4221_v10 = vadd.f32 %v5897_v20, %v4220_v1  ;;  %v2723_v9 = vpop.f32.mrf.mxu1  ;;  %4831 = vpow2.f32 %v2804_v13  ;;  %v2881_v44 = vmul.f32 1.442695, %v2878_v26 }
 0x8c6   :  { %4833 = vpow2.f32 %v2731_v12 }
 0x8c7   :  { %v4225_v1 = vsel %vm5936_vm0, %v5897_v20, %v4221_v10  ;;  %vm6203_vm0 = vmmov %vm6193_vm2 }
 0x8ca   :  { %v5899_v38 = vpop.f32.mrf.mxu2 }
 0x8cd   :  { %3984 = vrot.lane.b32.xlu2 %v3257_v50, %s4910_s2  ;;  %v3728_v50 = vmul.f32 %v4814_v16, %v3702_v25  ;;  %v4820_v25 = vpop.eup %4819 }
 0x8ce   :  { %v4822_v15 = vpop.eup %4821 }
 0x8cf   :  { %v2645_v57 = vpop.f32.mrf.mxu0 }
 0x8d0   :  { %v3730_v43 = vadd.f32 %v3728_v50, %v2645_v57  ;;  %v4824_v50 = vpop.eup %4823 }
 0x8d1   :  { %v5926_v55 = vpop.permute.xlu1 %3788  ;;  %v4826_v42 = vpop.eup %4825 }
 0x8d2   :  { %v5911_v17 = vpop.f32.mrf.mxu2  ;;  %v3756_v57 = vmul.f32 %v4820_v25, %v3730_v43  ;;  %v2803_v25 = vmul.f32 %v5732_v34, %v2801_v19  ;;  %v3925_v41 = vmul.f32 0.0, %v4826_v42  ;;  %v4828_v10 = vpop.eup %4827  ;;  %v2954_v19 = vmul.f32 1.442695, %v5735_v0 }
 0x8d3   :  { %v2956_v42 = vmul.f32 1.442695, %v5740_v23  ;;  %v3031_v23 = vmul.f32 1.442695, %v5747_v39 }
 0x8d4   :  { %v2806_v3 = vmul.f32 1.442695, %v2803_v25 }
 0x8d5   :  { %4040 = vrot.lane.b32.xlu2 %v3407_v45, %s4910_s2  ;;  %v3924_v45 = vmul.f32 0.0, %v4818_v54 }
 0x8d7   :  { %v2648_v21 = vpop.f32.mrf.mxu0 }
 0x8d8   :  { %v3731_v61 = vadd.f32 %v3729_v32, %v2648_v21  ;;  %v3758_v32 = vadd.f32 %v3756_v57, %v2720_v31  ;;  %v4830_v31 = vpop.eup %4829 }
 0x8da   :  { %v3169_v33 = vpop.f32.mrf.mxu2  ;;  %3750 = vmatpush.msra.mxu0 %v3731_v61  ;;  %v3757_v62 = vmul.f32 %v4822_v15, %v3731_v61 }
 0x8db   :  { %v5930_v6 = vadd.f32 %v3924_v45, %v3169_v33  ;;  %v5954_v45 = vpop.permute.xlu1 %3816 }
 0x8dc   :  { %v3759_v7 = vadd.f32 %v3757_v62, %v2723_v9  ;;  %3751 = vmatpush.msra.mxu0 %v3730_v43  ;;  %v4229_v43 = vor.u32 1.1754944e-38, %v4228_v35  ;;  %v3784_v9 = vmul.f32 %v4828_v10, %v3758_v32  ;;  %v4832_v35 = vpop.eup %4831 }
 0x8dd   :  { %4096 = vrot.lane.b32.xlu2 %v3557_v59, %s4910_s2  ;;  %v3952_v54 = vmul.f32 %v4824_v50, %v5930_v6  ;;  %v2879_v59 = vmul.f32 1.442695, %v2877_v58  ;;  %v3029_v50 = vmul.f32 1.442695, %v5744_v53  ;;  %v4834_v34 = vpop.eup %4833 }
 0x8de   :  { %3778 = vmatpush.msra.mxu1 %v3759_v7  ;;  %v4230_v20 = vsel %vm4227_vm1, %v4229_v43, %v4225_v1  ;;  %v3785_v11 = vmul.f32 %v4834_v34, %v3759_v7  ;;  %vm6204_vm1 = vmmov %vm6194_vm3 }
 0x8df   :  { %v2945_v21 = vpop.f32.mrf.mxu0  ;;  %v4247_v15 = vmul.f32 %v4230_v20, %v5583_v29  ;;  %4835 = vpow2.f32 %v2879_v59  ;;  %v3253_v29 = vmul.f32 1.442695, %v5756_v27 }
 0x8e0   :  { %3779 = vmatpush.msra.mxu1 %v3758_v32  ;;  %4837 = vpow2.f32 %v2806_v3 }
 0x8e1   :  { %4839 = vpow2.f32 %v2954_v19 }
 0x8e2   :  { %v3172_v61 = vpop.f32.mrf.mxu2  ;;  %4841 = vpow2.f32 %v3253_v29 }
 0x8e3   :  { %v5951_v8 = vadd.f32 %v3925_v41, %v3172_v61  ;;  %4843 = vpow2.f32 %v2881_v44  ;;  %v3845_v32 = vpop.permute.xlu1 %3844 }
 0x8e4   :  { %4845 = vpow2.f32 %v3029_v50 }
 0x8e5   :  { %v2795_v57 = vpop.f32.mrf.mxu3  ;;  %4251 = vrot.lane.b32.xlu2 %v4247_v15, %s4911_s24  ;;  %v3953_v33 = vmul.f32 %v4830_v31, %v5951_v8  ;;  %v4836_v1 = vpop.eup %4835  ;;  %4847 = vpow2.f32 %v2956_v42 }
 0x8e6   :  { %v3786_v62 = vadd.f32 %v3784_v9, %v2795_v57  ;;  %v4838_v27 = vpop.eup %4837 }
 0x8e7   :  { %v2948_v18 = vpop.f32.mrf.mxu0  ;;  %v4840_v53 = vpop.eup %4839 }
 0x8e8   :  { %v3812_v16 = vmul.f32 %v4832_v35, %v3786_v62  ;;  %v4842_v61 = vpop.eup %4841 }
 0x8e9   :  { %v4844_v10 = vpop.eup %4843 }
 0x8ea   :  { %v3814_v52 = vadd.f32 %v3812_v16, %v5899_v38  ;;  %v3255_v38 = vmul.f32 1.442695, %v5759_v28  ;;  %v4846_v9 = vpop.eup %4845 }
 0x8ec   :  { %v3840_v0 = vmul.f32 %v4836_v1, %v3814_v52  ;;  %4849 = vpow2.f32 %v3255_v38 }
 0x8ed   :  { %v2798_v13 = vpop.f32.mrf.mxu3  ;;  %v3502_v58 = vpop.trf.xlu2  ;;  %4851 = vpow2.f32 %v3031_v23 }
 0x8ee   :  { %v3787_v43 = vadd.f32 %v3785_v11, %v2798_v13  ;;  %4634 = vmatmul.msk.f32.vlgmr.msrb.gmra.mxu0 %vm6193_vm2, %v3502_v58  ;;  %v3842_v20 = vadd.f32 %v3840_v0, %v2945_v21  ;;  %vm6205_vm2 = vmmov %vm6203_vm0 }
 0x8ef   :  { %v3020_v12 = vpop.f32.mrf.mxu1  ;;  %v3244_v25 = vpop.f32.mrf.mxu0 }
 0x8f0   :  { %v3813_v41 = vmul.f32 %v4838_v27, %v3787_v43  ;;  %v3868_v7 = vmul.f32 %v4840_v53, %v3842_v20  ;;  %v3954_v59 = vadd.f32 %v3952_v54, %v3244_v25  ;;  %3806 = vmatpush.msrb.mxu2 %v3787_v43  ;;  %v3478_v53 = vmul.f32 1.442695, %v5778_v46 }
 0x8f2   :  { %v3815_v15 = vadd.f32 %v3813_v41, %v5911_v17  ;;  %v5968_v31 = vadd.f32 %v3868_v7, %v3020_v12  ;;  %3807 = vmatpush.msrb.mxu2 %v3786_v62  ;;  %v3980_v21 = vmul.f32 %v4842_v61, %v3954_v59  ;;  %v4848_v17 = vpop.eup %4847  ;;  %v5977_v62 = vpop.permute.xlu1 %3872 }
 0x8f3   :  { %4645 = vmatmul.msk.f32.vlgmr.msrb.gmra.mxu2 %vm6194_vm3, %v5926_v55  ;;  %v4850_v55 = vpop.eup %4849  ;;  %vm6206_vm3 = vmmov %vm6204_vm1 }
 0x8f4   :  { %3834 = vmatpush.msra.mxu3 %v3815_v15  ;;  %v3841_v28 = vmul.f32 %v4844_v10, %v3815_v15  ;;  %v3896_v54 = vmul.f32 %v4846_v9, %v5968_v31  ;;  %v4852_v16 = vpop.eup %4851 }
 0x8f5   :  { %v3503_v3 = vpop.trf.xlu2 }
 0x8f6   :  { %4635 = vmatmul.msk.f32.gmra.mxu0 %vm6195_vm4, %v3503_v3  ;;  %3835 = vmatpush.msra.mxu3 %v3814_v52  ;;  %v3843_v39 = vadd.f32 %v3841_v28, %v2948_v18  ;;  %v3403_v52 = vmul.f32 1.442695, %v5770_v22  ;;  %v3405_v22 = vmul.f32 1.442695, %v5773_v36  ;;  %vm6207_vm4 = vmmov %vm6204_vm1 }
 0x8f7   :  { %v3247_v26 = vpop.f32.mrf.mxu0  ;;  %4646 = vmatmul.msk.f32.vlgmr.msra.gmra.mxu3 %vm6196_vm5, %v5954_v45  ;;  %v3023_v35 = vpop.f32.mrf.mxu1  ;;  %vm6208_vm5 = vmmov %vm6204_vm1 }
 0x8f8   :  { %v3869_v57 = vmul.f32 %v4848_v17, %v3843_v39  ;;  %v3955_v19 = vadd.f32 %v3953_v33, %v3247_v26  ;;  %3946 = vmatpush.msrb.mxu3 %v5951_v8  ;;  %3862 = vmatpush.msrb.mxu0 %v3843_v39  ;;  %v3553_v39 = vmul.f32 1.442695, %v5784_v30  ;;  %v3555_v26 = vmul.f32 1.442695, %v5788_v56 }
 0x8f9   :  { %v3628_v56 = vmul.f32 1.442695, %v5791_v60 }
 0x8fa   :  { %v5979_v29 = vadd.f32 %v3869_v57, %v3023_v35  ;;  %3947 = vmatpush.msrb.mxu3 %v5930_v6  ;;  %3863 = vmatpush.msrb.mxu0 %v3842_v20  ;;  %v3981_v18 = vmul.f32 %v4850_v55, %v3955_v19  ;;  %v3901_v8 = vpop.permute.xlu1 %3900  ;;  %v3328_v6 = vmul.f32 1.442695, %v5764_v51 }
 0x8fc   :  { %v3897_v44 = vmul.f32 %v4852_v16, %v5979_v29  ;;  %4853 = vpow2.f32 %v3328_v6 }
 0x8fd   :  { %4855 = vpow2.f32 %v3403_v52 }
 0x8fe   :  { %4643 = vmatmul.msk.f32.vlgmr.msra.gmra.mxu0 %vm6197_vm6, %v5817_v14  ;;  %vm6209_vm6 = vmmov %vm6204_vm1 }
 0x8ff   :  { %3974 = vmatpush.msra.mxu0 %v3955_v19  ;;  %3760 = vrot.lane.b32.xlu0 %v2658_v2, %s4910_s2  ;;  %v3319_v33 = vpop.f32.mrf.mxu1  ;;  %v3330_v2 = vmul.f32 1.442695, %v5767_v37 }
 0x900   :  { %v5992_v14 = vadd.f32 %v3980_v21, %v3319_v33 }
 0x901   :  { %3975 = vmatpush.msra.mxu0 %v3954_v59  ;;  %4857 = vpow2.f32 %v3330_v2  ;;  %v3480_v59 = vmul.f32 1.442695, %v5781_v24 }
 0x902   :  { %v3957_v50 = vpop.permute.xlu1 %3956  ;;  %v4854_v11 = vpop.eup %4853  ;;  %4859 = vpow2.f32 %v3405_v22  ;;  %v4580_v22 = vld [vmem:[%s6148_s11 + $0x58] sm:$0xff] }
 0x903   :  { %v4008_v51 = vmul.f32 %v4854_v11, %v5992_v14  ;;  %v4856_v42 = vpop.eup %4855  ;;  %4861 = vpow2.f32 %v3478_v53 }
 0x904   :  { %4863 = vpow2.f32 %v3480_v59 }
 0x905   :  { %v3095_v45 = vpop.f32.mrf.mxu3  ;;  %4865 = vpow2.f32 %v3553_v39 }
 0x906   :  { %4647 = vmatmul.msk.f32.vlgmr.msrb.gmra.mxu0 %vm6198_vm10, %v3845_v32  ;;  %v3898_v40 = vadd.f32 %v3896_v54, %v3095_v45  ;;  %4867 = vpow2.f32 %v3555_v26  ;;  %vm6210_vm10 = vmmov %vm6204_vm1 }
 0x907   :  { %v3322_v0 = vpop.f32.mrf.mxu1  ;;  %v4858_v43 = vpop.eup %4857  ;;  %4869 = vpow2.f32 %v3628_v56 }
 0x908   :  { %v3983_v27 = vadd.f32 %v3981_v18, %v3322_v0  ;;  %v4860_v25 = vpop.eup %4859  ;;  %v4582_v0 = vld [vmem:[%s6148_s11 + $0x68] sm:$0xff] }
 0x909   :  { %v4862_v23 = vpop.eup %4861 }
 0x90a   :  { %v4009_v20 = vmul.f32 %v4858_v43, %v3983_v27  ;;  %v4013_v7 = vpop.permute.xlu1 %4012  ;;  %v4864_v28 = vpop.eup %4863 }
 0x90b   :  { %v4866_v19 = vpop.eup %4865 }
 0x90c   :  { %v4868_v18 = vpop.eup %4867 }
 0x90d   :  { %v3098_v34 = vpop.f32.mrf.mxu3  ;;  %v4870_v6 = vpop.eup %4869 }
 0x90e   :  { %v3899_v1 = vadd.f32 %v3897_v44, %v3098_v34  ;;  %4651 = vmatmul.msk.f32.vlgmr.msra.gmra.mxu0 %vm6199_vm11, %v3957_v50  ;;  %vm6211_vm11 = vmmov %vm6204_vm1 }
 0x910   :  { %3918 = vmatpush.msra.mxu2 %v3899_v1 }
 0x912   :  { %3919 = vmatpush.msra.mxu2 %v3898_v40  ;;  %v4069_v30 = vpop.permute.xlu1 %4068 }
 0x913   :  { %4649 = vmatmul.msk.f32.vlgmr.msra.gmra.mxu2 %vm6200_vm8, %v3901_v8  ;;  %v3630_v8 = vmul.f32 1.442695, %v5794_v5  ;;  %v4584_v5 = vld [vmem:[%s6148_s11 + $0x78] sm:$0xff]  ;;  %vm6212_vm8 = vcmask 1042432  }
 0x915   :  { %v3394_v13 = vpop.f32.mrf.mxu3  ;;  %4871 = vpow2.f32 %v3630_v8 }
 0x916   :  { %v4010_v58 = vadd.f32 %v4008_v51, %v3394_v13  ;;  %v4583_v51 = vld [vmem:[%s6148_s11 + $0x70] sm:$0xff]  ;;  %v4581_v13 = vld [vmem:[%s6148_s11 + $0x60] sm:$0xff] }
 0x918   :  { %v4036_v32 = vmul.f32 %v4856_v42, %v4010_v58  ;;  %v4578_v42 = vld [vmem:[%s6148_s11 + $0x48] sm:$0xff] }
 0x91a   :  { %v4125_v11 = vpop.permute.xlu1 %4124 }
 0x91b   :  { %v4872_v1 = vpop.eup %4871 }
 0x91d   :  { %v3397_v37 = vpop.f32.mrf.mxu3 }
 0x91e   :  { %v4011_v12 = vadd.f32 %v4009_v20, %v3397_v37 }
 0x91f   :  { %v3929_v38 = vpop.permute.xlu2 %3928 }
 0x920   :  { %4650 = vmatmul.msk.f32.vlgmr.msrb.gmra.mxu3 %vm6201_vm14, %v3929_v38  ;;  %4030 = vmatpush.msrb.mxu2 %v4011_v12  ;;  %v4037_v41 = vmul.f32 %v4860_v25, %v4011_v12  ;;  %vm6213_vm14 = vcmask 1043456  }
 0x922   :  { %4031 = vmatpush.msrb.mxu2 %v4010_v58  ;;  %v4579_v58 = vld [vmem:[%s6148_s11 + $0x50] sm:$0xff] }
 0x923   :  { %4653 = vmatmul.msk.f32.vlgmr.msrb.gmra.mxu2 %vm6202_vm15, %v4013_v7  ;;  %vm6214_vm15 = vcmask 1044480  }
 0x925   :  { %v3469_v36 = vpop.f32.mrf.mxu2  ;;  %v3694_v33 = vpop.f32.mrf.mxu3 }
 0x926   :  { %v4038_v61 = vadd.f32 %v4036_v32, %v3469_v36 }
 0x927   :  { %v3985_v10 = vpop.permute.xlu2 %3984 }
 0x928   :  { %v4064_v15 = vmul.f32 %v4862_v23, %v4038_v61 }
 0x92d   :  { %v3577_v46 = vpop.trf.xlu0  ;;  %v3472_v21 = vpop.f32.mrf.mxu2 }
 0x92e   :  { %v4039_v9 = vadd.f32 %v4037_v41, %v3472_v21  ;;  %4637 = vmatmul.msk.f32.vlgmr.msrb.gmra.mxu1 %vm6203_vm0, %v3577_v46  ;;  %vm6215_vm0 = vcmask 1045504  }
 0x92f   :  { %3890 = vmatpush.msrb.mxu1 %v5979_v29  ;;  %v4041_v3 = vpop.permute.xlu2 %4040 }
 0x930   :  { %4058 = vmatpush.msra.mxu3 %v4039_v9  ;;  %v4065_v54 = vmul.f32 %v4864_v28, %v4039_v9 }
 0x931   :  { %3891 = vmatpush.msrb.mxu1 %v5968_v31 }
 0x932   :  { %4059 = vmatpush.msra.mxu3 %v4038_v61 }
 0x933   :  { %4654 = vmatmul.msk.f32.vlgmr.msra.gmra.mxu3 %vm6204_vm1, %v4041_v3  ;;  %vm6216_vm1 = vcmask 1046528  }
 0x934   :  { %4273 = vmatpush.msrb.mxu3 %v4584_v5  ;;  %v4254_v5 = vpop.permute.xlu1 %4253 }
 0x935   :  { %v3578_v24 = vpop.trf.xlu0 }
 0x936   :  { %4638 = vmatmul.msk.f32.gmra.mxu1 %vm6205_vm2, %v3578_v24  ;;  %4274 = vmatpush.msrb.mxu3 %v4583_v51  ;;  %vm6217_vm2 = vmmov %vm6212_vm8 }
 0x938   :  { %4275 = vmatpush.msrb.mxu3 %v4582_v0 }
 0x93a   :  { %4276 = vmatpush.msrb.mxu3 %v4581_v13 }
 0x93c   :  { %4277 = vmatpush.msrb.mxu3 %v4580_v22 }
 0x93d   :  { %v3697_v40 = vpop.f32.mrf.mxu3 }
 0x93e   :  { %4278 = vmatpush.msrb.mxu3 %v4579_v58 }
 0x940   :  { %4279 = vmatpush.msrb.mxu3 %v4578_v42 }
 0x941   :  { %v3725_v32 = vpop.f32.mrf.mxu2 }
 0x96b   :  { %v3544_v17 = vpop.f32.mrf.mxu0 }
 0x96c   :  { %v4066_v57 = vadd.f32 %v4064_v15, %v3544_v17  ;;  %v4878_v15 = vld [vmem:[%s6146_s9 + $0x4] sm:$0x7] }
 0x96d   :  { %v4204_v46 = vperm.slane %v4878_v15, 2 }
 0x96e   :  { %v4092_v55 = vmul.f32 %v4866_v19, %v4066_v57 }
 0x96f   :  { %v4205_v39 = vmul.f32 %v4204_v46, %v5631_v47 }
 0x971   :  { %v3761_v35 = vpop.permute.xlu0 %3760 }
 0x972   :  { %4644 = vmatmul.msk.f32.vlgmr.msra.gmra.mxu1 %vm6206_vm3, %v3761_v35  ;;  %vm6218_vm3 = vmmov %vm6213_vm14 }
 0x973   :  { %4002 = vmatpush.msra.mxu1 %v3983_v27  ;;  %v3547_v31 = vpop.f32.mrf.mxu0  ;;  %v4577_v27 = vld [vmem:[%s6148_s11 + $0x40] sm:$0xff] }
 0x974   :  { %v4067_v29 = vadd.f32 %v4065_v54, %v3547_v31  ;;  %4280 = vmatpush.msrb.mxu3 %v4577_v27 }
 0x975   :  { %4003 = vmatpush.msra.mxu1 %v5992_v14 }
 0x976   :  { %4086 = vmatpush.msrb.mxu0 %v4067_v29  ;;  %v4093_v16 = vmul.f32 %v4868_v18, %v4067_v29  ;;  %v3809_v37 = vpop.f32.mrf.mxu2 }
 0x977   :  { %v4155_v25 = vrot.slane %v3809_v37, 5  ;;  %v4339_v37 = vld [vmem:[%s6150_s13 + $0x48] sm:$0xff] }
 0x978   :  { %4087 = vmatpush.msrb.mxu0 %v4066_v57 }
 0x979   :  { %4655 = vmatmul.msk.f32.vlgmr.msrb.gmra.mxu0 %vm6207_vm4, %v4069_v30  ;;  %vm6219_vm4 = vmmov %vm6214_vm15 }
 0x97a   :  { %4648 = vmatmul.msk.f32.vlgmr.msrb.gmra.mxu1 %vm6208_vm5, %v5977_v62  ;;  %v4097_v62 = vpop.permute.xlu2 %4096  ;;  %v3837_v38 = vpop.f32.mrf.mxu3  ;;  %vm6220_vm5 = vmmov %vm6215_vm0 }
 0x97b   :  { %v3753_v43 = vpop.f32.mrf.mxu0  ;;  %v4158_v59 = vrot.slane %v3837_v38, 4  ;;  %v4336_v38 = vld [vmem:[%s6150_s13 + $0x30] sm:$0xff] }
 0x97c   :  { %v4149_v20 = vrot.slane %v3753_v43, 7  ;;  %v4342_v43 = vld [vmem:[%s6150_s13 + $0x60] sm:$0xff] }
 0x97d   :  { %4364 = vmatpush.msra.mxu0 %v4342_v43 }
 0x97e   :  { %v4190_v41 = vsel %vm474_vm12, %v3725_v32, %v4149_v20  ;;  %v4344_v20 = vld [vmem:[%s6150_s13 + $0x70] sm:$0xff] }
 0x982   :  { %4652 = vmatmul.msk.f32.vlgmr.msra.gmra.mxu1 %vm6209_vm6, %v3985_v10  ;;  %v4252_v57 = vpop.permute.xlu2 %4251 }
 0x983   :  { %v3865_v61 = vpop.f32.mrf.mxu0 }
 0x984   :  { %v4161_v21 = vrot.slane %v3865_v61, 3 }
 0x98b   :  { %v3977_v31 = vpop.f32.mrf.mxu0 }
 0x98c   :  { %v4170_v18 = vrot.slane %v3977_v31, 7 }
 0x996   :  { %v3921_v23 = vpop.f32.mrf.mxu2 }
 0x997   :  { %v4167_v54 = vrot.slane %v3921_v23, 1 }
 0x9ab   :  { %v3619_v44 = vpop.f32.mrf.mxu1 }
 0x9ac   :  { %v4094_v45 = vadd.f32 %v4092_v55, %v3619_v44  ;;  %v3949_v55 = vpop.f32.mrf.mxu3 }
 0x9ad   :  { %v4197_v30 = vsel %vm474_vm12, %v3949_v55, %v4170_v18 }
 0x9ae   :  { %v4120_v50 = vmul.f32 %v4870_v6, %v4094_v45 }
 0x9b0   :  { %v4122_v60 = vadd.f32 %v4120_v50, %v3694_v33 }
 0x9b3   :  { %v3622_v34 = vpop.f32.mrf.mxu1 }
 0x9b4   :  { %v4095_v52 = vadd.f32 %v4093_v16, %v3622_v34  ;;  %v4033_v16 = vpop.f32.mrf.mxu2 }
 0x9b5   :  { %v4176_v44 = vrot.slane %v4033_v16, 5 }
 0x9b6   :  { %v4121_v14 = vmul.f32 %v4872_v1, %v4095_v52  ;;  %4114 = vmatpush.msrb.mxu1 %v4095_v52  ;;  %v4061_v8 = vpop.f32.mrf.mxu3 }
 0x9b7   :  { %v4179_v6 = vrot.slane %v4061_v8, 4 }
 0x9b8   :  { %v4123_v2 = vadd.f32 %v4121_v14, %v3697_v40  ;;  %4115 = vmatpush.msrb.mxu1 %v4094_v45 }
 0x9b9   :  { %4656 = vmatmul.msk.f32.vlgmr.msrb.gmra.mxu1 %vm6210_vm10, %v4097_v62 }
 0x9ba   :  { %4142 = vmatpush.msra.mxu2 %v4123_v2  ;;  %v4206_v2 = vmul.f32 %v4204_v46, %v5635_v4 }
 0x9bc   :  { %4143 = vmatpush.msra.mxu2 %v4122_v60 }
 0x9bd   :  { %4657 = vmatmul.msk.f32.vlgmr.msra.gmra.mxu2 %vm6211_vm11, %v4125_v11 }
 0x9be   :  { %4410 = vmatpush.msrb.mxu2 %v4344_v20 }
 0x9ef   :  { %v3781_v53 = vpop.f32.mrf.mxu1 }
 0x9f0   :  { %v4152_v12 = vrot.slane %v3781_v53, 6  ;;  %v4340_v53 = vld [vmem:[%s6150_s13 + $0x50] sm:$0xff] }
 0x9f1   :  { %4411 = vmatpush.msrb.mxu2 %v4340_v53 }
 0x9f2   :  { %v4191_v7 = vsel %vm360_vm7, %v4190_v41, %v4152_v12  ;;  %v4334_v12 = vld [vmem:[%s6150_s13 + $0x20] sm:$0xff] }
 0x9f3   :  { %v4192_v36 = vsel %vm6212_vm8, %v4191_v7, %v4155_v25  ;;  %v4335_v25 = vld [vmem:[%s6150_s13 + $0x28] sm:$0xff]  ;;  %v4330_v41 = vld [vmem:[%s6150_s13] sm:$0xff]  ;;  %4412 = vmatpush.msrb.mxu2 %v4336_v38 }
 0x9f4   :  { %v4193_v10 = vsel %vm6213_vm14, %v4192_v36, %v4158_v59  ;;  %v4331_v7 = vld [vmem:[%s6150_s13 + $0x8] sm:$0xff]  ;;  %v4332_v36 = vld [vmem:[%s6150_s13 + $0x10] sm:$0xff] }
 0x9f5   :  { %v4194_v3 = vsel %vm6214_vm15, %v4193_v10, %v4161_v21  ;;  %4413 = vmatpush.msrb.mxu2 %v4332_v36 }
 0x9f6   :  { %v4089_v33 = vpop.f32.mrf.mxu0 }
 0x9f7   :  { %v3893_v9 = vpop.f32.mrf.mxu1  ;;  %v4182_v52 = vrot.slane %v4089_v33, 3 }
 0x9f8   :  { %v4164_v28 = vrot.slane %v3893_v9, 2 }
 0x9fa   :  { %v4195_v24 = vsel %vm6215_vm0, %v4194_v3, %v4164_v28 }
 0x9fb   :  { %v4196_v17 = vsel %vm6216_vm1, %v4195_v24, %v4167_v54  ;;  %v4684_v54 = vld [vmem:[%s6149_s12] ss:$0 sm:$0xff] }
 0x9fc   :  { %v4207_v26 = vadd.f32 %v4205_v39, %v4196_v17  ;;  %v4345_v17 = vld [vmem:[%s6150_s13 + $0x78] sm:$0xff] }
 0x9fe   :  { %v4257_v19 = vmul.f32 %v4252_v57, %v4207_v26  ;;  %v4341_v26 = vld [vmem:[%s6150_s13 + $0x58] sm:$0xff] }
 0x9ff   :  { %v4005_v35 = vpop.f32.mrf.mxu1  ;;  %v4337_v57 = vld [vmem:[%s6150_s13 + $0x38] sm:$0xff] }
 0xa00   :  { %4660 = vmatmul.msk.f32.vlgmr.msrb.gmra.mxu3 %vm322_vm13, %v4257_v19  ;;  %v4173_v29 = vrot.slane %v4005_v35, 6  ;;  %v4333_v19 = vld [vmem:[%s6150_s13 + $0x18] sm:$0xff] }
 0xa02   :  { %v4198_v56 = vsel %vm360_vm7, %v4197_v30, %v4173_v29  ;;  %vm6221_vm7 = vmmov %vm6216_vm1 }
 0xa03   :  { %v4199_v47 = vsel %vm6217_vm2, %v4198_v56, %v4176_v44 }
 0xa04   :  { %v4200_v34 = vsel %vm6218_vm3, %v4199_v47, %v4179_v6 }
 0xa05   :  { %v4201_v14 = vsel %vm6219_vm4, %v4200_v34, %v4182_v52 }
 0xa36   :  { %v4117_v45 = vpop.f32.mrf.mxu1 }
 0xa37   :  { %v4185_v50 = vrot.slane %v4117_v45, 2 }
 0xa39   :  { %v4202_v62 = vsel %vm6220_vm5, %v4201_v14, %v4185_v50 }
 0xa40   :  { %v4145_v1 = vpop.f32.mrf.mxu2 }
 0xa41   :  { %v4188_v40 = vrot.slane %v4145_v1, 1 }
 0xa43   :  { %v4203_v60 = vsel %vm6221_vm7, %v4202_v62, %v4188_v40 }
 0xa44   :  { %v4208_v11 = vadd.f32 %v4206_v2, %v4203_v60 }
 0xa46   :  { %v4258_v51 = vmul.f32 %v4254_v5, %v4208_v11 }
 0xa48   :  { %4661 = vmatmul.msk.f32.gmra.mxu3 %vm322_vm13, %v4258_v51 }
 0xa83   :  { %v4282_v0 = vpop.f32.mrf.mxu3 }
 0xa84   :  { %v4288_v13 = vadd.f32 %v4282_v0, %v5530_v49  ;;  %v4343_v49 = vld [vmem:[%s6150_s13 + $0x68] sm:$0xff] }
 0xa85   :  { %4387 = vmatpush.msra.mxu1 %v4343_v49 }
 0xa86   :  { %v4291_v22 = vmul.f32 %v4288_v13, %v4288_v13 }
 0xa87   :  { %4388 = vmatpush.msra.mxu1 %v4339_v37 }
 0xa88   :  { %v4293_v58 = vsel %vm163_vm9, %v4291_v22, 0.0 }
 0xa89   :  { %4294 = vadd.xlane.f32.xlu2 %v4293_v58  ;;  %4389 = vmatpush.msra.mxu1 %v4335_v25 }
 0xa8b   :  { %4390 = vmatpush.msra.mxu1 %v4331_v7 }
 0xacb   :  { %v4285_v42 = vpop.f32.mrf.mxu3 }
 0xacc   :  { %v6067_v27 = vadd.f32 %v4285_v42, %v5536_v48  ;;  %v4338_v48 = vld [vmem:[%s6150_s13 + $0x40] sm:$0xff]  ;;  %s4912_s13 = smov [#allocation2]  }
 0xacd   :  { %4365 = vmatpush.msra.mxu0 %v4338_v48  ;;  %s4456_s4 = sshll.u32 %s4912_s13, 4  ;;  %s4457_s4 = int_to_ptr.vmem [resolvable:$true] %s4456_s4 }
 0xace   :  { %v4292_v4 = vmul.f32 %v6067_v27, %v6067_v27 }
 0xacf   :  { %4366 = vmatpush.msra.mxu0 %v4334_v12 }
 0xad0   :  { %v4296_v32 = vsel %vm163_vm9, %v4292_v4, 0.0 }
 0xad1   :  { %4297 = vadd.xlane.f32.xlu1 %v4296_v32  ;;  %4367 = vmatpush.msra.mxu0 %v4330_v41 }
 0xad3   :  { %4433 = vmatpush.msrb.mxu0 %v4345_v17 }
 0xad5   :  { %4434 = vmatpush.msrb.mxu0 %v4341_v26 }
 0xad7   :  { %4435 = vmatpush.msrb.mxu0 %v4337_v57 }
 0xad9   :  { %4436 = vmatpush.msrb.mxu0 %v4333_v19 }
 0xafc   :  { %v4295_v59 = vpop.xlane.xlu2 %4294 }
 0xafd   :  { %v4299_v61 = vmul.f32 %v4295_v59, %v5048_v63 }
 0xaff   :  { %v4301_v23 = vadd.f32 1e-05, %v4299_v61 }
 0xb01   :  { %4873 = vrsqrt.f32 %v4301_v23  ;;  %vm4309_vm12 = vweird.f32 %v4301_v23 }
 0xb07   :  { %v4874_v10 = vpop.eup %4873 }
 0xb08   :  { %v4304_v15 = vmul.f32 %v4874_v10, %v4301_v23  ;;  %vm4310_vm13 = vweird.f32 %v4874_v10 }
 0xb09   :  { %vm4311_vm6 = vmor %vm4309_vm12, %vm4310_vm13 }
 0xb0a   :  { %v4305_v46 = vmul.f32 %v4874_v10, %v4304_v15 }
 0xb0c   :  { %v4306_v21 = vmul.f32 0.5, %v4305_v46 }
 0xb0e   :  { %v4307_v9 = vsub.f32 1.5, %v4306_v21 }
 0xb10   :  { %v4308_v28 = vmul.f32 %v4874_v10, %v4307_v9 }
 0xb12   :  { %v4312_v3 = vsel %vm4311_vm6, %v4874_v10, %v4308_v28 }
 0xb13   :  { %v4323_v24 = vmul.f32 %v4312_v3, %v4288_v13 }
 0xb15   :  { %v4328_v39 = vmul.f32 %v4684_v54, %v4323_v24 }
 0xb17   :  { %4662 = vmatmul.msk.f32.vlgmr.msra.gmra.mxu0 %vm163_vm9, %v4328_v39  ;;  %4664 = vmatmul.msk.f32.vlgmr.msra.gmra.mxu1 %vm163_vm9, %v4328_v39 }
 0xb18   :  { %4666 = vmatmul.msk.f32.vlgmr.msrb.gmra.mxu2 %vm163_vm9, %v4328_v39 }
 0xb44   :  { %v4298_v55 = vpop.xlane.xlu1 %4297 }
 0xb45   :  { %v4300_v35 = vmul.f32 %v4298_v55, %v5048_v63 }
 0xb47   :  { %v4302_v31 = vadd.f32 1e-05, %v4300_v35 }
 0xb49   :  { %4875 = vrsqrt.f32 %v4302_v31  ;;  %vm4319_vm11 = vweird.f32 %v4302_v31 }
 0xb4f   :  { %v4876_v29 = vpop.eup %4875 }
 0xb50   :  { %v4314_v18 = vmul.f32 %v4876_v29, %v4302_v31  ;;  %vm4320_vm10 = vweird.f32 %v4876_v29 }
 0xb51   :  { %vm4321_vm8 = vmor %vm4319_vm11, %vm4320_vm10 }
 0xb52   :  { %v4315_v16 = vmul.f32 %v4876_v29, %v4314_v18 }
 0xb54   :  { %v4316_v30 = vmul.f32 0.5, %v4315_v16 }
 0xb56   :  { %v4317_v56 = vsub.f32 1.5, %v4316_v30 }
 0xb58   :  { %v4318_v44 = vmul.f32 %v4876_v29, %v4317_v56 }
 0xb5a   :  { %v4322_v8 = vsel %vm4321_vm8, %v4876_v29, %v4318_v44 }
 0xb5b   :  { %v4324_v47 = vmul.f32 %v4322_v8, %v6067_v27 }
 0xb5d   :  { %v4329_v45 = vmul.f32 %v4684_v54, %v4324_v47 }
 0xb5f   :  { %4663 = vmatmul.msk.f32.gmra.mxu0 %vm163_vm9, %v4329_v45  ;;  %4665 = vmatmul.msk.f32.gmra.mxu1 %vm163_vm9, %v4329_v45 }
 0xb60   :  { %4667 = vmatmul.msk.f32.gmra.mxu2 %vm163_vm9, %v4329_v45 }
 0xb67   :  { %4668 = vmatmul.msk.f32.vlgmr.msrb.gmra.mxu0 %vm163_vm9, %v4328_v39 }
 0xb6f   :  { %4669 = vmatmul.msk.f32.gmra.mxu0 %vm163_vm9, %v4329_v45 }
 0xb94   :  { %v4369_v63 = vpop.f32.mrf.mxu0  ;;  %v4392_v6 = vpop.f32.mrf.mxu1 }
 0xb95   :  { %4444 = vst [vmem:[#allocation2] sm:$0xff] %v4369_v63 }
 0xb96   :  { %4445 = vst [vmem:[#allocation2 + $0x8] sm:$0xff] %v4392_v6 }
 0xb9b   :  { %v4415_v33 = vpop.f32.mrf.mxu2 }
 0xb9c   :  { %4446 = vst [vmem:[#allocation2 + $0x10] sm:$0xff] %v4415_v33 }
 0xbdc   :  { %v4372_v50 = vpop.f32.mrf.mxu0  ;;  %v4395_v34 = vpop.f32.mrf.mxu1 }
 0xbdd   :  { %4448 = vst [vmem:[#allocation2 + $0x20] sm:$0xff] %v4372_v50 }
 0xbde   :  { %4449 = vst [vmem:[#allocation2 + $0x28] sm:$0xff] %v4395_v34 }
 0xbe3   :  { %v4418_v52 = vpop.f32.mrf.mxu2 }
 0xbe4   :  { %4450 = vst [vmem:[#allocation2 + $0x30] sm:$0xff] %v4418_v52  ;;  %v4438_v1 = vpop.f32.mrf.mxu0 }
 0xbe5   :  { %4447 = vst [vmem:[#allocation2 + $0x18] sm:$0xff] %v4438_v1 }
 0xbec   :  { %v4441_v14 = vpop.f32.mrf.mxu0 }
 0xbed   :  { %4451 = vst [vmem:[#allocation2 + $0x38] sm:$0xff] %v4441_v14 }
 0xbee   :  { %4464 = dma.vmem_to_hbm [thread:$0]  %s4457_s4, 1024, %s4459_s18, [#allocation3], %s4913_s19, %s4913_s19, %s4914_s10  }
 0xbef   :  { %4903 = dma.done.wait [#allocation3], 1024  }
 0xbf0   :  { %4904 = vsyncadd [#allocation3], 4294966272 }
 0xbf1   :  { %4469 = vsyncpa [#allocation3], 1 }

</bundles_post_ra>
